<compile_context>
chip_gen: v7x
topology: tpu7x:2x2x1
jax: 0.10.0
libtpu: 0.0.40
codegen_flags: <defaults>
</compile_context>

<pallas_src>
import functools

import jax
import jax.numpy as jnp
import numpy as np
from jax.experimental import pallas as pl
from jax.experimental.pallas import tpu as pltpu

num_points = 10
num_streamlines = 128
OUT_FEATS = 3 * num_streamlines * num_points   # 3840
HIDDEN = 512                                   # width of the last hidden layer
TN = 1920                                      # final-layer output tile (15*128); 3840/TN = 2
NUM_TILES = OUT_FEATS // TN


def pointnet_head_kernel(tom_ref, seed_ref,
                         w1_ref, b1_ref, w2_ref, b2_ref,
                         sw1_ref, sb1_ref, sw2_ref, sb2_ref,
                         w3t_ref, w3s_ref, b3_ref, w4_ref, b4_ref,
                         w5_ref, b5_ref,
                         out_ref, *, batch, n_tom, n_seed):
    bf = jnp.bfloat16
    f32 = jnp.float32

    # ---- tom branch: two 1x1 convs (channel matmuls) + relu, max over points ----
    t = jnp.dot(tom_ref[...], w1_ref[...], preferred_element_type=f32) + b1_ref[...]
    t = jnp.maximum(t, 0.0)
    t = jnp.dot(t.astype(bf), w2_ref[...], preferred_element_type=f32) + b2_ref[...]
    t = jnp.maximum(t, 0.0)
    t = jnp.max(t.reshape(batch, n_tom, 32), axis=1)            # (B, 32) == MaxPool1d

    # ---- seed branch ----
    s = jnp.dot(seed_ref[...], sw1_ref[...], preferred_element_type=f32) + sb1_ref[...]
    s = jnp.maximum(s, 0.0)
    s = jnp.dot(s.astype(bf), sw2_ref[...], preferred_element_type=f32) + sb2_ref[...]
    s = jnp.maximum(s, 0.0)
    s = jnp.max(s.reshape(batch, n_seed, 64), axis=1)           # (B, 64)

    # ---- MLP head; concat fused: [t, s] @ W3 == t @ W3[:32] + s @ W3[32:] ----
    h = (jnp.dot(t.astype(bf), w3t_ref[...], preferred_element_type=f32)
         + jnp.dot(s.astype(bf), w3s_ref[...], preferred_element_type=f32)
         + b3_ref[...])
    h = jnp.maximum(h, 0.0)
    h = jnp.dot(h.astype(bf), w4_ref[...], preferred_element_type=f32) + b4_ref[...]
    h = jnp.maximum(h, 0.0)                                     # (B, 512)

    # ---- final layer: one lane-dense (B, TN) output tile per grid step ----
    # (hidden recompute above is <1 us and hides under / is tiny next to the
    #  pipelined ~2 MB bf16 w5 tile DMA; this makes the grid axis fully parallel)
    out_ref[...] = (jnp.dot(h.astype(bf), w5_ref[...], preferred_element_type=f32)
                    + b5_ref[...])


def init_params(key, dtype=jnp.float32):
    """Deterministic synthetic parameters.  Weights stored as (in, out) so the
    kernel does y = x @ W + b (equivalent to Conv1d k=1 / Linear)."""
    ks = jax.random.split(key, 7)

    def w(k, shape, fan_in):
        return jax.random.normal(k, shape, dtype) / jnp.sqrt(jnp.asarray(fan_in, dtype))

    return (
        w(ks[0], (6, 64), 6),    jnp.zeros((1, 64), dtype),                       # mlp_1
        w(ks[1], (64, 32), 64),  jnp.zeros((1, 32), dtype),                       # mlp_2
        w(ks[2], (3, 32), 3),    jnp.zeros((1, 32), dtype),                       # seed_mlp_1
        w(ks[3], (32, 64), 32),  jnp.zeros((1, 64), dtype),                       # seed_mlp_2
        w(ks[4], (96, 256), 96), 0.01 * jnp.ones((1, 256), dtype),                # linear_1
        w(ks[5], (256, 512), 256), 0.01 * jnp.ones((1, 512), dtype),              # linear_2
        w(ks[6], (512, OUT_FEATS), 512), 0.01 * jnp.ones((1, OUT_FEATS), dtype),  # linear_3
    )


def prepare_params(params):
    """ONE-TIME weight prep (call once, reuse across all forward calls):
      * cast weights to bf16 (halves the dominant HBM weight traffic),
      * pre-split w3 so the fused concat needs no in-kernel sublane slicing,
      * re-lay-out w5 as (NUM_TILES, HIDDEN, TN) so each grid tile is one
        fully contiguous HBM slab.
    Biases stay f32 (accumulation is f32)."""
    (w1, b1, w2, b2, sw1, sb1, sw2, sb2, w3, b3, w4, b4, w5, b5) = params
    bf = jnp.bfloat16
    w1b, w2b, sw1b, sw2b, w4b = (w.astype(bf) for w in (w1, w2, sw1, sw2, w4))
    w3t = w3[:32, :].astype(bf)
    w3s = w3[32:, :].astype(bf)
    # (HIDDEN, OUT_FEATS) -> (NUM_TILES, HIDDEN, TN); tile j == W[:, j*TN:(j+1)*TN]
    w5b = w5.astype(bf).reshape(HIDDEN, NUM_TILES, TN).transpose(1, 0, 2)
    prepped = (w1b, b1, w2b, b2, sw1b, sb1, sw2b, sb2,
               w3t, w3s, b3, w4b, b4, w5b, b5)
    return jax.block_until_ready(prepped)


def custom_model_forward(tom_cloud, seeds_cloud, prepped):
    """tom_cloud: (B, 6, N_tom) NCW; seeds_cloud: (B, 3, N_seed) NCW.
    `prepped` is the output of prepare_params() (computed once, not per call)."""
    (w1b, b1, w2b, b2, sw1b, sb1, sw2b, sb2,
     w3t, w3s, b3, w4b, b4, w5b, b5) = prepped
    bf = jnp.bfloat16

    B, _, Nt = tom_cloud.shape
    _, _, Ns = seeds_cloud.shape

    # Tiny per-call activation prep (few KB): NCW -> points-major, flatten, bf16.
    tom = jnp.transpose(tom_cloud, (0, 2, 1)).reshape(B * Nt, 6).astype(bf)
    seeds = jnp.transpose(seeds_cloud, (0, 2, 1)).reshape(B * Ns, 3).astype(bf)

    kernel = functools.partial(pointnet_head_kernel, batch=B, n_tom=Nt, n_seed=Ns)

    def full_spec(arr):
        nd = arr.ndim
        return pl.BlockSpec(arr.shape, lambda j, _nd=nd: (0,) * _nd)

    resident = (tom, seeds,
                w1b, b1, w2b, b2,
                sw1b, sb1, sw2b, sb2,
                w3t, w3s, b3, w4b, b4)
    in_specs = [full_spec(a) for a in resident]
    in_specs += [
        # w5 tile: contiguous (HIDDEN, TN) slab per grid step, double-buffered by Pallas.
        pl.BlockSpec((None, HIDDEN, TN), lambda j: (j, 0, 0)),
        pl.BlockSpec((1, TN), lambda j: (0, j)),                 # b5 tile
    ]

    out = pl.pallas_call(
        kernel,
        out_shape=jax.ShapeDtypeStruct((B, OUT_FEATS), jnp.float32),
        grid_spec=pltpu.PrefetchScalarGridSpec(
            num_scalar_prefetch=0,
            grid=(NUM_TILES,),
            in_specs=in_specs,
            out_specs=pl.BlockSpec((B, TN), lambda j: (0, j)),
        ),
        compiler_params=pltpu.CompilerParams(
            # No cross-step state (hidden recomputed per step) -> feature axis is
            # truly parallel; on v7x the two TensorCores each take one w5 tile.
            dimension_semantics=("parallel",),
        ),
    )(*resident, w5b, b5)

    # Keep the (B, 3, 1280) view in the wrapper; the kernel's store stays lane-dense.
    return out.reshape(B, 3, num_streamlines * num_points)


def reference_forward(tom_cloud, seeds_cloud, params):
    """Pure-JAX f32 reference mirroring the PyTorch forward."""
    (w1, b1, w2, b2, sw1, sb1, sw2, sb2, w3, b3, w4, b4, w5, b5) = params
    tom = jnp.transpose(tom_cloud, (0, 2, 1)).astype(jnp.float32)    # (B, Nt, 6)
    seeds = jnp.transpose(seeds_cloud, (0, 2, 1)).astype(jnp.float32)

    t = jax.nn.relu(tom @ w1 + b1)
    t = jax.nn.relu(t @ w2 + b2)
    t = jnp.max(t, axis=1)                    # (B, 32)
    s = jax.nn.relu(seeds @ sw1 + sb1)
    s = jax.nn.relu(s @ sw2 + sb2)
    s = jnp.max(s, axis=1)                    # (B, 64)
    x = jnp.concatenate([t, s], axis=1)       # (B, 96)
    x = jax.nn.relu(x @ w3 + b3)
    x = jax.nn.relu(x @ w4 + b4)
    x = x @ w5 + b5
    return x.reshape(-1, 3, num_streamlines * num_points)


if __name__ == "__main__":
    key = jax.random.PRNGKey(0)
    k_tom, k_seed, k_param = jax.random.split(key, 3)

    B, N_TOM, N_SEED = 2, 64, 32
    tom_cloud = jax.random.normal(k_tom, (B, 6, N_TOM), jnp.float32)      # NCW, like PyTorch
    seeds_cloud = jax.random.normal(k_seed, (B, 3, N_SEED), jnp.float32)  # NCW, like PyTorch

    params = init_params(k_param)
    prepped = prepare_params(params)   # one-time weight prep (NOT per forward call)

    out = custom_model_forward(tom_cloud, seeds_cloud, prepped)
    out = jax.block_until_ready(out)

    ref = jax.block_until_ready(reference_forward(tom_cloud, seeds_cloud, params))

    assert out.shape == (B, 3, num_streamlines * num_points), out.shape
    # Tolerance relaxed for the bf16 weight/activation path (f32 accumulation).
    assert np.allclose(np.asarray(out), np.asarray(ref), rtol=2e-2, atol=2e-2), \
        "Pallas kernel does not match JAX reference"

    print("KERNEL_OK")
</pallas_src>

<mosaic_0001>
module attributes {stable_mosaic.version = 11 : i64} {
  func.func @pointnet_head_kernel(%arg0: i32, %arg1: memref<128x6xbf16, #tpu.memory_space<vmem>>, %arg2: memref<64x3xbf16, #tpu.memory_space<vmem>>, %arg3: memref<6x64xbf16, #tpu.memory_space<vmem>>, %arg4: memref<1x64xf32, #tpu.memory_space<vmem>>, %arg5: memref<64x32xbf16, #tpu.memory_space<vmem>>, %arg6: memref<1x32xf32, #tpu.memory_space<vmem>>, %arg7: memref<3x32xbf16, #tpu.memory_space<vmem>>, %arg8: memref<1x32xf32, #tpu.memory_space<vmem>>, %arg9: memref<32x64xbf16, #tpu.memory_space<vmem>>, %arg10: memref<1x64xf32, #tpu.memory_space<vmem>>, %arg11: memref<32x256xbf16, #tpu.memory_space<vmem>>, %arg12: memref<64x256xbf16, #tpu.memory_space<vmem>>, %arg13: memref<1x256xf32, #tpu.memory_space<vmem>>, %arg14: memref<256x512xbf16, #tpu.memory_space<vmem>>, %arg15: memref<1x512xf32, #tpu.memory_space<vmem>>, %arg16: memref<1x512x1920xbf16, #tpu.memory_space<vmem>>, %arg17: memref<1x1920xf32, #tpu.memory_space<vmem>>, %arg18: memref<2x1920xf32, #tpu.memory_space<vmem>>) attributes {dimension_semantics = [#tpu.dimension_semantics<parallel>], iteration_bounds = array<i64: 2>, scalar_prefetch = 0 : i64, scratch_operands = 0 : i64, tpu.core_type = #tpu.core_type<tc>, window_params = [{pipeline_mode = #tpu.pipeline_mode<synchronous>, transform_indices = @transform_0, window_bounds = array<i64: 128, 6>}, {pipeline_mode = #tpu.pipeline_mode<synchronous>, transform_indices = @transform_1, window_bounds = array<i64: 64, 3>}, {pipeline_mode = #tpu.pipeline_mode<synchronous>, transform_indices = @transform_2, window_bounds = array<i64: 6, 64>}, {pipeline_mode = #tpu.pipeline_mode<synchronous>, transform_indices = @transform_3, window_bounds = array<i64: 1, 64>}, {pipeline_mode = #tpu.pipeline_mode<synchronous>, transform_indices = @transform_4, window_bounds = array<i64: 64, 32>}, {pipeline_mode = #tpu.pipeline_mode<synchronous>, transform_indices = @transform_5, window_bounds = array<i64: 1, 32>}, {pipeline_mode = #tpu.pipeline_mode<synchronous>, transform_indices = @transform_6, window_bounds = array<i64: 3, 32>}, {pipeline_mode = #tpu.pipeline_mode<synchronous>, transform_indices = @transform_7, window_bounds = array<i64: 1, 32>}, {pipeline_mode = #tpu.pipeline_mode<synchronous>, transform_indices = @transform_8, window_bounds = array<i64: 32, 64>}, {pipeline_mode = #tpu.pipeline_mode<synchronous>, transform_indices = @transform_9, window_bounds = array<i64: 1, 64>}, {pipeline_mode = #tpu.pipeline_mode<synchronous>, transform_indices = @transform_10, window_bounds = array<i64: 32, 256>}, {pipeline_mode = #tpu.pipeline_mode<synchronous>, transform_indices = @transform_11, window_bounds = array<i64: 64, 256>}, {pipeline_mode = #tpu.pipeline_mode<synchronous>, transform_indices = @transform_12, window_bounds = array<i64: 1, 256>}, {pipeline_mode = #tpu.pipeline_mode<synchronous>, transform_indices = @transform_13, window_bounds = array<i64: 256, 512>}, {pipeline_mode = #tpu.pipeline_mode<synchronous>, transform_indices = @transform_14, window_bounds = array<i64: 1, 512>}, {transform_indices = @transform_15, window_bounds = array<i64: 1, 512, 1920>}, {transform_indices = @transform_16, window_bounds = array<i64: 1, 1920>}, {transform_indices = @transform_17, window_bounds = array<i64: 2, 1920>}]} {
    %c0 = arith.constant 0 : index
    %c0_0 = arith.constant 0 : index
    %0 = vector.load %arg1[%c0, %c0_0] : memref<128x6xbf16, #tpu.memory_space<vmem>>, vector<128x6xbf16>
    %c0_1 = arith.constant 0 : index
    %c0_2 = arith.constant 0 : index
    %1 = vector.load %arg3[%c0_1, %c0_2] : memref<6x64xbf16, #tpu.memory_space<vmem>>, vector<6x64xbf16>
    %cst = arith.constant dense<0.000000e+00> : vector<128x64xf32>
    %2 = tpu.matmul %0, %1, %cst {dimension_numbers = #tpu.dot_dimension_numbers<[1], [0], [0], [1], [0, 0, 1, 1], [], []>} : vector<128x6xbf16>, vector<6x64xbf16>, vector<128x64xf32> -> vector<128x64xf32>
    %c0_3 = arith.constant 0 : index
    %c0_4 = arith.constant 0 : index
    %3 = vector.load %arg4[%c0_3, %c0_4] : memref<1x64xf32, #tpu.memory_space<vmem>>, vector<1x64xf32>
    %4 = vector.broadcast %3 : vector<1x64xf32> to vector<128x64xf32>
    %5 = arith.addf %2, %4 : vector<128x64xf32>
    %cst_5 = arith.constant 0.000000e+00 : f32
    %6 = vector.broadcast %cst_5 : f32 to vector<128x64xf32>
    %7 = arith.maximumf %5, %6 : vector<128x64xf32>
    %8 = arith.truncf %7 : vector<128x64xf32> to vector<128x64xbf16>
    %c0_6 = arith.constant 0 : index
    %c0_7 = arith.constant 0 : index
    %9 = vector.load %arg5[%c0_6, %c0_7] : memref<64x32xbf16, #tpu.memory_space<vmem>>, vector<64x32xbf16>
    %cst_8 = arith.constant dense<0.000000e+00> : vector<128x32xf32>
    %10 = tpu.matmul %8, %9, %cst_8 {dimension_numbers = #tpu.dot_dimension_numbers<[1], [0], [0], [1], [0, 0, 1, 1], [], []>} : vector<128x64xbf16>, vector<64x32xbf16>, vector<128x32xf32> -> vector<128x32xf32>
    %c0_9 = arith.constant 0 : index
    %c0_10 = arith.constant 0 : index
    %11 = vector.load %arg6[%c0_9, %c0_10] : memref<1x32xf32, #tpu.memory_space<vmem>>, vector<1x32xf32>
    %12 = vector.broadcast %11 : vector<1x32xf32> to vector<128x32xf32>
    %13 = arith.addf %10, %12 : vector<128x32xf32>
    %cst_11 = arith.constant 0.000000e+00 : f32
    %14 = vector.broadcast %cst_11 : f32 to vector<128x32xf32>
    %15 = arith.maximumf %13, %14 : vector<128x32xf32>
    %16 = vector.shape_cast %15 : vector<128x32xf32> to vector<2x64x32xf32>
    %cst_12 = arith.constant dense<0xFF800000> : vector<2x32xf32>
    %17 = vector.multi_reduction <maximumf>, %16, %cst_12 [1] : vector<2x64x32xf32> to vector<2x32xf32>
    %c0_13 = arith.constant 0 : index
    %c0_14 = arith.constant 0 : index
    %18 = vector.load %arg2[%c0_13, %c0_14] : memref<64x3xbf16, #tpu.memory_space<vmem>>, vector<64x3xbf16>
    %c0_15 = arith.constant 0 : index
    %c0_16 = arith.constant 0 : index
    %19 = vector.load %arg7[%c0_15, %c0_16] : memref<3x32xbf16, #tpu.memory_space<vmem>>, vector<3x32xbf16>
    %cst_17 = arith.constant dense<0.000000e+00> : vector<64x32xf32>
    %20 = tpu.matmul %18, %19, %cst_17 {dimension_numbers = #tpu.dot_dimension_numbers<[1], [0], [0], [1], [0, 0, 1, 1], [], []>} : vector<64x3xbf16>, vector<3x32xbf16>, vector<64x32xf32> -> vector<64x32xf32>
    %c0_18 = arith.constant 0 : index
    %c0_19 = arith.constant 0 : index
    %21 = vector.load %arg8[%c0_18, %c0_19] : memref<1x32xf32, #tpu.memory_space<vmem>>, vector<1x32xf32>
    %22 = vector.broadcast %21 : vector<1x32xf32> to vector<64x32xf32>
    %23 = arith.addf %20, %22 : vector<64x32xf32>
    %cst_20 = arith.constant 0.000000e+00 : f32
    %24 = vector.broadcast %cst_20 : f32 to vector<64x32xf32>
    %25 = arith.maximumf %23, %24 : vector<64x32xf32>
    %26 = arith.truncf %25 : vector<64x32xf32> to vector<64x32xbf16>
    %c0_21 = arith.constant 0 : index
    %c0_22 = arith.constant 0 : index
    %27 = vector.load %arg9[%c0_21, %c0_22] : memref<32x64xbf16, #tpu.memory_space<vmem>>, vector<32x64xbf16>
    %cst_23 = arith.constant dense<0.000000e+00> : vector<64x64xf32>
    %28 = tpu.matmul %26, %27, %cst_23 {dimension_numbers = #tpu.dot_dimension_numbers<[1], [0], [0], [1], [0, 0, 1, 1], [], []>} : vector<64x32xbf16>, vector<32x64xbf16>, vector<64x64xf32> -> vector<64x64xf32>
    %c0_24 = arith.constant 0 : index
    %c0_25 = arith.constant 0 : index
    %29 = vector.load %arg10[%c0_24, %c0_25] : memref<1x64xf32, #tpu.memory_space<vmem>>, vector<1x64xf32>
    %30 = vector.broadcast %29 : vector<1x64xf32> to vector<64x64xf32>
    %31 = arith.addf %28, %30 : vector<64x64xf32>
    %cst_26 = arith.constant 0.000000e+00 : f32
    %32 = vector.broadcast %cst_26 : f32 to vector<64x64xf32>
    %33 = arith.maximumf %31, %32 : vector<64x64xf32>
    %34 = vector.shape_cast %33 : vector<64x64xf32> to vector<2x32x64xf32>
    %cst_27 = arith.constant dense<0xFF800000> : vector<2x64xf32>
    %35 = vector.multi_reduction <maximumf>, %34, %cst_27 [1] : vector<2x32x64xf32> to vector<2x64xf32>
    %36 = arith.truncf %17 : vector<2x32xf32> to vector<2x32xbf16>
    %c0_28 = arith.constant 0 : index
    %c0_29 = arith.constant 0 : index
    %37 = vector.load %arg11[%c0_28, %c0_29] : memref<32x256xbf16, #tpu.memory_space<vmem>>, vector<32x256xbf16>
    %cst_30 = arith.constant dense<0.000000e+00> : vector<2x256xf32>
    %38 = tpu.matmul %36, %37, %cst_30 {dimension_numbers = #tpu.dot_dimension_numbers<[1], [0], [0], [1], [0, 0, 1, 1], [], []>} : vector<2x32xbf16>, vector<32x256xbf16>, vector<2x256xf32> -> vector<2x256xf32>
    %39 = arith.truncf %35 : vector<2x64xf32> to vector<2x64xbf16>
    %c0_31 = arith.constant 0 : index
    %c0_32 = arith.constant 0 : index
    %40 = vector.load %arg12[%c0_31, %c0_32] : memref<64x256xbf16, #tpu.memory_space<vmem>>, vector<64x256xbf16>
    %cst_33 = arith.constant dense<0.000000e+00> : vector<2x256xf32>
    %41 = tpu.matmul %39, %40, %cst_33 {dimension_numbers = #tpu.dot_dimension_numbers<[1], [0], [0], [1], [0, 0, 1, 1], [], []>} : vector<2x64xbf16>, vector<64x256xbf16>, vector<2x256xf32> -> vector<2x256xf32>
    %42 = arith.addf %38, %41 : vector<2x256xf32>
    %c0_34 = arith.constant 0 : index
    %c0_35 = arith.constant 0 : index
    %43 = vector.load %arg13[%c0_34, %c0_35] : memref<1x256xf32, #tpu.memory_space<vmem>>, vector<1x256xf32>
    %44 = vector.broadcast %43 : vector<1x256xf32> to vector<2x256xf32>
    %45 = arith.addf %42, %44 : vector<2x256xf32>
    %cst_36 = arith.constant 0.000000e+00 : f32
    %46 = vector.broadcast %cst_36 : f32 to vector<2x256xf32>
    %47 = arith.maximumf %45, %46 : vector<2x256xf32>
    %48 = arith.truncf %47 : vector<2x256xf32> to vector<2x256xbf16>
    %c0_37 = arith.constant 0 : index
    %c0_38 = arith.constant 0 : index
    %49 = vector.load %arg14[%c0_37, %c0_38] : memref<256x512xbf16, #tpu.memory_space<vmem>>, vector<256x512xbf16>
    %cst_39 = arith.constant dense<0.000000e+00> : vector<2x512xf32>
    %50 = tpu.matmul %48, %49, %cst_39 {dimension_numbers = #tpu.dot_dimension_numbers<[1], [0], [0], [1], [0, 0, 1, 1], [], []>} : vector<2x256xbf16>, vector<256x512xbf16>, vector<2x512xf32> -> vector<2x512xf32>
    %c0_40 = arith.constant 0 : index
    %c0_41 = arith.constant 0 : index
    %51 = vector.load %arg15[%c0_40, %c0_41] : memref<1x512xf32, #tpu.memory_space<vmem>>, vector<1x512xf32>
    %52 = vector.broadcast %51 : vector<1x512xf32> to vector<2x512xf32>
    %53 = arith.addf %50, %52 : vector<2x512xf32>
    %cst_42 = arith.constant 0.000000e+00 : f32
    %54 = vector.broadcast %cst_42 : f32 to vector<2x512xf32>
    %55 = arith.maximumf %53, %54 : vector<2x512xf32>
    %56 = arith.truncf %55 : vector<2x512xf32> to vector<2x512xbf16>
    %c0_43 = arith.constant 0 : index
    %c0_44 = arith.constant 0 : index
    %c0_45 = arith.constant 0 : index
    %57 = vector.load %arg16[%c0_43, %c0_44, %c0_45] : memref<1x512x1920xbf16, #tpu.memory_space<vmem>>, vector<1x512x1920xbf16>
    %58 = vector.shape_cast %57 : vector<1x512x1920xbf16> to vector<512x1920xbf16>
    %cst_46 = arith.constant dense<0.000000e+00> : vector<2x1920xf32>
    %59 = tpu.matmul %56, %58, %cst_46 {dimension_numbers = #tpu.dot_dimension_numbers<[1], [0], [0], [1], [0, 0, 1, 1], [], []>} : vector<2x512xbf16>, vector<512x1920xbf16>, vector<2x1920xf32> -> vector<2x1920xf32>
    %c0_47 = arith.constant 0 : index
    %c0_48 = arith.constant 0 : index
    %60 = vector.load %arg17[%c0_47, %c0_48] : memref<1x1920xf32, #tpu.memory_space<vmem>>, vector<1x1920xf32>
    %61 = vector.broadcast %60 : vector<1x1920xf32> to vector<2x1920xf32>
    %62 = arith.addf %59, %61 : vector<2x1920xf32>
    %c0_49 = arith.constant 0 : index
    %c0_50 = arith.constant 0 : index
    %63 = vector.load %arg18[%c0_49, %c0_50] : memref<2x1920xf32, #tpu.memory_space<vmem>>, vector<2x1920xf32>
    tpu.vector_store %arg18[%c0_49, %c0_50], %62 {strides = array<i32>} : memref<2x1920xf32, #tpu.memory_space<vmem>>, vector<2x1920xf32>,
    return
  }
  func.func @transform_0(%arg0: i32) -> (i32, i32) {
    %c0_i32 = arith.constant 0 : i32
    %c0_i32_0 = arith.constant 0 : i32
    %c0_i32_1 = arith.constant 0 : i32
    return %c0_i32, %c0_i32_0 : i32, i32
  }
  func.func @transform_1(%arg0: i32) -> (i32, i32) {
    %c0_i32 = arith.constant 0 : i32
    %c0_i32_0 = arith.constant 0 : i32
    %c0_i32_1 = arith.constant 0 : i32
    return %c0_i32, %c0_i32_0 : i32, i32
  }
  func.func @transform_2(%arg0: i32) -> (i32, i32) {
    %c0_i32 = arith.constant 0 : i32
    %c0_i32_0 = arith.constant 0 : i32
    %c0_i32_1 = arith.constant 0 : i32
    return %c0_i32, %c0_i32_0 : i32, i32
  }
  func.func @transform_3(%arg0: i32) -> (i32, i32) {
    %c0_i32 = arith.constant 0 : i32
    %c0_i32_0 = arith.constant 0 : i32
    %c0_i32_1 = arith.constant 0 : i32
    return %c0_i32, %c0_i32_0 : i32, i32
  }
  func.func @transform_4(%arg0: i32) -> (i32, i32) {
    %c0_i32 = arith.constant 0 : i32
    %c0_i32_0 = arith.constant 0 : i32
    %c0_i32_1 = arith.constant 0 : i32
    return %c0_i32, %c0_i32_0 : i32, i32
  }
  func.func @transform_5(%arg0: i32) -> (i32, i32) {
    %c0_i32 = arith.constant 0 : i32
    %c0_i32_0 = arith.constant 0 : i32
    %c0_i32_1 = arith.constant 0 : i32
    return %c0_i32, %c0_i32_0 : i32, i32
  }
  func.func @transform_6(%arg0: i32) -> (i32, i32) {
    %c0_i32 = arith.constant 0 : i32
    %c0_i32_0 = arith.constant 0 : i32
    %c0_i32_1 = arith.constant 0 : i32
    return %c0_i32, %c0_i32_0 : i32, i32
  }
  func.func @transform_7(%arg0: i32) -> (i32, i32) {
    %c0_i32 = arith.constant 0 : i32
    %c0_i32_0 = arith.constant 0 : i32
    %c0_i32_1 = arith.constant 0 : i32
    return %c0_i32, %c0_i32_0 : i32, i32
  }
  func.func @transform_8(%arg0: i32) -> (i32, i32) {
    %c0_i32 = arith.constant 0 : i32
    %c0_i32_0 = arith.constant 0 : i32
    %c0_i32_1 = arith.constant 0 : i32
    return %c0_i32, %c0_i32_0 : i32, i32
  }
  func.func @transform_9(%arg0: i32) -> (i32, i32) {
    %c0_i32 = arith.constant 0 : i32
    %c0_i32_0 = arith.constant 0 : i32
    %c0_i32_1 = arith.constant 0 : i32
    return %c0_i32, %c0_i32_0 : i32, i32
  }
  func.func @transform_10(%arg0: i32) -> (i32, i32) {
    %c0_i32 = arith.constant 0 : i32
    %c0_i32_0 = arith.constant 0 : i32
    %c0_i32_1 = arith.constant 0 : i32
    return %c0_i32, %c0_i32_0 : i32, i32
  }
  func.func @transform_11(%arg0: i32) -> (i32, i32) {
    %c0_i32 = arith.constant 0 : i32
    %c0_i32_0 = arith.constant 0 : i32
    %c0_i32_1 = arith.constant 0 : i32
    return %c0_i32, %c0_i32_0 : i32, i32
  }
  func.func @transform_12(%arg0: i32) -> (i32, i32) {
    %c0_i32 = arith.constant 0 : i32
    %c0_i32_0 = arith.constant 0 : i32
    %c0_i32_1 = arith.constant 0 : i32
    return %c0_i32, %c0_i32_0 : i32, i32
  }
  func.func @transform_13(%arg0: i32) -> (i32, i32) {
    %c0_i32 = arith.constant 0 : i32
    %c0_i32_0 = arith.constant 0 : i32
    %c0_i32_1 = arith.constant 0 : i32
    return %c0_i32, %c0_i32_0 : i32, i32
  }
  func.func @transform_14(%arg0: i32) -> (i32, i32) {
    %c0_i32 = arith.constant 0 : i32
    %c0_i32_0 = arith.constant 0 : i32
    %c0_i32_1 = arith.constant 0 : i32
    return %c0_i32, %c0_i32_0 : i32, i32
  }
  func.func @transform_15(%arg0: i32) -> (i32, i32, i32) {
    %c0_i32 = arith.constant 0 : i32
    %c0_i32_0 = arith.constant 0 : i32
    %c0_i32_1 = arith.constant 0 : i32
    return %arg0, %c0_i32, %c0_i32_0 : i32, i32, i32
  }
  func.func @transform_16(%arg0: i32) -> (i32, i32) {
    %c0_i32 = arith.constant 0 : i32
    %c0_i32_0 = arith.constant 0 : i32
    return %c0_i32, %arg0 : i32, i32
  }
  func.func @transform_17(%arg0: i32) -> (i32, i32) {
    %c0_i32 = arith.constant 0 : i32
    %c0_i32_0 = arith.constant 0 : i32
    return %c0_i32, %arg0 : i32, i32
  }
}

</mosaic_0001>

<bundles_post_ra>
// kernel: tpu_custom_call.1
= control target key start
LH: loop header
LB: loop body
LE: loop exit
PB: predicated region body
PF: predicated region fallthrough
CT: control target
= control target key end

     0   :  { %s9816_s0 = inlined_call_operand.vmem [shape: bf16[128,6], index: 0, kind: input, shape index: {}]   ;;  %s9817_s1 = inlined_call_operand.vmem [shape: bf16[64,3], index: 1, kind: input, shape index: {}]   ;;  %s9818_s2 = inlined_call_operand.hbm [shape: bf16[6,64], index: 2, kind: input, shape index: {}]   ;;  %s9819_s3 = inlined_call_operand.hbm [shape: f32[1,64], index: 3, kind: input, shape index: {}]   ;;  %s9820_s4 = inlined_call_operand.vmem [shape: bf16[64,32], index: 4, kind: input, shape index: {}]   ;;  %s9821_s5 = inlined_call_operand.hbm [shape: f32[1,32], index: 5, kind: input, shape index: {}]   ;;  %s9822_s6 = inlined_call_operand.hbm [shape: bf16[3,32], index: 6, kind: input, shape index: {}]   ;;  %s9823_s7 = inlined_call_operand.hbm [shape: f32[1,32], index: 7, kind: input, shape index: {}]   ;;  %s9824_s8 = inlined_call_operand.hbm [shape: bf16[32,64], index: 8, kind: input, shape index: {}]   ;;  %s9825_s9 = inlined_call_operand.hbm [shape: f32[1,64], index: 9, kind: input, shape index: {}]   ;;  %s9826_s10 = inlined_call_operand.hbm [shape: bf16[32,256], index: 10, kind: input, shape index: {}]   ;;  %s9827_s11 = inlined_call_operand.hbm [shape: bf16[64,256], index: 11, kind: input, shape index: {}]   ;;  %s9828_s12 = inlined_call_operand.hbm [shape: f32[1,256], index: 12, kind: input, shape index: {}]   ;;  %s9829_s13 = inlined_call_operand.hbm [shape: bf16[256,512], index: 13, kind: input, shape index: {}]   ;;  %s9830_s14 = inlined_call_operand.hbm [shape: f32[1,512], index: 14, kind: input, shape index: {}]   ;;  %s9831_s15 = inlined_call_operand.hbm [shape: bf16[2,512,1920], index: 15, kind: input, shape index: {}]   ;;  %s9832_s16 = inlined_call_operand.hbm [shape: f32[1,3840], index: 16, kind: input, shape index: {}]   ;;  %s9833_s17 = inlined_call_operand.hbm [shape: f32[2,3840], index: 17, kind: output, shape index: {}]  }
   0x1   :  { %9854 = sst [smem:[#allocation36_spill]] %s9816_s0 }
   0x2   :  { %9855 = sst [smem:[#allocation37_spill]] %s9817_s1 }
   0x3   :  { %9856 = sst [smem:[#allocation38_spill]] %s9818_s2 }
   0x4   :  { %9857 = sst [smem:[#allocation39_spill]] %s9819_s3 }
   0x5   :  { %9858 = sst [smem:[#allocation40_spill]] %s9820_s4 }
   0x6   :  { %9859 = sst [smem:[#allocation41_spill]] %s9821_s5 }
   0x7   :  { %9860 = sst [smem:[#allocation42_spill]] %s9822_s6 }
   0x8   :  { %9861 = sst [smem:[#allocation43_spill]] %s9823_s7 }
   0x9   :  { %9862 = sst [smem:[#allocation44_spill]] %s9824_s8 }
   0xa   :  { %9863 = sst [smem:[#allocation45_spill]] %s9825_s9 }
   0xb   :  { %9864 = sst [smem:[#allocation46_spill]] %s9826_s10 }
   0xc   :  { %9865 = sst [smem:[#allocation47_spill]] %s9827_s11 }
   0xd   :  { %9866 = sst [smem:[#allocation48_spill]] %s9828_s12 }
   0xe   :  { %9867 = sst [smem:[#allocation49_spill]] %s9829_s13 }
   0xf   :  { %9868 = sst [smem:[#allocation50_spill]] %s9830_s14 }
  0x10   :  { %9869 = sst [smem:[#allocation51_spill]] %s9831_s15 }
  0x11   :  { %9870 = sst [smem:[#allocation52_spill]] %s9832_s16 }
  0x12   :  { %9871 = sst [smem:[#allocation53_spill]] %s9833_s17 }
  0x13   :  { %22 = vsyncpa [#allocation3], 0 }
  0x14   :  { %23 = vsyncpa [#allocation6], 0 }
  0x15   :  { %24 = vsyncpa [#allocation9], 0 }
  0x16   :  { %25 = vsyncpa [#allocation12], 0 }
  0x17   :  { %26 = vsyncpa [#allocation15], 0 }
  0x18   :  { %27 = vsyncpa [#allocation18], 0 }
  0x19   :  { %28 = vsyncpa [#allocation21], 0 }
  0x1a   :  { %29 = vsyncpa [#allocation4], 0 }
  0x1b   :  { %31 = vsyncpa [#allocation4 + $0x1], 0  ;;  %s8594_s24 = smov 0   ;;  %s8596_s25 = smov 0  }
  0x1c   :  { %s8598_s26 = smov 0   ;;  %s8600_s27 = smov 0  }
  0x1d LB: > { %s8478_s28 = smov [#allocation2]   ;;  %s8615_s0 = sadd.s32 4294967295, %s8476_s27   ;;  %s8476_s27 = sphi %s8600_s27, %s9931_s27   ;;  %s8472_s26 = sphi %s8598_s26, %s9930_s26   ;;  %s8468_s25 = sphi %s8596_s25, %s9929_s25   ;;  %s8464_s24 = sphi %s8594_s24, %s9928_s24  }
  0x1e   : > { %s454_s29 = sshll.u32 %s8478_s28, 4  ;;  %p6140_p0 = scmp.ge.s32.totalorder %s8476_s27, 1  ;;  %s8620_s29 = int_to_ptr.vmem [resolvable:$true] %s454_s29 }
  0x1f   : > { %p9842_p1 = scmp.eq.s32.totalorder %s8615_s0, 0  ;;  %p435_p2 = scmp.lt.s32.totalorder %s8476_s27, 3 }
  0x20   : > { %s8479_s18 = smov [#allocation5]   ;;  %s8480_s1 = smov [#allocation8]  }
  0x21   : > { %p8622_p3 = pnand %p6140_p0, %p435_p2  ;;  %s465_s19 = sshll.u32 %s8479_s18, 4  ;;  %s8629_s19 = int_to_ptr.vmem [resolvable:$true] %s465_s19 }
  0x22   : > { %s490_s20 = sshll.u32 %s8480_s1, 4  ;;  %s8481_s22 = smov [#allocation11]   ;;  %s8637_s20 = int_to_ptr.vmem [resolvable:$true] %s490_s20 }
  0x23   : > { %s9872_s30 = scalar_select %p8622_p3, 1, 0 }
  0x24   : > { %p7021_p5 = pneg %p8622_p3  ;;  %s8639_s23 = sshll.u32 %s8481_s22, 4  ;;  %s512_s23 = int_to_ptr.vmem [resolvable:$true] %s8639_s23 }
  0x25   : > { %9873 = sst [smem:[#allocation34_spill]] %s9872_s30  ;;  %s9875_s2 = sld [smem:[#allocation38_spill]] }
  0x26   : > { %p8633_p6 = pnand %p7021_p5, %p9842_p1 }
  0x28   : > { %s9874_s21 = scalar_select %p8633_p6, 1, 0 }
  0x29   : > { %p8649_p8 = pneg %p8633_p6 }
  0x2b   : > { %s7986_s4 = scalar_lea.hbm %s9875_s2, 64 }
  0x2c   : > { %p7987_p7 = scmp.ne.s32.totalorder %s9875_s2, %s7986_s4  ;;  %p7993_p11 = scmp.lt.u32.totalorder %s7986_s4, %s9875_s2 }
  0x2e   : > { %p7989_p9 = pnand %p8649_p8, %p7987_p7 }
  0x30   : > { %p7990_p10 = pneg %p7989_p9 }
  0x32   : > { %p7995_p12 = pnand %p7993_p11, %p7990_p10 }
  0x34   : > { %7998 = shalt.err (!%p7995_p12)
}
  0x35   : > { %s7999_s17 = scalar_lea.vmem %s8620_s29, 64  ;;  %p8007_p5 = scmp.lt.s32.totalorder %s8620_s29, %s8620_s29 }
  0x36   : > { %p8000_p13 = scmp.ne.s32.totalorder %s8620_s29, %s7999_s17  ;;  %p8008_p4 = scmp.lt.s32.totalorder %s7999_s17, %s7999_s17 }
  0x38   : > { %p8002_p0 = pnand %p8000_p13, %p8649_p8  ;;  %p8009_p7 = por %p8008_p4, %p8007_p5 }
  0x3a   : > { %p8003_p2 = pneg %p8002_p0 }
  0x3c   : > { %p8010_p9 = pnand %p8009_p7, %p8003_p2 }
  0x3e   : > { %8013 = shalt.err (!%p8010_p9)
}
  0x3f   : > { %7024 = dma.hbm_to_vmem [thread:$0]  (!%p8633_p6), %s9875_s2, 64, %s8620_s29, [#allocation3]  }
  0x40   : > { %s9877_s3 = sld [smem:[#allocation39_spill]] }
  0x46   : > { %s8014_s18 = scalar_lea.hbm %s9877_s3, 16 }
  0x47   : > { %p8015_p10 = scmp.ne.s32.totalorder %s9877_s3, %s8014_s18  ;;  %p8021_p12 = scmp.lt.u32.totalorder %s8014_s18, %s9877_s3 }
  0x49   : > { %p8017_p4 = pnand %p8015_p10, %p8649_p8 }
  0x4b   : > { %p8018_p11 = pneg %p8017_p4 }
  0x4d   : > { %p8023_p13 = pnand %p8021_p12, %p8018_p11 }
  0x4f   : > { %8026 = shalt.err (!%p8023_p13)
}
  0x50   : > { %s8027_s29 = scalar_lea.vmem %s8629_s19, 16  ;;  %s8034_s14 = scalar_lea.vmem %s8629_s19, 32 }
  0x51   : > { %p8028_p0 = scmp.ne.s32.totalorder %s8629_s19, %s8027_s29  ;;  %p8035_p7 = scmp.lt.s32.totalorder %s8629_s19, %s8629_s19 }
  0x52   : > { %p8036_p9 = scmp.lt.s32.totalorder %s8034_s14, %s8027_s29 }
  0x53   : > { %p8030_p2 = pnand %p8028_p0, %p8649_p8 }
  0x54   : > { %p8037_p10 = por %p8036_p9, %p8035_p7 }
  0x55   : > { %p8031_p5 = pneg %p8030_p2 }
  0x57   : > { %p8038_p4 = pnand %p8037_p10, %p8031_p5 }
  0x59   : > { %8041 = shalt.err (!%p8038_p4)
}
  0x5a   : > { %7027 = dma.hbm_to_vmem [thread:$0]  (!%p8633_p6), %s9877_s3, 16, %s8629_s19, [#allocation6]  }
  0x5b   : > { %s9878_s6 = sld [smem:[#allocation42_spill]] }
  0x61   : > { %s8042_s28 = scalar_lea.hbm %s9878_s6, 32 }
  0x62   : > { %p8043_p11 = scmp.ne.s32.totalorder %s9878_s6, %s8042_s28  ;;  %p8049_p0 = scmp.lt.u32.totalorder %s8042_s28, %s9878_s6 }
  0x64   : > { %p8045_p12 = pnand %p8043_p11, %p8649_p8 }
  0x66   : > { %p8046_p13 = pneg %p8045_p12 }
  0x68   : > { %p8051_p2 = pnand %p8049_p0, %p8046_p13 }
  0x6a   : > { %8054 = shalt.err (!%p8051_p2)
}
  0x6b   : > { %s8055_s19 = scalar_lea.vmem %s8637_s20, 32  ;;  %p8063_p10 = scmp.lt.s32.totalorder %s8637_s20, %s8637_s20 }
  0x6c   : > { %p8056_p5 = scmp.ne.s32.totalorder %s8637_s20, %s8055_s19  ;;  %p8064_p4 = scmp.lt.s32.totalorder %s8055_s19, %s8055_s19 }
  0x6e   : > { %p8058_p7 = pnand %p8056_p5, %p8649_p8  ;;  %p8065_p11 = por %p8064_p4, %p8063_p10 }
  0x70   : > { %p8059_p9 = pneg %p8058_p7 }
  0x72   : > { %p8066_p12 = pnand %p8065_p11, %p8059_p9 }
  0x74   : > { %8069 = shalt.err (!%p8066_p12)
}
  0x75   : > { %7033 = dma.hbm_to_vmem [thread:$0]  (!%p8633_p6), %s9878_s6, 32, %s8637_s20, [#allocation9]  }
  0x76   : > { %s9879_s8 = sld [smem:[#allocation44_spill]] }
  0x7c   : > { %s8070_s30 = scalar_lea.hbm %s9879_s8, 256 }
  0x7d   : > { %p8071_p13 = scmp.ne.s32.totalorder %s9879_s8, %s8070_s30  ;;  %p8077_p5 = scmp.lt.u32.totalorder %s8070_s30, %s9879_s8 }
  0x7f   : > { %p8073_p0 = pnand %p8071_p13, %p8649_p8 }
  0x81   : > { %p8074_p2 = pneg %p8073_p0 }
  0x83   : > { %p8079_p7 = pnand %p8077_p5, %p8074_p2 }
  0x85   : > { %8082 = shalt.err (!%p8079_p7)
}
  0x86   : > { %s8083_s29 = scalar_lea.vmem %s512_s23, 256  ;;  %p8091_p11 = scmp.lt.s32.totalorder %s512_s23, %s512_s23 }
  0x87   : > { %p8084_p9 = scmp.ne.s32.totalorder %s512_s23, %s8083_s29  ;;  %p8092_p12 = scmp.lt.s32.totalorder %s8083_s29, %s8083_s29 }
  0x89   : > { %p8086_p10 = pnand %p8084_p9, %p8649_p8  ;;  %p8093_p1 = por %p8092_p12, %p8091_p11 }
  0x8b   : > { %p8087_p4 = pneg %p8086_p10 }
  0x8d   : > { %p8094_p3 = pnand %p8093_p1, %p8087_p4 }
  0x8f   : > { %8097 = shalt.err (!%p8094_p3)
}
  0x90   : > { %s8482_s20 = smov 64   ;;  %s8483_s19 = smov 4  }
  0x91   : > { %7039 = dma.hbm_to_vmem [thread:$0]  (!%p8633_p6), %s9879_s8, 256, %s512_s23, [#allocation12], %s8482_s20, %s8482_s20, %s8483_s19  }
  0x92   : > { %s8484_s4 = smov [#allocation14]   ;;  %s9880_s10 = sld [smem:[#allocation46_spill]] }
  0x93   : > { %s535_s16 = sshll.u32 %s8484_s4, 4  ;;  %s536_s16 = int_to_ptr.vmem [resolvable:$true] %s535_s16 }
  0x98   : > { %s8098_s18 = scalar_lea.hbm %s9880_s10, 512 }
  0x99   : > { %p8099_p1 = scmp.ne.s32.totalorder %s9880_s10, %s8098_s18  ;;  %p8105_p0 = scmp.lt.u32.totalorder %s8098_s18, %s9880_s10 }
  0x9b   : > { %p8101_p3 = pnand %p8099_p1, %p8649_p8 }
  0x9d   : > { %p8102_p13 = pneg %p8101_p3 }
  0x9f   : > { %p8107_p2 = pnand %p8105_p0, %p8102_p13 }
  0xa1   : > { %8110 = shalt.err (!%p8107_p2)
}
  0xa2   : > { %s8111_s23 = scalar_lea.vmem %s536_s16, 512  ;;  %p8119_p10 = scmp.lt.s32.totalorder %s536_s16, %s536_s16 }
  0xa3   : > { %p8112_p5 = scmp.ne.s32.totalorder %s536_s16, %s8111_s23  ;;  %p8120_p4 = scmp.lt.s32.totalorder %s8111_s23, %s8111_s23 }
  0xa5   : > { %p8114_p7 = pnand %p8112_p5, %p8649_p8  ;;  %p8121_p11 = por %p8120_p4, %p8119_p10 }
  0xa7   : > { %p8115_p9 = pneg %p8114_p7 }
  0xa9   : > { %p8122_p12 = pnand %p8121_p11, %p8115_p9 }
  0xab   : > { %8125 = shalt.err (!%p8122_p12)
}
  0xac   : > { %s9844_s20 = smov 128   ;;  %s9845_s19 = smov 8  }
  0xad   : > { %7045 = dma.hbm_to_vmem [thread:$0]  (!%p8633_p6), %s9880_s10, 512, %s536_s16, [#allocation15], %s9844_s20, %s9844_s20, %s9845_s19  }
  0xae   : > { %s8487_s13 = smov [#allocation17]   ;;  %s9881_s12 = sld [smem:[#allocation48_spill]] }
  0xaf   : > { %s562_s4 = sshll.u32 %s8487_s13, 4  ;;  %s563_s4 = int_to_ptr.vmem [resolvable:$true] %s562_s4 }
  0xb4   : > { %s8126_s18 = scalar_lea.hbm %s9881_s12, 32 }
  0xb5   : > { %p8127_p1 = scmp.ne.s32.totalorder %s9881_s12, %s8126_s18  ;;  %p8133_p0 = scmp.lt.u32.totalorder %s8126_s18, %s9881_s12 }
  0xb7   : > { %p8129_p3 = pnand %p8127_p1, %p8649_p8 }
  0xb9   : > { %p8130_p13 = pneg %p8129_p3 }
  0xbb   : > { %p8135_p2 = pnand %p8133_p0, %p8130_p13 }
  0xbd   : > { %8138 = shalt.err (!%p8135_p2)
}
  0xbe   : > { %s8139_s16 = scalar_lea.vmem %s563_s4, 32  ;;  %p8147_p10 = scmp.lt.s32.totalorder %s563_s4, %s563_s4 }
  0xbf   : > { %p8140_p5 = scmp.ne.s32.totalorder %s563_s4, %s8139_s16  ;;  %p8148_p4 = scmp.lt.s32.totalorder %s8139_s16, %s8139_s16 }
  0xc1   : > { %p8142_p7 = pnand %p8140_p5, %p8649_p8  ;;  %p8149_p11 = por %p8148_p4, %p8147_p10 }
  0xc3   : > { %p8143_p9 = pneg %p8142_p7 }
  0xc5   : > { %p8150_p12 = pnand %p8149_p11, %p8143_p9 }
  0xc7   : > { %8153 = shalt.err (!%p8150_p12)
}
  0xc8   : > { %7051 = dma.hbm_to_vmem [thread:$0]  (!%p8633_p6), %s9881_s12, 32, %s563_s4, [#allocation18]  }
  0xc9   : > { %s6139_s13 = sadd.s32 4294967294, %s8476_s27   ;;  %s8777_s30 = sadd.s32 1, %s8476_s27  }
  0xca   : > { %s356_s28 = ssub.s32 %s8476_s27, %s8777_s30  ;;  %s359_s18 = sadd.s32 1, %s8472_s26 }
  0xcb   : > { %p357_p1 = scmp.eq.s32.totalorder %s356_s28, 0  ;;  %p366_p3 = scmp.ne.s32.totalorder %s8472_s26, %s8468_s25 }
  0xcc   : > { %p367_p13 = scmp.eq.s32.totalorder %s8476_s27, 0  ;;  %p372_p0 = scmp.ne.s32.totalorder %s8468_s25, %s8464_s24 }
  0xcd   : > { %s8788_s22 = scalar_select %p357_p1, %s8472_s26, %s359_s18  }
  0xce   : > { %p368_p2 = por %p367_p13, %p366_p3  ;;  %p9883_p5 = scmp.eq.s32.totalorder %s8615_s0, 0 }
  0xcf   : > { %9882 = sst [smem:[#allocation35_spill]] %s8788_s22  ;;  %p422_p9 = scmp.eq.s32.totalorder %s8615_s0, 1 }
  0xd0   : > { %p8792_p7 = por %p9883_p5, %p372_p0  ;;  %p428_p10 = scmp.eq.s32.totalorder %s6139_s13, 1 }
  0xd1   : > { %p7081_p4 = scmp.lt.s32.totalorder %s8476_s27, 2  ;;  %s597_s4 = sand.u32 1, %s8476_s27  }
  0xd2   : > { %s9884_s17 = scalar_select %p8792_p7, 1, 0 }
  0xd3   : > { %p8799_p11 = por %p422_p9, %p366_p3  ;;  %p8803_p12 = por %p428_p10, %p372_p0 }
  0xd4   : > { %s9846_s16 = sand.u32 1, %s8472_s26   ;;  %p8810_p1 = pnand %p7081_p4, %p368_p2 }
  0xd5   : > { %s9885_s29 = scalar_select %p8799_p11, 1, 0 }
  0xd6   : > { %s9886_s23 = scalar_select %p8803_p12, 1, 0 }
  0xd7   : > { %s6961_s2 = smul.u32 3840, %s9846_s16  ;;  %s9888_s15 = sld [smem:[#allocation51_spill]] }
  0xd8   : > { %s9887_s14 = scalar_select %p8810_p1, 1, 0 }
  0xd9   : > { %s6962_s13 = smul.u32 61440, %s8476_s27  ;;  %s601_s19 = scalar_lea.vmem [#allocation22], %s6961_s2 }
  0xda   : > { %s608_s3 = sshll.u32 %s601_s19, 4  ;;  %s8822_s16 = scalar_lea.sflag [#allocation3], %s597_s4  ;;  %s8820_s3 = int_to_ptr.vmem [resolvable:$true] %s608_s3 }
  0xdb   : > { %p9851_p13 = pneg %p8810_p1 }
  0xdd   : > { %s8818_s20 = scalar_lea.hbm %s9888_s15, %s6962_s13  ;;  %s8159_s18 = scalar_lea.hbm %s9888_s15, 122880 }
  0xde   : > { %s8154_s6 = scalar_lea.hbm %s8818_s20, 61440  ;;  %p8160_p5 = scmp.lt.u32.totalorder %s8818_s20, %s9888_s15 }
  0xdf   : > { %p8155_p3 = scmp.ne.s32.totalorder %s8818_s20, %s8154_s6  ;;  %p8161_p9 = scmp.lt.u32.totalorder %s8159_s18, %s8154_s6 }
  0xe0   : > { %p8163_p4 = scmp.lt.u32.totalorder %s8154_s6, %s8818_s20 }
  0xe1   : > { %p8157_p0 = pnand %p9851_p13, %p8155_p3  ;;  %p8162_p10 = por %p8161_p9, %p8160_p5 }
  0xe3   : > { %p8158_p2 = pneg %p8157_p0  ;;  %p8164_p12 = por %p8163_p4, %p8162_p10 }
  0xe5   : > { %p8165_p11 = pnand %p8164_p12, %p8158_p2 }
  0xe7   : > { %8168 = shalt.err (!%p8165_p11)
}
  0xe8   : > { %s8169_s19 = scalar_lea.vmem %s8820_s3, 61440  ;;  %s8488_s4 = smov [#allocation22]  }
  0xe9   : > { %p8170_p3 = scmp.ne.s32.totalorder %s8820_s3, %s8169_s19  ;;  %s8174_s2 = sshll.u32 %s8488_s4, 4  ;;  %s8175_s2 = int_to_ptr.vmem [resolvable:$false] %s8174_s2 }
  0xea   : > { %s8176_s8 = scalar_lea.vmem %s8175_s2, 122880  ;;  %p8177_p6 = scmp.lt.s32.totalorder %s8820_s3, %s8175_s2 }
  0xeb   : > { %p8172_p0 = pnand %p8170_p3, %p9851_p13  ;;  %p8178_p5 = scmp.lt.s32.totalorder %s8176_s8, %s8169_s19 }
  0xed   : > { %p8173_p7 = pneg %p8172_p0  ;;  %p8179_p9 = por %p8178_p5, %p8177_p6 }
  0xef   : > { %p8180_p10 = pnand %p8179_p9, %p8173_p7 }
  0xf1   : > { %8183 = shalt.err (!%p8180_p10)
}
  0xf2   : > { %s8489_s6 = smov 960   ;;  %s8490_s10 = smov 60  }
  0xf3   : > { %7061 = dma.hbm_to_vmem [thread:$0]  (!%p8810_p1), %s8818_s20, 61440, %s8820_s3, %s8822_s16, %s8489_s6, %s8489_s6, %s8490_s10  }
  0xf4   : > { %s8491_s13 = smov [#allocation7]   ;;  %s8492_s18 = smov [#allocation10]  }
  0xf5   : > { %s479_s28 = sshll.u32 %s8491_s13, 4  ;;  %s501_s4 = sshll.u32 %s8492_s18, 4  ;;  %s480_s28 = int_to_ptr.vmem [resolvable:$true] %s479_s28  ;;  %s8850_s4 = int_to_ptr.vmem [resolvable:$true] %s501_s4 }
  0xf6   : > { %s9889_s5 = sld [smem:[#allocation41_spill]] }
  0xfc   : > { %s8184_s8 = scalar_lea.hbm %s9889_s5, 16 }
  0xfd   : > { %p8185_p6 = scmp.ne.s32.totalorder %s9889_s5, %s8184_s8  ;;  %p8191_p12 = scmp.lt.u32.totalorder %s8184_s8, %s9889_s5 }
  0xff   : > { %p8187_p7 = pnand %p8185_p6, %p8649_p8 }
 0x101   : > { %p8188_p11 = pneg %p8187_p7 }
 0x103   : > { %p8193_p2 = pnand %p8191_p12, %p8188_p11 }
 0x105   : > { %8196 = shalt.err (!%p8193_p2)
}
 0x106   : > { %s8197_s20 = scalar_lea.vmem %s480_s28, 16  ;;  %s8204_s6 = scalar_lea.vmem %s480_s28, 32 }
 0x107   : > { %p8198_p4 = scmp.ne.s32.totalorder %s480_s28, %s8197_s20  ;;  %p8205_p5 = scmp.lt.s32.totalorder %s480_s28, %s480_s28 }
 0x108   : > { %p8206_p9 = scmp.lt.s32.totalorder %s8204_s6, %s8197_s20 }
 0x109   : > { %p8200_p3 = pnand %p8198_p4, %p8649_p8 }
 0x10a   : > { %p8207_p10 = por %p8206_p9, %p8205_p5 }
 0x10b   : > { %p8201_p0 = pneg %p8200_p3 }
 0x10d   : > { %p8208_p13 = pnand %p8207_p10, %p8201_p0 }
 0x10f   : > { %8211 = shalt.err (!%p8208_p13)
}
 0x110   : > { %p9890_p6 = scmp.ne.s32.totalorder %s9874_s21, 0  ;;  %s9891_s7 = sld [smem:[#allocation43_spill]] }
 0x112   : > { %7030 = dma.hbm_to_vmem [thread:$0]  (!%p9890_p6), %s9889_s5, 16, %s480_s28, [#allocation6]  }
 0x116   : > { %s8212_s13 = scalar_lea.hbm %s9891_s7, 16 }
 0x117   : > { %p8213_p7 = scmp.ne.s32.totalorder %s9891_s7, %s8212_s13  ;;  %p8219_p13 = scmp.lt.u32.totalorder %s8212_s13, %s9891_s7 }
 0x119   : > { %p8215_p11 = pnand %p8213_p7, %p8649_p8 }
 0x11b   : > { %p8216_p12 = pneg %p8215_p11 }
 0x11d   : > { %p8221_p2 = pnand %p8219_p13, %p8216_p12 }
 0x11f   : > { %8224 = shalt.err (!%p8221_p2)
}
 0x120   : > { %s8225_s28 = scalar_lea.vmem %s8850_s4, 16  ;;  %s8232_s3 = scalar_lea.vmem %s8850_s4, 32 }
 0x121   : > { %p8226_p4 = scmp.ne.s32.totalorder %s8850_s4, %s8225_s28  ;;  %p8233_p5 = scmp.lt.s32.totalorder %s8850_s4, %s8850_s4 }
 0x122   : > { %p8234_p9 = scmp.lt.s32.totalorder %s8232_s3, %s8225_s28 }
 0x123   : > { %p8228_p3 = pnand %p8226_p4, %p8649_p8 }
 0x124   : > { %p8235_p10 = por %p8234_p9, %p8233_p5 }
 0x125   : > { %p8229_p0 = pneg %p8228_p3 }
 0x127   : > { %p8236_p7 = pnand %p8235_p10, %p8229_p0 }
 0x129   : > { %8239 = shalt.err (!%p8236_p7)
}
 0x12a   : > { %7036 = dma.hbm_to_vmem [thread:$0]  (!%p9890_p6), %s9891_s7, 16, %s8850_s4, [#allocation9]  }
 0x12b   : > { %s8493_s12 = smov [#allocation13]   ;;  %s8494_s22 = smov [#allocation16]  }
 0x12c   : > { %s525_s15 = sshll.u32 %s8493_s12, 4  ;;  %s548_s10 = sshll.u32 %s8494_s22, 4  ;;  %s526_s15 = int_to_ptr.vmem [resolvable:$true] %s525_s15  ;;  %s8894_s10 = int_to_ptr.vmem [resolvable:$true] %s548_s10 }
 0x12d   : > { %s9892_s9 = sld [smem:[#allocation45_spill]] }
 0x133   : > { %s8240_s19 = scalar_lea.hbm %s9892_s9, 16 }
 0x134   : > { %p8241_p11 = scmp.ne.s32.totalorder %s9892_s9, %s8240_s19  ;;  %p8247_p2 = scmp.lt.u32.totalorder %s8240_s19, %s9892_s9 }
 0x136   : > { %p8243_p12 = pnand %p8241_p11, %p8649_p8 }
 0x138   : > { %p8244_p13 = pneg %p8243_p12 }
 0x13a   : > { %p8249_p4 = pnand %p8247_p2, %p8244_p13 }
 0x13c   : > { %8252 = shalt.err (!%p8249_p4)
}
 0x13d   : > { %s8253_s3 = scalar_lea.vmem %s526_s15, 16  ;;  %s8260_s20 = scalar_lea.vmem %s526_s15, 32 }
 0x13e   : > { %p8254_p3 = scmp.ne.s32.totalorder %s526_s15, %s8253_s3  ;;  %p8261_p9 = scmp.lt.s32.totalorder %s526_s15, %s526_s15 }
 0x13f   : > { %p8262_p10 = scmp.lt.s32.totalorder %s8260_s20, %s8253_s3 }
 0x140   : > { %p8256_p0 = pnand %p8254_p3, %p8649_p8 }
 0x141   : > { %p8263_p7 = por %p8262_p10, %p8261_p9 }
 0x142   : > { %p8257_p5 = pneg %p8256_p0 }
 0x144   : > { %p8264_p1 = pnand %p8263_p7, %p8257_p5 }
 0x146   : > { %8267 = shalt.err (!%p8264_p1)
}
 0x147   : > { %7042 = dma.hbm_to_vmem [thread:$0]  (!%p9890_p6), %s9892_s9, 16, %s526_s15, [#allocation12]  }
 0x148   : > { %s9893_s11 = sld [smem:[#allocation47_spill]] }
 0x14e   : > { %s8268_s18 = scalar_lea.hbm %s9893_s11, 1024 }
 0x14f   : > { %p8269_p11 = scmp.ne.s32.totalorder %s9893_s11, %s8268_s18  ;;  %p8275_p1 = scmp.lt.u32.totalorder %s8268_s18, %s9893_s11 }
 0x151   : > { %p8271_p12 = pnand %p8269_p11, %p8649_p8 }
 0x153   : > { %p8272_p13 = pneg %p8271_p12 }
 0x155   : > { %p8277_p2 = pnand %p8275_p1, %p8272_p13 }
 0x157   : > { %8280 = shalt.err (!%p8277_p2)
}
 0x158   : > { %s8281_s15 = scalar_lea.vmem %s8894_s10, 1024  ;;  %p8289_p5 = scmp.lt.s32.totalorder %s8894_s10, %s8894_s10 }
 0x159   : > { %p8282_p4 = scmp.ne.s32.totalorder %s8894_s10, %s8281_s15  ;;  %p8290_p9 = scmp.lt.s32.totalorder %s8281_s15, %s8281_s15 }
 0x15b   : > { %p8284_p3 = pnand %p8282_p4, %p8649_p8  ;;  %p8291_p10 = por %p8290_p9, %p8289_p5 }
 0x15d   : > { %p8285_p0 = pneg %p8284_p3 }
 0x15f   : > { %p8292_p7 = pnand %p8291_p10, %p8285_p0 }
 0x161   : > { %8295 = shalt.err (!%p8292_p7)
}
 0x162   : > { %s9894_s4 = smov 8   ;;  %s9895_s3 = smov 128  }
 0x163   : > { %7048 = dma.hbm_to_vmem [thread:$0]  (!%p9890_p6), %s9893_s11, 1024, %s8894_s10, [#allocation15], %s9895_s3, %s9895_s3, %s9894_s4  }
 0x164   : > { %s8495_s12 = smov [#allocation19]   ;;  %s9896_s19 = sld [smem:[#allocation49_spill]] }
 0x165   : > { %s572_s22 = sshll.u32 %s8495_s12, 4  ;;  %s573_s22 = int_to_ptr.vmem [resolvable:$true] %s572_s22 }
 0x16a   : > { %s8296_s2 = scalar_lea.hbm %s9896_s19, 8192 }
 0x16b   : > { %p8297_p11 = scmp.ne.s32.totalorder %s9896_s19, %s8296_s2  ;;  %p8303_p1 = scmp.lt.u32.totalorder %s8296_s2, %s9896_s19 }
 0x16d   : > { %p8299_p12 = pnand %p8297_p11, %p8649_p8 }
 0x16f   : > { %p8300_p13 = pneg %p8299_p12 }
 0x171   : > { %p8305_p2 = pnand %p8303_p1, %p8300_p13 }
 0x173   : > { %8308 = shalt.err (!%p8305_p2)
}
 0x174   : > { %s8309_s10 = scalar_lea.vmem %s573_s22, 8192  ;;  %p8317_p5 = scmp.lt.s32.totalorder %s573_s22, %s573_s22 }
 0x175   : > { %p8310_p4 = scmp.ne.s32.totalorder %s573_s22, %s8309_s10  ;;  %p8318_p9 = scmp.lt.s32.totalorder %s8309_s10, %s8309_s10 }
 0x177   : > { %p8312_p3 = pnand %p8310_p4, %p8649_p8  ;;  %p8319_p10 = por %p8318_p9, %p8317_p5 }
 0x179   : > { %p8313_p0 = pneg %p8312_p3 }
 0x17b   : > { %p8320_p7 = pnand %p8319_p10, %p8313_p0 }
 0x17d   : > { %8323 = shalt.err (!%p8320_p7)
}
 0x17e   : > { %s8496_s4 = smov 256   ;;  %s8497_s5 = smov 16  }
 0x17f   : > { %7054 = dma.hbm_to_vmem [thread:$0]  (!%p9890_p6), %s9896_s19, 8192, %s573_s22, [#allocation18], %s8496_s4, %s8496_s4, %s8497_s5  }
 0x180   : > { %s8498_s6 = smov [#allocation20]   ;;  %s9897_s13 = sand.u32 1, %s8472_s26  }
 0x181   : > { %s586_s12 = sshll.u32 %s8498_s6, 4  ;;  %s6963_s18 = smul.u32 15, %s9897_s13  ;;  %s587_s12 = int_to_ptr.vmem [resolvable:$true] %s586_s12 }
 0x182   : > { %s6776_s2 = smul.u32 240, %s8476_s27  ;;  %s9898_s15 = sld [smem:[#allocation50_spill]] }
 0x188   : > { %s8324_s10 = scalar_lea.hbm %s9898_s15, 64 }
 0x189   : > { %p8325_p11 = scmp.ne.s32.totalorder %s9898_s15, %s8324_s10  ;;  %p8331_p1 = scmp.lt.u32.totalorder %s8324_s10, %s9898_s15 }
 0x18b   : > { %p8327_p12 = pnand %p8325_p11, %p8649_p8 }
 0x18d   : > { %p8328_p13 = pneg %p8327_p12 }
 0x18f   : > { %p8333_p2 = pnand %p8331_p1, %p8328_p13 }
 0x191   : > { %8336 = shalt.err (!%p8333_p2)
}
 0x192   : > { %s8337_s22 = scalar_lea.vmem %s587_s12, 64  ;;  %p8345_p5 = scmp.lt.s32.totalorder %s587_s12, %s587_s12 }
 0x193   : > { %p8338_p4 = scmp.ne.s32.totalorder %s587_s12, %s8337_s22  ;;  %p8346_p9 = scmp.lt.s32.totalorder %s8337_s22, %s8337_s22 }
 0x195   : > { %p8340_p3 = pnand %p8338_p4, %p8649_p8  ;;  %p8347_p10 = por %p8346_p9, %p8345_p5 }
 0x197   : > { %p8341_p0 = pneg %p8340_p3 }
 0x199   : > { %p8348_p7 = pnand %p8347_p10, %p8341_p0 }
 0x19b   : > { %8351 = shalt.err (!%p8348_p7)
}
 0x19c   : > { %7057 = dma.hbm_to_vmem [thread:$0]  (!%p9890_p6), %s9898_s15, 64, %s587_s12, [#allocation21]  }
 0x19d   : > { %s9899_s5 = sld [smem:[#allocation52_spill]]  ;;  %s622_s1 = scalar_lea.vmem [#allocation23], %s6963_s18 }
 0x19e   : > { %s630_s6 = sshll.u32 %s622_s1, 4  ;;  %p9900_p11 = scmp.ne.s32.totalorder %s9887_s14, 0  ;;  %s631_s6 = int_to_ptr.vmem [resolvable:$true] %s630_s6 }
 0x1a0   : > { %p9901_p12 = pneg %p9900_p11 }
 0x1a3   : > { %s8982_s20 = scalar_lea.hbm %s9899_s5, %s6776_s2  ;;  %s8357_s8 = scalar_lea.hbm %s9899_s5, 480 }
 0x1a4   : > { %s8352_s13 = scalar_lea.hbm %s8982_s20, 240  ;;  %p8358_p6 = scmp.lt.u32.totalorder %s8982_s20, %s9899_s5 }
 0x1a5   : > { %p8353_p8 = scmp.ne.s32.totalorder %s8982_s20, %s8352_s13  ;;  %p8359_p2 = scmp.lt.u32.totalorder %s8357_s8, %s8352_s13 }
 0x1a6   : > { %p8361_p3 = scmp.lt.u32.totalorder %s8352_s13, %s8982_s20 }
 0x1a7   : > { %p8355_p13 = pnand %p8353_p8, %p9901_p12  ;;  %p8360_p4 = por %p8359_p2, %p8358_p6 }
 0x1a9   : > { %p8356_p1 = pneg %p8355_p13  ;;  %p8362_p0 = por %p8361_p3, %p8360_p4 }
 0x1ab   : > { %p8363_p5 = pnand %p8362_p0, %p8356_p1 }
 0x1ad   : > { %8366 = shalt.err (!%p8363_p5)
}
 0x1ae   : > { %s8367_s18 = scalar_lea.vmem %s631_s6, 240  ;;  %p9902_p10 = pmov %p9901_p12 }
 0x1af   : > { %p8368_p9 = scmp.ne.s32.totalorder %s631_s6, %s8367_s18  ;;  %s8499_s10 = smov [#allocation23]  }
 0x1b0   : > { %s8372_s3 = sshll.u32 %s8499_s10, 4  ;;  %s8373_s3 = int_to_ptr.vmem [resolvable:$false] %s8372_s3 }
 0x1b1   : > { %p8370_p7 = pnand %p8368_p9, %p9902_p10  ;;  %s8374_s22 = scalar_lea.vmem %s8373_s3, 480 }
 0x1b2   : > { %p8375_p12 = scmp.lt.s32.totalorder %s631_s6, %s8373_s3  ;;  %p8376_p13 = scmp.lt.s32.totalorder %s8374_s22, %s8367_s18 }
 0x1b3   : > { %p8371_p8 = pneg %p8370_p7 }
 0x1b4   : > { %p8377_p2 = por %p8376_p13, %p8375_p12 }
 0x1b6   : > { %p8378_p6 = pnand %p8377_p2, %p8371_p8 }
 0x1b8   : > { %8381 = shalt.err (!%p8378_p6)
}
 0x1b9   : > { %7064 = dma.hbm_to_vmem [thread:$0]  (!%p9900_p11), %s8982_s20, 240, %s631_s6, %s8822_s16  }
 0x1ba   : > { %s9903_s7 = sld [smem:[#allocation34_spill]] }
 0x1c0   : > { %p9904_p1 = scmp.ne.s32.totalorder %s9903_s7, 0 }
 0x1c1   : > { %p9905_p4 = scmp.eq.s32.totalorder (!%p9904_p1), %s8615_s0, 0 }
 0x1c2   : > { %639 = sbr.rel (%p9904_p1) target bundleno = 2128 (0x850), region = 88 }
 0x1c9   : > { %8427 = dma.done.wait (%p9905_p4), [#allocation3], 64   ;;  %p9906_p3 = pmov %p9905_p4 }
 0x1cb   : > { %8429 = vsyncadd (%p9906_p3), [#allocation3], 4294967232  ;;  %p9907_p0 = pmov %p9906_p3 }
 0x1cd   : > { %8431 = dma.done.wait (%p9907_p0), [#allocation6], 32   ;;  %p9908_p5 = pmov %p9907_p0 }
 0x1ce   : > { %p9909_p9 = pmov %p9907_p0 }
 0x1cf   : > { %8433 = vsyncadd (%p9908_p5), [#allocation6], 4294967264 }
 0x1d0   : > { %8435 = dma.done.wait (%p9909_p9), [#allocation9], 48   ;;  %p9910_p11 = pmov %p9907_p0 }
 0x1d1   : > { %p9911_p10 = pmov %p9907_p0 }
 0x1d2   : > { %8437 = vsyncadd (%p9910_p11), [#allocation9], 4294967248 }
 0x1d3   : > { %8439 = dma.done.wait (%p9911_p10), [#allocation12], 272   ;;  %p9912_p7 = pmov %p9907_p0 }
 0x1d4   : > { %p9913_p8 = pmov %p9907_p0 }
 0x1d5   : > { %8441 = vsyncadd (%p9912_p7), [#allocation12], 4294967024 }
 0x1d6   : > { %8443 = dma.done.wait (%p9913_p8), [#allocation15], 1536   ;;  %p9914_p12 = pmov %p9907_p0 }
 0x1d7   : > { %p9915_p13 = pmov %p9907_p0 }
 0x1d8   : > { %8445 = vsyncadd (%p9914_p12), [#allocation15], 4294965760 }
 0x1d9   : > { %8447 = dma.done.wait (%p9915_p13), [#allocation18], 8224   ;;  %p9916_p2 = pmov %p9907_p0 }
 0x1da   : > { %p9917_p6 = pmov %p9907_p0 }
 0x1db   : > { %8449 = vsyncadd (%p9916_p2), [#allocation18], 4294959072 }
 0x1dc   : > { %8451 = dma.done.wait (%p9917_p6), [#allocation21], 64   ;;  %p9918_p1 = pmov %p9907_p0 }
 0x1dd   : > { %s689_s16 = sand.u32 1, %s8615_s0   ;;  %s9036_s14 = sand.u32 1, %s8468_s25  }
 0x1de   : > { %8453 = vsyncadd (%p9918_p1), [#allocation21], 4294967232  ;;  %s6964_s9 = smul.u32 3840, %s9036_s14  ;;  %s690_s11 = scalar_lea.sflag [#allocation3], %s689_s16 }
 0x1df   : > { %p9919_p4 = scmp.ne.s32.totalorder %s9884_s17, 0 }
 0x1e0   : > { %s9039_s4 = scalar_lea.vmem [#allocation22], %s6964_s9 }
 0x1e1   : > { %8455 = dma.done.wait (%p9919_p4), %s690_s11, 61680  }
 0x1e2   : > { %8457 = vsyncadd (%p9919_p4), %s690_s11, 4294905616  ;;  %vm1244_vm0 = vcmask 1040384   ;;  %vm1245_vm1 = vcmask 1041408   ;;  %v8500_v0 = vmov 65535   ;;  %vm850_vm2 = vcmask 1042432   ;;  %s9920_s6 = sld [smem:[#allocation36_spill]] }
 0x1e3   : > { %v1246_v1 = vsel %vm1244_vm0, 4294967295, %v8500_v0  ;;  %vm825_vm3 = vcmask 48128   ;;  %v777_v3 = vld [vmem:[#allocation2] sm:$0x7]  ;;  %v1203_v7 = vld [vmem:[#allocation8] sm:$0x3] }
 0x1e4   : > { %v1247_v2 = vsel %vm1245_vm1, %v1246_v1, 0  ;;  %6960 = vmatprep.subr.msk.bf16.mxu0 %vm850_vm2, %v777_v3  ;;  %v852_v4 = vsel %vm850_vm2, %v777_v3, 0  ;;  %s9921_s22 = sld [smem:[#allocation40_spill]]  ;;  %s9922_s8 = sld [smem:[#allocation37_spill]]  ;;  %vm1231_vm4 = vcmask 23552   ;;  %v7166_v23 = vld [vmem:[#allocation11] sm:$0xff]  }
 0x1e5   : > { %6855 = vmatpush3.bf16.msra.mxu0 %v852_v4  ;;  %v1249_v8 = vand.u32 %v1247_v2, %v1203_v7  ;;  %v7167_v24 = vld [vmem:[#allocation11 + $0x8] sm:$0xff]   ;;  %v6169_v25 = vld [vmem:[#allocation5] ss:$0 sm:$0xff]  ;;  %vm1014_vm5 = vcmask 523264   ;;  %vm1152_vm6 = vcmask 261120   ;;  %vm1482_vm7 = vcmask 1041409  }
 0x1e6   : > { %s6965_s1 = smul.u32 15, %s9036_s14  ;;  %s9923_s18 = sld [smem:[#allocation53_spill]] }
 0x1e7   : > { %6896 = vmatprep.subr.bf16.mxu0 %v1249_v8  ;;  %s6966_s21 = smul.u32 30, %s9036_s14  ;;  %s5921_s3 = scalar_lea.sflag [#allocation4], %s9036_s14 }
 0x1e8   : > { %v7150_v5 = vld [vmem:[%s9920_s6] sm:$0xff]   ;;  %v7151_v6 = vld [vmem:[%s9920_s6 + $0x8] sm:$0xff]   ;;  %v7152_v9 = vld [vmem:[%s9920_s6 + $0x10] sm:$0xff]   ;;  %s9560_s13 = scalar_lea.vmem [#allocation23], %s6965_s1  ;;  %p9924_p0 = scmp.ne.s32.totalorder %s9885_s29, 0 }
 0x1e9   : > { %6856 = vmatprep.mubr.msk.bf16.mxu0 %vm825_vm3, %v7150_v5  ;;  %v7153_v10 = vld [vmem:[%s9920_s6 + $0x18] sm:$0xff]   ;;  %v7154_v11 = vld [vmem:[%s9920_s6 + $0x20] sm:$0xff]   ;;  %v7155_v14 = vld [vmem:[%s9920_s6 + $0x28] sm:$0xff]   ;;  %s9594_s17 = scalar_lea.vmem [#allocation24], %s6966_s21 }
 0x1ea   : > { %6857 = vmatmul.mubr.msk.bf16.vlgmr.msra.gmra.mrb[0].mxu0 %vm825_vm3, %v7151_v6  ;;  %v7162_v12 = vld [vmem:[%s9921_s22] sm:$0xff]   ;;  %v7163_v13 = vld [vmem:[%s9921_s22 + $0x8] sm:$0xff]   ;;  %v7156_v15 = vld [vmem:[%s9920_s6 + $0x30] sm:$0xff]   ;;  %s5935_s12 = sshll.u32 %s9594_s17, 4  ;;  %s9773_s12 = int_to_ptr.vmem [resolvable:$true] %s5935_s12 }
 0x1eb   : > { %6897 = vmatpush3.bf16.msra.mxu0 %v1249_v8  ;;  %6860 = vmatprep.mubr.msk.bf16.mxu0 %vm825_vm3, %v7152_v9  ;;  %v7157_v16 = vld [vmem:[%s9920_s6 + $0x38] sm:$0xff]   ;;  %v7158_v17 = vld [vmem:[%s9922_s8] sm:$0xff]   ;;  %v7159_v18 = vld [vmem:[%s9922_s8 + $0x8] sm:$0xff]   ;;  %s8382_s7 = scalar_lea.vmem %s9773_s12, 480 }
 0x1ec   : > { %6872 = vmatprep.subr.bf16.mxu1 %v7162_v12  ;;  %v7160_v19 = vld [vmem:[%s9922_s8 + $0x10] sm:$0xff]   ;;  %v7161_v20 = vld [vmem:[%s9922_s8 + $0x18] sm:$0xff]   ;;  %6906 = vmatprep.subr.bf16.mxu0 %v7166_v23  ;;  %p8383_p3 = scmp.ne.s32.totalorder %s9773_s12, %s8382_s7 }
 0x1ed   : > { %6873 = vmatpush3.bf16.msra.mxu1 %v7162_v12  ;;  %v7164_v21 = vld [vmem:[%s9921_s22 + $0x10] sm:$0xff]   ;;  %v7165_v22 = vld [vmem:[%s9921_s22 + $0x18] sm:$0xff]  }
 0x1ee   : > { %6874 = vmatprep.subr.bf16.mxu1 %v7163_v13  ;;  %p8384_p5 = pnand %p8383_p3, %p9924_p0 }
 0x1f0   : > { %p8385_p9 = pneg %p8384_p5 }
 0x1f1   : > { %6875 = vmatpush3.bf16.msra.mxu1 %v7163_v13 }
 0x1f2   : > { %6861 = vmatmul.mubr.msk.bf16.gmra.mrb[4].mxu0 %vm825_vm3, %v7153_v10  ;;  %6876 = vmatprep.subr.bf16.mxu1 %v7164_v21 }
 0x1f3   : > { %6864 = vmatprep.mubr.msk.bf16.mxu0 %vm825_vm3, %v7154_v11 }
 0x1f5   : > { %6877 = vmatpush3.bf16.msra.mxu1 %v7164_v21 }
 0x1f6   : > { %6878 = vmatprep.subr.bf16.mxu1 %v7165_v22 }
 0x1f9   : > { %6879 = vmatpush3.bf16.msra.mxu1 %v7165_v22 }
 0x1fa   : > { %6865 = vmatmul.mubr.msk.bf16.gmra.mrb[8].mxu0 %vm825_vm3, %v7155_v14 }
 0x1fb   : > { %6868 = vmatprep.mubr.msk.bf16.mxu0 %vm825_vm3, %v7156_v15 }
 0x202   : > { %6869 = vmatmul.mubr.msk.bf16.gmra.mrb[12].mxu0 %vm825_vm3, %v7157_v16  ;;  %v6199_v16 = vld [vmem:[#allocation10] ss:$0 sm:$0xff] }
 0x203   : > { %6898 = vmatprep.mubr.msk.bf16.mxu0 %vm1231_vm4, %v7158_v17 }
 0x20a   : > { %6899 = vmatmul.mubr.msk.bf16.vlgmr.msra.gmra.mrb[16].mxu0 %vm1231_vm4, %v7159_v18 }
 0x20b   : > { %6902 = vmatprep.mubr.msk.bf16.mxu0 %vm1231_vm4, %v7160_v19  ;;  %6907 = vmatpush3.bf16.msra.mxu0 %v7166_v23 }
 0x20c   : > { %6908 = vmatprep.subr.bf16.mxu0 %v7167_v24 }
 0x20f   : > { %6909 = vmatpush3.bf16.msra.mxu0 %v7167_v24 }
 0x212   : > { %6903 = vmatmul.mubr.msk.bf16.gmra.mrb[20].mxu0 %vm1231_vm4, %v7161_v20 }
 0x2bd   : > { %v6858_v26 = vpop.f32.mrb[0].mxu0 }
 0x2be   : > { %v897_v27 = vadd.f32 %v6858_v26, %v6169_v25  ;;  %v888_v28 = vpop.f32.mrb[1].mxu0 }
 0x2bf   : > { %v889_v29 = vadd.f32 %v6169_v25, %v888_v28  ;;  %v6859_v30 = vpop.f32.mrb[2].mxu0 }
 0x2c0   : > { %v900_v31 = vadd.f32 %v6859_v30, %v6169_v25  ;;  %v891_v32 = vpop.f32.mrb[3].mxu0  ;;  %v953_v34 = vmax.f32 %v897_v27, 0.0 }
 0x2c1   : > { %v892_v33 = vadd.f32 %v6169_v25, %v891_v32  ;;  %v951_v36 = vmax.f32 %v889_v29, 0.0 }
 0x2c2   : > { %v954_v35 = vmax.f32 %v900_v31, 0.0 }
 0x2c3   : > { %v952_v37 = vmax.f32 %v892_v33, 0.0 }
 0x2c4   : > { %v968_v38 = vpack.c.bf16 %v954_v35, %v953_v34 }
 0x2c5   : > { %v6862_v39 = vpop.f32.mrb[4].mxu0  ;;  %v967_v40 = vpack.c.bf16 %v952_v37, %v951_v36 }
 0x2c6   : > { %v913_v41 = vadd.f32 %v6862_v39, %v6169_v25  ;;  %v904_v42 = vpop.f32.mrb[5].mxu0 }
 0x2c7   : > { %v905_v43 = vadd.f32 %v6169_v25, %v904_v42  ;;  %v6863_v44 = vpop.f32.mrb[6].mxu0  ;;  %6880 = vmatprep.mubr.msk.bf16.mxu1 %vm1014_vm5, %v967_v40 }
 0x2c8   : > { %v916_v45 = vadd.f32 %v6863_v44, %v6169_v25  ;;  %v907_v46 = vpop.f32.mrb[7].mxu0  ;;  %6881 = vmatmul.mubr.msk.bf16.vlgmr.msra.gmra.mrb[0].mxu1 %vm1014_vm5, %v968_v38  ;;  %v957_v48 = vmax.f32 %v913_v41, 0.0 }
 0x2c9   : > { %v908_v47 = vadd.f32 %v6169_v25, %v907_v46  ;;  %v955_v50 = vmax.f32 %v905_v43, 0.0 }
 0x2ca   : > { %v958_v49 = vmax.f32 %v916_v45, 0.0 }
 0x2cb   : > { %v956_v51 = vmax.f32 %v908_v47, 0.0  ;;  %v7170_v47 = vld [vmem:[#allocation16 + $0x4] ss:$8 sps:$4 sm:$0xff]  }
 0x2cc   : > { %v970_v52 = vpack.c.bf16 %v958_v49, %v957_v48  ;;  %v7168_v48 = vld [vmem:[#allocation16] ss:$8 sps:$4 sm:$0xff]   ;;  %1528 = vmatprep.subr.bf16.mxu0 %v7170_v47  ;;  %v7173_v49 = vld [vmem:[#allocation16 + $0x14] ss:$8 sps:$4 sm:$0xff]  }
 0x2cd   : > { %v969_v53 = vpack.c.bf16 %v956_v51, %v955_v50  ;;  %v6866_v54 = vpop.f32.mrb[8].mxu0  ;;  %v7171_v50 = vld [vmem:[#allocation16 + $0x10] ss:$8 sps:$4 sm:$0xff]   ;;  %v7176_v51 = vld [vmem:[#allocation16 + $0x24] ss:$8 sps:$4 sm:$0xff]  }
 0x2ce   : > { %v929_v55 = vadd.f32 %v6866_v54, %v6169_v25  ;;  %v920_v56 = vpop.f32.mrb[9].mxu0  ;;  %v7177_v54 = vld [vmem:[#allocation16 + $0x30] ss:$8 sps:$4 sm:$0xff]  }
 0x2cf   : > { %v921_v57 = vadd.f32 %v6169_v25, %v920_v56  ;;  %v6867_v58 = vpop.f32.mrb[10].mxu0  ;;  %6884 = vmatprep.mubr.msk.bf16.mxu1 %vm1014_vm5, %v969_v53  ;;  %v7179_v53 = vld [vmem:[#allocation16 + $0x34] ss:$8 sps:$4 sm:$0xff]   ;;  %v7182_v56 = vld [vmem:[#allocation14 + $0x4] ss:$8 sps:$4 sm:$0xff]  }
 0x2d0   : > { %v932_v59 = vadd.f32 %v6867_v58, %v6169_v25  ;;  %v923_v60 = vpop.f32.mrb[11].mxu0  ;;  %6885 = vmatmul.mubr.msk.bf16.gmra.mrb[4].mxu1 %vm1014_vm5, %v970_v52  ;;  %v961_v62 = vmax.f32 %v929_v55, 0.0  ;;  %v7174_v52 = vld [vmem:[#allocation16 + $0x20] ss:$8 sps:$4 sm:$0xff]   ;;  %v8501_v55 = vmov 0  }
 0x2d1   : > { %v924_v61 = vadd.f32 %v6169_v25, %v923_v60  ;;  %v959_v0 = vmax.f32 %v921_v57, 0.0  ;;  %v7186_v57 = vld [vmem:[#allocation19] ss:$16 sps:$4 sm:$0xff]   ;;  %v7188_v58 = vld [vmem:[#allocation19 + $0x4] ss:$16 sps:$4 sm:$0xff]  }
 0x2d2   : > { %v962_v63 = vmax.f32 %v932_v59, 0.0  ;;  %v7194_v59 = vld [vmem:[#allocation19 + $0x24] ss:$16 sps:$4 sm:$0xff]   ;;  %2063 = vmatprep.subr.bf16.mxu1 %v7188_v58  ;;  %v7192_v60 = vld [vmem:[#allocation19 + $0x20] ss:$16 sps:$4 sm:$0xff]  }
 0x2d3   : > { %v960_v1 = vmax.f32 %v924_v61, 0.0  ;;  %2064 = vmatpush1.bf16.msra.mxu1 %v7186_v57  ;;  %v7200_v61 = vld [vmem:[#allocation19 + $0x44] ss:$16 sps:$4 sm:$0xff]  }
 0x2d4   : > { %v972_v2 = vpack.c.bf16 %v962_v63, %v961_v62  ;;  %2065 = vmatprep.subr.bf16.mxu1 %v7194_v59  ;;  %v7198_v62 = vld [vmem:[#allocation19 + $0x40] ss:$16 sps:$4 sm:$0xff]   ;;  %v7206_v63 = vld [vmem:[#allocation19 + $0x64] ss:$16 sps:$4 sm:$0xff]  }
 0x2d5   : > { %v971_v3 = vpack.c.bf16 %v960_v1, %v959_v0  ;;  %v6870_v4 = vpop.f32.mrb[12].mxu0  ;;  %v7204_v0 = vld [vmem:[#allocation19 + $0x60] ss:$16 sps:$4 sm:$0xff]   ;;  %v7212_v1 = vld [vmem:[#allocation19 + $0x84] ss:$16 sps:$4 sm:$0xff]  }
 0x2d6   : > { %v945_v5 = vadd.f32 %v6870_v4, %v6169_v25  ;;  %v936_v6 = vpop.f32.mrb[13].mxu0  ;;  %v7216_v4 = vld [vmem:[#allocation19 + $0xa0] ss:$16 sps:$4 sm:$0xff]  }
 0x2d7   : > { %v937_v7 = vadd.f32 %v6169_v25, %v936_v6  ;;  %v6871_v8 = vpop.f32.mrb[14].mxu0  ;;  %6888 = vmatprep.mubr.msk.bf16.mxu1 %vm1014_vm5, %v971_v3  ;;  %2066 = vmatpush1.bf16.msra.mxu1 %v7192_v60  ;;  %v7218_v3 = vld [vmem:[#allocation19 + $0xa4] ss:$16 sps:$4 sm:$0xff]   ;;  %v7222_v6 = vld [vmem:[#allocation19 + $0xc0] ss:$16 sps:$4 sm:$0xff]  }
 0x2d8   : > { %v948_v9 = vadd.f32 %v6871_v8, %v6169_v25  ;;  %v939_v10 = vpop.f32.mrb[15].mxu0  ;;  %6889 = vmatmul.mubr.msk.bf16.gmra.mrb[8].mxu1 %vm1014_vm5, %v972_v2  ;;  %v965_v12 = vmax.f32 %v945_v5, 0.0  ;;  %2067 = vmatprep.subr.bf16.mxu1 %v7200_v61  ;;  %v7210_v2 = vld [vmem:[#allocation19 + $0x80] ss:$16 sps:$4 sm:$0xff]   ;;  %v7224_v5 = vld [vmem:[#allocation19 + $0xc4] ss:$16 sps:$4 sm:$0xff]  }
 0x2d9   : > { %v940_v11 = vadd.f32 %v6169_v25, %v939_v10  ;;  %v963_v14 = vmax.f32 %v937_v7, 0.0  ;;  %v7230_v7 = vld [vmem:[#allocation19 + $0xe4] ss:$16 sps:$4 sm:$0xff]   ;;  %v7228_v8 = vld [vmem:[#allocation19 + $0xe0] ss:$16 sps:$4 sm:$0xff]  }
 0x2da   : > { %v966_v13 = vmax.f32 %v948_v9, 0.0  ;;  %v7236_v9 = vld [vmem:[#allocation19 + $0x104] ss:$16 sps:$4 sm:$0xff]   ;;  %v7234_v10 = vld [vmem:[#allocation19 + $0x100] ss:$16 sps:$4 sm:$0xff]  }
 0x2db   : > { %v964_v15 = vmax.f32 %v940_v11, 0.0  ;;  %2068 = vmatpush1.bf16.msra.mxu1 %v7198_v62  ;;  %v7242_v11 = vld [vmem:[#allocation19 + $0x124] ss:$16 sps:$4 sm:$0xff]  }
 0x2dc   : > { %v974_v17 = vpack.c.bf16 %v966_v13, %v965_v12  ;;  %2069 = vmatprep.subr.bf16.mxu1 %v7206_v63  ;;  %v7240_v12 = vld [vmem:[#allocation19 + $0x120] ss:$16 sps:$4 sm:$0xff]   ;;  %v7248_v13 = vld [vmem:[#allocation19 + $0x144] ss:$16 sps:$4 sm:$0xff]  }
 0x2dd   : > { %v973_v18 = vpack.c.bf16 %v964_v15, %v963_v14  ;;  %v6900_v19 = vpop.f32.mrb[16].mxu0  ;;  %v7246_v14 = vld [vmem:[#allocation19 + $0x140] ss:$16 sps:$4 sm:$0xff]   ;;  %v7254_v15 = vld [vmem:[#allocation19 + $0x164] ss:$16 sps:$4 sm:$0xff]  }
 0x2de   : > { %v1294_v20 = vadd.f32 %v6900_v19, %v6199_v16  ;;  %v1285_v21 = vpop.f32.mrb[17].mxu0 }
 0x2df   : > { %v1286_v22 = vadd.f32 %v6199_v16, %v1285_v21  ;;  %6892 = vmatprep.mubr.msk.bf16.mxu1 %vm1014_vm5, %v973_v18  ;;  %v6901_v23 = vpop.f32.mrb[18].mxu0  ;;  %2070 = vmatpush1.bf16.msra.mxu1 %v7204_v0 }
 0x2e0   : > { %v1297_v24 = vadd.f32 %v6901_v23, %v6199_v16  ;;  %6893 = vmatmul.mubr.msk.bf16.gmra.mrb[12].mxu1 %vm1014_vm5, %v974_v17  ;;  %v1288_v26 = vpop.f32.mrb[19].mxu0  ;;  %v1318_v25 = vmax.f32 %v1294_v20, 0.0  ;;  %2071 = vmatprep.subr.bf16.mxu1 %v7212_v1  ;;  %v9114_v17 = vld [vmem:[#allocation7] ss:$0 sm:$0xff] }
 0x2e1   : > { %v1289_v27 = vadd.f32 %v6199_v16, %v1288_v26  ;;  %v1316_v29 = vmax.f32 %v1286_v22, 0.0 }
 0x2e2   : > { %v1319_v28 = vmax.f32 %v1297_v24, 0.0 }
 0x2e3   : > { %v1317_v30 = vmax.f32 %v1289_v27, 0.0  ;;  %2072 = vmatpush1.bf16.msra.mxu1 %v7210_v2 }
 0x2e4   : > { %v1325_v31 = vpack.c.bf16 %v1319_v28, %v1318_v25  ;;  %2073 = vmatprep.subr.bf16.mxu1 %v7218_v3 }
 0x2e5   : > { %v1324_v32 = vpack.c.bf16 %v1317_v30, %v1316_v29  ;;  %v6904_v33 = vpop.f32.mrb[20].mxu0 }
 0x2e6   : > { %v1310_v34 = vadd.f32 %v6904_v33, %v6199_v16  ;;  %v1301_v35 = vpop.f32.mrb[21].mxu0 }
 0x2e7   : > { %v1302_v36 = vadd.f32 %v6199_v16, %v1301_v35  ;;  %v6905_v37 = vpop.f32.mrb[22].mxu0  ;;  %6910 = vmatprep.mubr.msk.bf16.mxu0 %vm1152_vm6, %v1324_v32  ;;  %2074 = vmatpush1.bf16.msra.mxu1 %v7216_v4 }
 0x2e8   : > { %v1313_v38 = vadd.f32 %v6905_v37, %v6199_v16  ;;  %v1304_v39 = vpop.f32.mrb[23].mxu0  ;;  %6911 = vmatmul.mubr.msk.bf16.vlgmr.msra.gmra.mrb[24].mxu0 %vm1152_vm6, %v1325_v31  ;;  %v1322_v41 = vmax.f32 %v1310_v34, 0.0  ;;  %2075 = vmatprep.subr.bf16.mxu1 %v7224_v5 }
 0x2e9   : > { %v1305_v40 = vadd.f32 %v6199_v16, %v1304_v39  ;;  %v1320_v43 = vmax.f32 %v1302_v36, 0.0  ;;  %1529 = vmatpush1.bf16.msra.mxu0 %v7168_v48  ;;  %v7252_v16 = vld [vmem:[#allocation19 + $0x160] ss:$16 sps:$4 sm:$0xff]  }
 0x2ea   : > { %v1323_v42 = vmax.f32 %v1313_v38, 0.0  ;;  %1530 = vmatprep.subr.bf16.mxu0 %v7173_v49 }
 0x2eb   : > { %v1321_v44 = vmax.f32 %v1305_v40, 0.0  ;;  %2076 = vmatpush1.bf16.msra.mxu1 %v7222_v6 }
 0x2ec   : > { %v1327_v45 = vpack.c.bf16 %v1323_v42, %v1322_v41  ;;  %2077 = vmatprep.subr.bf16.mxu1 %v7230_v7 }
 0x2ed   : > { %v1326_v46 = vpack.c.bf16 %v1321_v44, %v1320_v43  ;;  %1531 = vmatpush1.bf16.msra.mxu0 %v7171_v50 }
 0x2ee   : > { %1532 = vmatprep.subr.bf16.mxu0 %v7176_v51 }
 0x2ef   : > { %6914 = vmatprep.mubr.msk.bf16.mxu0 %vm1152_vm6, %v1326_v46  ;;  %2078 = vmatpush1.bf16.msra.mxu1 %v7228_v8 }
 0x2f0   : > { %6915 = vmatmul.mubr.msk.bf16.gmra.mrb[28].mxu0 %vm1152_vm6, %v1327_v45  ;;  %2079 = vmatprep.subr.bf16.mxu1 %v7236_v9 }
 0x2f1   : > { %1533 = vmatpush1.bf16.msra.mxu0 %v7174_v52  ;;  %1560 = vmatprep.mubr.bf16.mxu0 %v8501_v55 }
 0x2f2   : > { %1534 = vmatprep.subr.bf16.mxu0 %v7179_v53 }
 0x2f3   : > { %2080 = vmatpush1.bf16.msra.mxu1 %v7234_v10 }
 0x2f4   : > { %2081 = vmatprep.subr.bf16.mxu1 %v7242_v11 }
 0x2f5   : > { %1535 = vmatpush1.bf16.msra.mxu0 %v7177_v54 }
 0x2f6   : > { %1598 = vmatprep.subr.bf16.mxu0 %v7182_v56 }
 0x2f7   : > { %2082 = vmatpush1.bf16.msra.mxu1 %v7240_v12 }
 0x2f8   : > { %2083 = vmatprep.subr.bf16.mxu1 %v7248_v13 }
 0x2fb   : > { %2084 = vmatpush1.bf16.msra.mxu1 %v7246_v14 }
 0x2fc   : > { %2085 = vmatprep.subr.bf16.mxu1 %v7254_v15 }
 0x2ff   : > { %2086 = vmatpush1.bf16.msra.mxu1 %v7252_v16 }
 0x39b   : > { %v6882_v18 = vpop.f32.mrb[0].mxu1 }
 0x39c   : > { %v1082_v19 = vadd.f32 %v6882_v18, %v9114_v17  ;;  %v1073_v20 = vpop.f32.mrb[1].mxu1 }
 0x39d   : > { %v1074_v21 = vadd.f32 %v9114_v17, %v1073_v20  ;;  %v6883_v22 = vpop.f32.mrb[2].mxu1 }
 0x39e   : > { %v1138_v23 = vmax.f32 %v1082_v19, 0.0  ;;  %v1085_v24 = vadd.f32 %v6883_v22, %v9114_v17  ;;  %v1076_v26 = vpop.f32.mrb[3].mxu1 }
 0x39f   : > { %v1136_v27 = vmax.f32 %v1074_v21, 0.0  ;;  %v1077_v25 = vadd.f32 %v9114_v17, %v1076_v26 }
 0x3a0   : > { %v1155_v28 = vsel %vm1152_vm6, %v1138_v23, -inf  ;;  %v1139_v29 = vmax.f32 %v1085_v24, 0.0 }
 0x3a1   : > { %v1153_v30 = vsel %vm1152_vm6, %v1136_v27, -inf  ;;  %v1137_v31 = vmax.f32 %v1077_v25, 0.0 }
 0x3a2   : > { %v1156_v32 = vmax.f32 %v1153_v30, %v1155_v28  ;;  %v1157_v33 = vsel %vm1152_vm6, %v1139_v29, -inf  ;;  %v6208_v28 = vld [vmem:[#allocation13] ss:$0 sm:$0xff] }
 0x3a3   : > { %v1154_v34 = vsel %vm1152_vm6, %v1137_v31, -inf  ;;  %v6886_v35 = vpop.f32.mrb[4].mxu1 }
 0x3a4   : > { %v1158_v36 = vmax.f32 %v1154_v34, %v1157_v33  ;;  %v1098_v37 = vadd.f32 %v6886_v35, %v9114_v17  ;;  %v1089_v38 = vpop.f32.mrb[5].mxu1 }
 0x3a5   : > { %v1090_v39 = vadd.f32 %v9114_v17, %v1089_v38  ;;  %v6887_v40 = vpop.f32.mrb[6].mxu1 }
 0x3a6   : > { %v1101_v41 = vadd.f32 %v6887_v40, %v9114_v17  ;;  %v1092_v42 = vpop.f32.mrb[7].mxu1  ;;  %v1142_v43 = vmax.f32 %v1098_v37, 0.0 }
 0x3a7   : > { %v1140_v44 = vmax.f32 %v1090_v39, 0.0  ;;  %v1093_v45 = vadd.f32 %v9114_v17, %v1092_v42 }
 0x3a8   : > { %v1143_v47 = vmax.f32 %v1101_v41, 0.0  ;;  %v1163_v50 = vsel %vm1152_vm6, %v1142_v43, -inf }
 0x3a9   : > { %v1159_v46 = vsel %vm1152_vm6, %v1140_v44, -inf  ;;  %v1141_v48 = vmax.f32 %v1093_v45, 0.0 }
 0x3aa   : > { %v1160_v49 = vmax.f32 %v1156_v32, %v1159_v46  ;;  %v1165_v58 = vsel %vm1152_vm6, %v1143_v47, -inf }
 0x3ab   : > { %v1161_v51 = vsel %vm1152_vm6, %v1141_v48, -inf  ;;  %v6890_v52 = vpop.f32.mrb[8].mxu1 }
 0x3ac   : > { %v1164_v53 = vmax.f32 %v1160_v49, %v1163_v50  ;;  %v1162_v54 = vmax.f32 %v1158_v36, %v1161_v51  ;;  %v1114_v56 = vadd.f32 %v6890_v52, %v9114_v17  ;;  %v1105_v57 = vpop.f32.mrb[9].mxu1 }
 0x3ad   : > { %v1106_v59 = vadd.f32 %v9114_v17, %v1105_v57  ;;  %v6891_v60 = vpop.f32.mrb[10].mxu1 }
 0x3ae   : > { %v1166_v61 = vmax.f32 %v1162_v54, %v1165_v58  ;;  %v1146_v62 = vmax.f32 %v1114_v56, 0.0  ;;  %v1117_v63 = vadd.f32 %v6891_v60, %v9114_v17  ;;  %v1108_v0 = vpop.f32.mrb[11].mxu1 }
 0x3af   : > { %v1144_v1 = vmax.f32 %v1106_v59, 0.0  ;;  %v1109_v2 = vadd.f32 %v9114_v17, %v1108_v0 }
 0x3b0   : > { %v1167_v3 = vmax.f32 %v1164_v53, %v1166_v61  ;;  %v1176_v4 = vsel %vm1152_vm6, %v1146_v62, -inf  ;;  %v1147_v5 = vmax.f32 %v1117_v63, 0.0 }
 0x3b1   : > { %v1174_v6 = vsel %vm1152_vm6, %v1144_v1, -inf  ;;  %v1145_v7 = vmax.f32 %v1109_v2, 0.0 }
 0x3b2   : > { %v1177_v8 = vmax.f32 %v1174_v6, %v1176_v4  ;;  %v1178_v9 = vsel %vm1152_vm6, %v1147_v5, -inf  ;;  %v1168_v10 = vrot.slane %v1167_v3, 4 }
 0x3b3   : > { %v1175_v11 = vsel %vm1152_vm6, %v1145_v7, -inf  ;;  %v6894_v12 = vpop.f32.mrb[12].mxu1 }
 0x3b4   : > { %v1179_v13 = vmax.f32 %v1175_v11, %v1178_v9  ;;  %v1130_v14 = vadd.f32 %v6894_v12, %v9114_v17  ;;  %v1121_v15 = vpop.f32.mrb[13].mxu1  ;;  %v1169_v21 = vmax.f32 %v1167_v3, %v1168_v10 }
 0x3b5   : > { %v1122_v16 = vadd.f32 %v9114_v17, %v1121_v15  ;;  %v6895_v18 = vpop.f32.mrb[14].mxu1 }
 0x3b6   : > { %v1133_v19 = vadd.f32 %v6895_v18, %v9114_v17  ;;  %v1124_v20 = vpop.f32.mrb[15].mxu1  ;;  %v1150_v22 = vmax.f32 %v1130_v14, 0.0  ;;  %v1170_v30 = vrot.slane %v1169_v21, 2 }
 0x3b7   : > { %v1148_v23 = vmax.f32 %v1122_v16, 0.0  ;;  %v1125_v24 = vadd.f32 %v9114_v17, %v1124_v20 }
 0x3b8   : > { %v1151_v27 = vmax.f32 %v1133_v19, 0.0  ;;  %v1184_v31 = vsel %vm1152_vm6, %v1150_v22, -inf  ;;  %v1171_v44 = vmax.f32 %v1169_v21, %v1170_v30 }
 0x3b9   : > { %v1180_v26 = vsel %vm1152_vm6, %v1148_v23, -inf  ;;  %v1149_v25 = vmax.f32 %v1125_v24, 0.0 }
 0x3ba   : > { %v1181_v29 = vmax.f32 %v1177_v8, %v1180_v26  ;;  %v1186_v38 = vsel %vm1152_vm6, %v1151_v27, -inf  ;;  %v1172_v56 = vrot.slane %v1171_v44, 1 }
 0x3bb   : > { %v1182_v32 = vsel %vm1152_vm6, %v1149_v25, -inf  ;;  %v6912_v33 = vpop.f32.mrb[24].mxu0 }
 0x3bc   : > { %v1185_v34 = vmax.f32 %v1181_v29, %v1184_v31  ;;  %v1183_v35 = vmax.f32 %v1179_v13, %v1182_v32  ;;  %v1406_v36 = vadd.f32 %v6912_v33, %v6208_v28  ;;  %v1397_v37 = vpop.f32.mrb[25].mxu0  ;;  %v1173_v6 = vmax.f32 %v1171_v44, %v1172_v56  ;;  %v7207_v56 = vld [vmem:[#allocation19 + $0x68] ss:$16 sps:$4 sm:$0xff]  }
 0x3bd   : > { %v1398_v39 = vadd.f32 %v6208_v28, %v1397_v37  ;;  %v6913_v17 = vpop.f32.mrb[26].mxu0 }
 0x3be   : > { %v1187_v40 = vmax.f32 %v1183_v35, %v1186_v38  ;;  %v1430_v41 = vmax.f32 %v1406_v36, 0.0  ;;  %v1409_v42 = vadd.f32 %v6913_v17, %v6208_v28  ;;  %v1400_v43 = vpop.f32.mrb[27].mxu0  ;;  %v1462_v21 = vpack.c.bf16 %v1173_v6, %v1173_v6  ;;  %v7257_v6 = vld [vmem:[#allocation19 + $0x16c] ss:$16 sps:$4 sm:$0xff]  }
 0x3bf   : > { %v1428_v45 = vmax.f32 %v1398_v39, 0.0  ;;  %v1401_v46 = vadd.f32 %v6208_v28, %v1400_v43  ;;  %v7180_v43 = vld [vmem:[#allocation14] ss:$8 sps:$4 sm:$0xff]  }
 0x3c0   : > { %v1188_v47 = vmax.f32 %v1185_v34, %v1187_v40  ;;  %v1438_v48 = vsel %vm1014_vm5, %v1430_v41, -inf  ;;  %v1431_v49 = vmax.f32 %v1409_v42, 0.0 }
 0x3c1   : > { %v1436_v50 = vsel %vm1014_vm5, %v1428_v45, -inf  ;;  %v1429_v51 = vmax.f32 %v1401_v46, 0.0  ;;  %v7185_v45 = vld [vmem:[#allocation14 + $0x14] ss:$8 sps:$4 sm:$0xff]   ;;  %v7183_v46 = vld [vmem:[#allocation14 + $0x10] ss:$8 sps:$4 sm:$0xff]  }
 0x3c2   : > { %v1189_v52 = vrot.slane %v1188_v47, 4  ;;  %v1439_v53 = vmax.f32 %v1436_v50, %v1438_v48  ;;  %v1440_v54 = vsel %vm1014_vm5, %v1431_v49, -inf  ;;  %v7189_v48 = vld [vmem:[#allocation19 + $0x8] ss:$16 sps:$4 sm:$0xff]   ;;  %v7197_v50 = vld [vmem:[#allocation19 + $0x2c] ss:$16 sps:$4 sm:$0xff]  }
 0x3c3   : > { %v1437_v57 = vsel %vm1014_vm5, %v1429_v51, -inf  ;;  %v6916_v58 = vpop.f32.mrb[28].mxu0  ;;  %v7195_v51 = vld [vmem:[#allocation19 + $0x28] ss:$16 sps:$4 sm:$0xff]  }
 0x3c4   : > { %v1190_v59 = vmax.f32 %v1188_v47, %v1189_v52  ;;  %v1441_v60 = vmax.f32 %v1437_v57, %v1440_v54  ;;  %v1422_v61 = vadd.f32 %v6916_v58, %v6208_v28  ;;  %v1413_v62 = vpop.f32.mrb[29].mxu0  ;;  %v7191_v47 = vld [vmem:[#allocation19 + $0xc] ss:$16 sps:$4 sm:$0xff]   ;;  %v7213_v57 = vld [vmem:[#allocation19 + $0x88] ss:$16 sps:$4 sm:$0xff]  }
 0x3c5   : > { %v1414_v63 = vadd.f32 %v6208_v28, %v1413_v62  ;;  %v6917_v0 = vpop.f32.mrb[30].mxu0  ;;  %v7203_v52 = vld [vmem:[#allocation19 + $0x4c] ss:$16 sps:$4 sm:$0xff]  }
 0x3c6   : > { %v1191_v1 = vrot.slane %v1190_v59, 2  ;;  %v1442_v2 = vmax.f32 %v1439_v53, %v1441_v60  ;;  %v1434_v3 = vmax.f32 %v1422_v61, 0.0  ;;  %v1425_v4 = vadd.f32 %v6917_v0, %v6208_v28  ;;  %v1416_v5 = vpop.f32.mrb[31].mxu0  ;;  %v7201_v53 = vld [vmem:[#allocation19 + $0x48] ss:$16 sps:$4 sm:$0xff]  }
 0x3c7   : > { %v1432_v7 = vmax.f32 %v1414_v63, 0.0  ;;  %v1417_v8 = vadd.f32 %v6208_v28, %v1416_v5  ;;  %v1571_v28 = vunpack.c.l.b16 %v1462_v21  ;;  %v7209_v54 = vld [vmem:[#allocation19 + $0x6c] ss:$16 sps:$4 sm:$0xff]   ;;  %v7225_v61 = vld [vmem:[#allocation19 + $0xc8] ss:$16 sps:$4 sm:$0xff]  }
 0x3c8   : > { %v1192_v9 = vmax.f32 %v1190_v59, %v1191_v1  ;;  %v1443_v10 = vrot.slane %v1442_v2, 4  ;;  %v1451_v11 = vsel %vm1014_vm5, %v1434_v3, -inf  ;;  %v1435_v12 = vmax.f32 %v1425_v4, 0.0  ;;  %v7221_v58 = vld [vmem:[#allocation19 + $0xac] ss:$16 sps:$4 sm:$0xff]  }
 0x3c9   : > { %v1449_v13 = vsel %vm1014_vm5, %v1432_v7, -inf  ;;  %v1433_v14 = vmax.f32 %v1417_v8, 0.0  ;;  %v7219_v59 = vld [vmem:[#allocation19 + $0xa8] ss:$16 sps:$4 sm:$0xff]   ;;  %v7227_v60 = vld [vmem:[#allocation19 + $0xcc] ss:$16 sps:$4 sm:$0xff]  }
 0x3ca   : > { %v1193_v15 = vrot.slane %v1192_v9, 1  ;;  %v1444_v16 = vmax.f32 %v1442_v2, %v1443_v10  ;;  %v1452_v18 = vmax.f32 %v1449_v13, %v1451_v11  ;;  %v1453_v19 = vsel %vm1014_vm5, %v1435_v12, -inf  ;;  %v7233_v62 = vld [vmem:[#allocation19 + $0xec] ss:$16 sps:$4 sm:$0xff]   ;;  %v7231_v63 = vld [vmem:[#allocation19 + $0xe8] ss:$16 sps:$4 sm:$0xff]  }
 0x3cb   : > { %v1450_v20 = vsel %vm1014_vm5, %v1433_v14, -inf  ;;  %v7239_v0 = vld [vmem:[#allocation19 + $0x10c] ss:$16 sps:$4 sm:$0xff]   ;;  %v7237_v1 = vld [vmem:[#allocation19 + $0x108] ss:$16 sps:$4 sm:$0xff]  }
 0x3cc   : > { %v1194_v22 = vmax.f32 %v1192_v9, %v1193_v15  ;;  %v1445_v23 = vrot.slane %v1444_v16, 2  ;;  %v1454_v24 = vmax.f32 %v1450_v20, %v1453_v19  ;;  %v7245_v2 = vld [vmem:[#allocation19 + $0x12c] ss:$16 sps:$4 sm:$0xff]   ;;  %v7243_v3 = vld [vmem:[#allocation19 + $0x128] ss:$16 sps:$4 sm:$0xff]  }
 0x3cd   : > { %v7251_v4 = vld [vmem:[#allocation19 + $0x14c] ss:$16 sps:$4 sm:$0xff]   ;;  %v7249_v5 = vld [vmem:[#allocation19 + $0x148] ss:$16 sps:$4 sm:$0xff]   ;;  %v7260_v8 = vld [vmem:[#allocation19 + $0x184] ss:$16 sps:$4 sm:$0xff]  }
 0x3ce   : > { %v1463_v26 = vpack.c.bf16 %v1194_v22, %v1194_v22  ;;  %v1446_v27 = vmax.f32 %v1444_v16, %v1445_v23  ;;  %v1455_v25 = vmax.f32 %v1452_v18, %v1454_v24  ;;  %v7255_v7 = vld [vmem:[#allocation19 + $0x168] ss:$16 sps:$4 sm:$0xff]   ;;  %v7263_v9 = vld [vmem:[#allocation19 + $0x18c] ss:$16 sps:$4 sm:$0xff]   ;;  %v7258_v10 = vld [vmem:[#allocation19 + $0x180] ss:$16 sps:$4 sm:$0xff]   ;;  %2087 = vmatprep.subr.bf16.mxu1 %v7260_v8 }
 0x3cf   : > { %v7261_v11 = vld [vmem:[#allocation19 + $0x188] ss:$16 sps:$4 sm:$0xff]   ;;  %v7266_v12 = vld [vmem:[#allocation19 + $0x1a4] ss:$16 sps:$4 sm:$0xff]   ;;  %2088 = vmatpush1.bf16.msra.mxu1 %v7258_v10  ;;  %v7264_v13 = vld [vmem:[#allocation19 + $0x1a0] ss:$16 sps:$4 sm:$0xff]  }
 0x3d0   : > { %v1572_v29 = vunpack.c.l.b16 %v1463_v26  ;;  %v1456_v30 = vrot.slane %v1455_v25, 4  ;;  %v1447_v31 = vrot.slane %v1446_v27, 1  ;;  %v7267_v14 = vld [vmem:[#allocation19 + $0x1a8] ss:$16 sps:$4 sm:$0xff]   ;;  %v7269_v15 = vld [vmem:[#allocation19 + $0x1ac] ss:$16 sps:$4 sm:$0xff]   ;;  %2089 = vmatprep.subr.bf16.mxu1 %v7266_v12 }
 0x3d1   : > { %v7272_v16 = vld [vmem:[#allocation19 + $0x1c4] ss:$16 sps:$4 sm:$0xff]   ;;  %v7275_v18 = vld [vmem:[#allocation19 + $0x1cc] ss:$16 sps:$4 sm:$0xff]   ;;  %v7270_v19 = vld [vmem:[#allocation19 + $0x1c0] ss:$16 sps:$4 sm:$0xff]  }
 0x3d2   : > { %v1457_v32 = vmax.f32 %v1455_v25, %v1456_v30  ;;  %v1573_v33 = vsel %vm1482_vm7, %v1572_v29, %v1571_v28  ;;  %v1448_v35 = vmax.f32 %v1446_v27, %v1447_v31  ;;  %v7273_v20 = vld [vmem:[#allocation19 + $0x1c8] ss:$16 sps:$4 sm:$0xff]   ;;  %v7278_v21 = vld [vmem:[#allocation19 + $0x1e4] ss:$16 sps:$4 sm:$0xff]   ;;  %v7281_v22 = vld [vmem:[#allocation19 + $0x1ec] ss:$16 sps:$4 sm:$0xff]   ;;  %v1641_v25 = vlaneseq }
 0x3d3   : > { %v1574_v49 = vpack.c.b16 %v1573_v33, %v1573_v33  ;;  %2090 = vmatpush1.bf16.msra.mxu1 %v7264_v13  ;;  %v7276_v23 = vld [vmem:[#allocation19 + $0x1e0] ss:$16 sps:$4 sm:$0xff]   ;;  %v7279_v24 = vld [vmem:[#allocation19 + $0x1e8] ss:$16 sps:$4 sm:$0xff]  }
 0x3d4   : > { %v1458_v34 = vrot.slane %v1457_v32, 2  ;;  %v1468_v38 = vpack.c.bf16 %v1448_v35, %v1448_v35  ;;  %2091 = vmatprep.subr.bf16.mxu1 %v7272_v16  ;;  %v7284_v26 = vld [vmem:[%s9039_s4 + $0x4] ss:$60 sps:$4 sm:$0xff]   ;;  %v7287_v27 = vld [vmem:[%s9039_s4 + $0xc] ss:$60 sps:$4 sm:$0xff]   ;;  %v9163_v28 = vshrl.u32 %v1641_v25, 7 }
 0x3d5   : > { %v7323_v8 = vld [vmem:[%s9039_s4 + $0x2dc] ss:$60 sps:$4 sm:$0xff]   ;;  %v7329_v12 = vld [vmem:[%s9039_s4 + $0x354] ss:$60 sps:$4 sm:$0xff]   ;;  %v7324_v13 = vld [vmem:[%s9039_s4 + $0x348] ss:$60 sps:$4 sm:$0xff]  }
 0x3d6   : > { %v1459_v36 = vmax.f32 %v1457_v32, %v1458_v34  ;;  %v1480_v40 = vunpack.c.l.b16 %v1468_v38  ;;  %v9166_v33 = vsub.s32 0, %v9163_v28  ;;  %v1639_v34 = vld [vmem:[#allocation17] sm:$0x3]  ;;  %v9169_v35 = vsub.s32 1, %v9163_v28  ;;  %v7335_v16 = vld [vmem:[%s9039_s4 + $0x3cc] ss:$60 sps:$4 sm:$0xff]  }
 0x3d7   : > { %2092 = vmatpush1.bf16.msra.mxu1 %v7270_v19  ;;  %v7321_v10 = vld [vmem:[%s9039_s4 + $0x2d8] ss:$60 sps:$4 sm:$0xff]   ;;  %v7333_v19 = vld [vmem:[%s9039_s4 + $0x3c8] ss:$60 sps:$4 sm:$0xff]  }
 0x3d8   : > { %v1460_v37 = vrot.slane %v1459_v36, 1  ;;  %2093 = vmatprep.subr.bf16.mxu1 %v7278_v21  ;;  %v1648_v38 = vrot.slane %v1639_v34, %v9169_v35  ;;  %v7341_v21 = vld [vmem:[%s9039_s4 + $0x444] ss:$60 sps:$4 sm:$0xff]   ;;  %v7345_v25 = vld [vmem:[%s9039_s4 + $0x4b8] ss:$60 sps:$4 sm:$0xff]  }
 0x3da   : > { %v1461_v39 = vmax.f32 %v1459_v36, %v1460_v37  ;;  %v1644_v36 = vrot.slane %v1639_v34, %v9166_v33  ;;  %v7356_v34 = vld [vmem:[%s9039_s4 + $0x5a4] ss:$60 sps:$4 sm:$0xff]  }
 0x3db   : > { %2094 = vmatpush1.bf16.msra.mxu1 %v7276_v23  ;;  %v7339_v23 = vld [vmem:[%s9039_s4 + $0x440] ss:$60 sps:$4 sm:$0xff]  }
 0x3dc   : > { %v1469_v17 = vpack.c.bf16 %v1461_v39, %v1461_v39  ;;  %5176 = vmatprep.subr.bf16.mxu1 %v7284_v26  ;;  %v7347_v26 = vld [vmem:[%s9039_s4 + $0x4bc] ss:$60 sps:$4 sm:$0xff]  }
 0x3de   : > { %v1481_v41 = vunpack.c.l.b16 %v1469_v17 }
 0x3e0   : > { %v1483_v42 = vsel %vm1482_vm7, %v1481_v41, %v1480_v40 }
 0x3e1   : > { %v1484_v44 = vpack.c.b16 %v1483_v42, %v1483_v42 }
 0x3e3   : > { %6223 = vmatmul.mubr.msk.bf16.vlgmr.msra.gmra.mrb[32].mxu0 %vm1014_vm5, %v1484_v44 }
 0x3e4   : > { %1599 = vmatpush1.bf16.msra.mxu0 %v7180_v43  ;;  %1630 = vmatprep.mubr.bf16.mxu0 %v8501_v55  ;;  %v7215_v55 = vld [vmem:[#allocation19 + $0x8c] ss:$16 sps:$4 sm:$0xff]  }
 0x3e5   : > { %1600 = vmatprep.subr.bf16.mxu0 %v7185_v45 }
 0x3e8   : > { %1601 = vmatpush1.bf16.msra.mxu0 %v7183_v46 }
 0x3e9   : > { %2104 = vmatprep.subr.bf16.mxu0 %v7191_v47 }
 0x3eb   : > { %6228 = vmatmul.mubr.msk.bf16.vlgmr.msra.gmra.mrb[36].mxu0 %vm1152_vm6, %v1574_v49  ;;  %v7285_v49 = vld [vmem:[%s9039_s4 + $0x8] ss:$60 sps:$4 sm:$0xff]  }
 0x3ec   : > { %2105 = vmatpush1.bf16.msra.mxu0 %v7189_v48  ;;  %v7282_v48 = vld [vmem:[%s9039_s4] ss:$60 sps:$4 sm:$0xff]  }
 0x3ed   : > { %2106 = vmatprep.subr.bf16.mxu0 %v7197_v50 }
 0x3f0   : > { %2107 = vmatpush1.bf16.msra.mxu0 %v7195_v51  ;;  %v7290_v51 = vld [vmem:[%s9039_s4 + $0x7c] ss:$60 sps:$4 sm:$0xff]  }
 0x3f1   : > { %2108 = vmatprep.subr.bf16.mxu0 %v7203_v52  ;;  %v7293_v52 = vld [vmem:[%s9039_s4 + $0x84] ss:$60 sps:$4 sm:$0xff]  }
 0x3f4   : > { %2109 = vmatpush1.bf16.msra.mxu0 %v7201_v53  ;;  %v7288_v53 = vld [vmem:[%s9039_s4 + $0x78] ss:$60 sps:$4 sm:$0xff]  }
 0x3f5   : > { %2110 = vmatprep.subr.bf16.mxu0 %v7209_v54  ;;  %v7291_v54 = vld [vmem:[%s9039_s4 + $0x80] ss:$60 sps:$4 sm:$0xff]  }
 0x3f8   : > { %2111 = vmatpush1.bf16.msra.mxu0 %v7207_v56  ;;  %v7296_v56 = vld [vmem:[%s9039_s4 + $0xf4] ss:$60 sps:$4 sm:$0xff]  }
 0x3f9   : > { %2112 = vmatprep.subr.bf16.mxu0 %v7215_v55  ;;  %v7299_v55 = vld [vmem:[%s9039_s4 + $0xfc] ss:$60 sps:$4 sm:$0xff]  }
 0x3fc   : > { %2113 = vmatpush1.bf16.msra.mxu0 %v7213_v57  ;;  %v7294_v57 = vld [vmem:[%s9039_s4 + $0xf0] ss:$60 sps:$4 sm:$0xff]  }
 0x3fd   : > { %2114 = vmatprep.subr.bf16.mxu0 %v7221_v58  ;;  %v7297_v58 = vld [vmem:[%s9039_s4 + $0xf8] ss:$60 sps:$4 sm:$0xff]  }
 0x400   : > { %2115 = vmatpush1.bf16.msra.mxu0 %v7219_v59  ;;  %v7302_v59 = vld [vmem:[%s9039_s4 + $0x16c] ss:$60 sps:$4 sm:$0xff]  }
 0x401   : > { %2116 = vmatprep.subr.bf16.mxu0 %v7227_v60  ;;  %v7305_v60 = vld [vmem:[%s9039_s4 + $0x174] ss:$60 sps:$4 sm:$0xff]  }
 0x404   : > { %2117 = vmatpush1.bf16.msra.mxu0 %v7225_v61  ;;  %v7300_v61 = vld [vmem:[%s9039_s4 + $0x168] ss:$60 sps:$4 sm:$0xff]  }
 0x405   : > { %2118 = vmatprep.subr.bf16.mxu0 %v7233_v62  ;;  %v7303_v62 = vld [vmem:[%s9039_s4 + $0x170] ss:$60 sps:$4 sm:$0xff]  }
 0x408   : > { %2119 = vmatpush1.bf16.msra.mxu0 %v7231_v63  ;;  %v7308_v63 = vld [vmem:[%s9039_s4 + $0x1e4] ss:$60 sps:$4 sm:$0xff]  }
 0x409   : > { %2120 = vmatprep.subr.bf16.mxu0 %v7239_v0  ;;  %v7311_v0 = vld [vmem:[%s9039_s4 + $0x1ec] ss:$60 sps:$4 sm:$0xff]  }
 0x40c   : > { %2121 = vmatpush1.bf16.msra.mxu0 %v7237_v1  ;;  %v7306_v1 = vld [vmem:[%s9039_s4 + $0x1e0] ss:$60 sps:$4 sm:$0xff]  }
 0x40d   : > { %2122 = vmatprep.subr.bf16.mxu0 %v7245_v2  ;;  %v7309_v2 = vld [vmem:[%s9039_s4 + $0x1e8] ss:$60 sps:$4 sm:$0xff]  }
 0x410   : > { %2123 = vmatpush1.bf16.msra.mxu0 %v7243_v3  ;;  %v7314_v3 = vld [vmem:[%s9039_s4 + $0x25c] ss:$60 sps:$4 sm:$0xff]  }
 0x411   : > { %2124 = vmatprep.subr.bf16.mxu0 %v7251_v4  ;;  %v7317_v4 = vld [vmem:[%s9039_s4 + $0x264] ss:$60 sps:$4 sm:$0xff]  }
 0x414   : > { %2125 = vmatpush1.bf16.msra.mxu0 %v7249_v5  ;;  %v7312_v5 = vld [vmem:[%s9039_s4 + $0x258] ss:$60 sps:$4 sm:$0xff]  }
 0x415   : > { %2126 = vmatprep.subr.bf16.mxu0 %v7257_v6  ;;  %v7315_v6 = vld [vmem:[%s9039_s4 + $0x260] ss:$60 sps:$4 sm:$0xff]  }
 0x418   : > { %2127 = vmatpush1.bf16.msra.mxu0 %v7255_v7  ;;  %v7320_v7 = vld [vmem:[%s9039_s4 + $0x2d4] ss:$60 sps:$4 sm:$0xff]  }
 0x419   : > { %2128 = vmatprep.subr.bf16.mxu0 %v7263_v9  ;;  %v7318_v9 = vld [vmem:[%s9039_s4 + $0x2d0] ss:$60 sps:$4 sm:$0xff]  }
 0x41c   : > { %2129 = vmatpush1.bf16.msra.mxu0 %v7261_v11  ;;  %v7326_v11 = vld [vmem:[%s9039_s4 + $0x34c] ss:$60 sps:$4 sm:$0xff]  }
 0x41d   : > { %2130 = vmatprep.subr.bf16.mxu0 %v7269_v15  ;;  %v7332_v15 = vld [vmem:[%s9039_s4 + $0x3c4] ss:$60 sps:$4 sm:$0xff]  }
 0x420   : > { %2131 = vmatpush1.bf16.msra.mxu0 %v7267_v14  ;;  %v7327_v14 = vld [vmem:[%s9039_s4 + $0x350] ss:$60 sps:$4 sm:$0xff]  }
 0x421   : > { %2132 = vmatprep.subr.bf16.mxu0 %v7275_v18  ;;  %v7330_v18 = vld [vmem:[%s9039_s4 + $0x3c0] ss:$60 sps:$4 sm:$0xff]  }
 0x424   : > { %2133 = vmatpush1.bf16.msra.mxu0 %v7273_v20  ;;  %v7338_v20 = vld [vmem:[%s9039_s4 + $0x43c] ss:$60 sps:$4 sm:$0xff]  }
 0x425   : > { %2134 = vmatprep.subr.bf16.mxu0 %v7281_v22  ;;  %v7336_v22 = vld [vmem:[%s9039_s4 + $0x438] ss:$60 sps:$4 sm:$0xff]  }
 0x428   : > { %2135 = vmatpush1.bf16.msra.mxu0 %v7279_v24  ;;  %v7344_v24 = vld [vmem:[%s9039_s4 + $0x4b4] ss:$60 sps:$4 sm:$0xff]  }
 0x429   : > { %5258 = vmatprep.subr.bf16.mxu0 %v7287_v27  ;;  %v7342_v27 = vld [vmem:[%s9039_s4 + $0x4b0] ss:$60 sps:$4 sm:$0xff]  }
 0x4b6   : > { %v1562_v29 = vpop.f32.mrb[32].mxu0 }
 0x4b7   : > { %v1564_v30 = vpop.f32.mrb[33].mxu0 }
 0x4b8   : > { %v1566_v31 = vpop.f32.mrb[34].mxu0 }
 0x4b9   : > { %v1567_v32 = vpop.f32.mrb[35].mxu0  ;;  %v7348_v31 = vld [vmem:[%s9039_s4 + $0x528] ss:$60 sps:$4 sm:$0xff]  }
 0x4ba   : > { %v7351_v32 = vld [vmem:[%s9039_s4 + $0x530] ss:$60 sps:$4 sm:$0xff]  }
 0x4be   : > { %v1632_v37 = vpop.f32.mrb[36].mxu0 }
 0x4bf   : > { %v1633_v39 = vadd.f32 %v1632_v37, %v1562_v29  ;;  %v1634_v17 = vpop.f32.mrb[37].mxu0  ;;  %v7350_v29 = vld [vmem:[%s9039_s4 + $0x52c] ss:$60 sps:$4 sm:$0xff]   ;;  %v7354_v37 = vld [vmem:[%s9039_s4 + $0x5a0] ss:$60 sps:$4 sm:$0xff]  }
 0x4c0   : > { %v1635_v40 = vadd.f32 %v1634_v17, %v1564_v30  ;;  %v1636_v41 = vpop.f32.mrb[38].mxu0  ;;  %v7353_v30 = vld [vmem:[%s9039_s4 + $0x534] ss:$60 sps:$4 sm:$0xff]   ;;  %v7365_v17 = vld [vmem:[%s9039_s4 + $0x624] ss:$60 sps:$4 sm:$0xff]  }
 0x4c1   : > { %v1651_v42 = vadd.f32 %v1644_v36, %v1633_v39  ;;  %v1637_v43 = vpop.f32.mrb[39].mxu0  ;;  %v7359_v36 = vld [vmem:[%s9039_s4 + $0x5ac] ss:$60 sps:$4 sm:$0xff]   ;;  %v7362_v39 = vld [vmem:[%s9039_s4 + $0x61c] ss:$60 sps:$4 sm:$0xff]  }
 0x4c2   : > { %v1652_v44 = vadd.f32 %v1648_v38, %v1635_v40  ;;  %v7357_v38 = vld [vmem:[%s9039_s4 + $0x5a8] ss:$60 sps:$4 sm:$0xff]   ;;  %v7360_v40 = vld [vmem:[%s9039_s4 + $0x618] ss:$60 sps:$4 sm:$0xff]   ;;  %v7363_v41 = vld [vmem:[%s9039_s4 + $0x620] ss:$60 sps:$4 sm:$0xff]  }
 0x4c3   : > { %v1653_v45 = vmax.f32 %v1651_v42, 0.0  ;;  %v7368_v42 = vld [vmem:[%s9039_s4 + $0x694] ss:$60 sps:$4 sm:$0xff]   ;;  %v7371_v43 = vld [vmem:[%s9039_s4 + $0x69c] ss:$60 sps:$4 sm:$0xff]  }
 0x4c4   : > { %v1654_v46 = vmax.f32 %v1652_v44, 0.0  ;;  %v7366_v44 = vld [vmem:[%s9039_s4 + $0x690] ss:$60 sps:$4 sm:$0xff]  }
 0x4c5   : > { %v1655_v50 = vpack.c.bf16 %v1653_v45, %v1653_v45  ;;  %v7369_v45 = vld [vmem:[%s9039_s4 + $0x698] ss:$60 sps:$4 sm:$0xff]  }
 0x4c6   : > { %v1656_v47 = vpack.c.bf16 %v1654_v46, %v1654_v46  ;;  %v7374_v46 = vld [vmem:[%s9039_s4 + $0x70c] ss:$60 sps:$4 sm:$0xff]  }
 0x4c8   : > { %2095 = vmatprep.mubr.bf16.mxu1 %v1656_v47  ;;  %2136 = vmatprep.mubr.bf16.mxu0 %v1656_v47  ;;  %v7377_v47 = vld [vmem:[%s9039_s4 + $0x714] ss:$60 sps:$4 sm:$0xff]  }
 0x4c9   : > { %2096 = vmatmul.mubr.bf16.vlgmr.msra.gmra.mrb[16].mxu1 %v1655_v50  ;;  %2137 = vmatmul.mubr.bf16.vlgmr.msra.gmra.mrb[40].mxu0 %v1655_v50  ;;  %v7380_v50 = vld [vmem:[%s9039_s4 + $0x784] ss:$60 sps:$4 sm:$0xff]  }
 0x4ca   : > { %5177 = vmatpush1.bf16.msra.mxu1 %v7282_v48  ;;  %5259 = vmatpush1.bf16.msra.mxu0 %v7285_v49  ;;  %v7372_v48 = vld [vmem:[%s9039_s4 + $0x708] ss:$60 sps:$4 sm:$0xff]   ;;  %v7375_v49 = vld [vmem:[%s9039_s4 + $0x710] ss:$60 sps:$4 sm:$0xff]  }
 0x4cb   : > { %5178 = vmatprep.subr.bf16.mxu1 %v7290_v51  ;;  %5260 = vmatprep.subr.bf16.mxu0 %v7293_v52  ;;  %v7383_v51 = vld [vmem:[%s9039_s4 + $0x78c] ss:$60 sps:$4 sm:$0xff]   ;;  %v9237_v52 = vld [vmem:[#allocation20] sm:$0xf] }
 0x4ce   : > { %5179 = vmatpush1.bf16.msra.mxu1 %v7288_v53  ;;  %5261 = vmatpush1.bf16.msra.mxu0 %v7291_v54  ;;  %v9240_v53 = vsub.s32 3, %v9163_v28  ;;  %v1726_v54 = vrot.slane %v9237_v52, %v9166_v33 }
 0x4cf   : > { %5180 = vmatprep.subr.bf16.mxu1 %v7296_v56  ;;  %5262 = vmatprep.subr.bf16.mxu0 %v7299_v55  ;;  %v1730_v56 = vrot.slane %v9237_v52, %v9169_v35 }
 0x4d0   : > { %v1738_v55 = vrot.slane %v9237_v52, %v9240_v53 }
 0x4d2   : > { %5181 = vmatpush1.bf16.msra.mxu1 %v7294_v57  ;;  %5263 = vmatpush1.bf16.msra.mxu0 %v7297_v58 }
 0x4d3   : > { %5182 = vmatprep.subr.bf16.mxu1 %v7302_v59  ;;  %5264 = vmatprep.subr.bf16.mxu0 %v7305_v60 }
 0x4d6   : > { %5183 = vmatpush1.bf16.msra.mxu1 %v7300_v61  ;;  %5265 = vmatpush1.bf16.msra.mxu0 %v7303_v62 }
 0x4d7   : > { %5184 = vmatprep.subr.bf16.mxu1 %v7308_v63  ;;  %5266 = vmatprep.subr.bf16.mxu0 %v7311_v0 }
 0x4da   : > { %5185 = vmatpush1.bf16.msra.mxu1 %v7306_v1  ;;  %5267 = vmatpush1.bf16.msra.mxu0 %v7309_v2 }
 0x4db   : > { %5186 = vmatprep.subr.bf16.mxu1 %v7314_v3  ;;  %5268 = vmatprep.subr.bf16.mxu0 %v7317_v4 }
 0x4de   : > { %5187 = vmatpush1.bf16.msra.mxu1 %v7312_v5  ;;  %5269 = vmatpush1.bf16.msra.mxu0 %v7315_v6 }
 0x4df   : > { %5188 = vmatprep.subr.bf16.mxu1 %v7320_v7  ;;  %5270 = vmatprep.subr.bf16.mxu0 %v7323_v8  ;;  %v7378_v8 = vld [vmem:[%s9039_s4 + $0x780] ss:$60 sps:$4 sm:$0xff]  }
 0x4e2   : > { %5189 = vmatpush1.bf16.msra.mxu1 %v7318_v9  ;;  %5271 = vmatpush1.bf16.msra.mxu0 %v7321_v10  ;;  %v7381_v9 = vld [vmem:[%s9039_s4 + $0x788] ss:$60 sps:$4 sm:$0xff]  }
 0x4e3   : > { %5190 = vmatprep.subr.bf16.mxu1 %v7326_v11  ;;  %5272 = vmatprep.subr.bf16.mxu0 %v7329_v12  ;;  %v7386_v11 = vld [vmem:[%s9039_s4 + $0x7fc] ss:$60 sps:$4 sm:$0xff]   ;;  %v7389_v12 = vld [vmem:[%s9039_s4 + $0x804] ss:$60 sps:$4 sm:$0xff]  }
 0x4e6   : > { %5191 = vmatpush1.bf16.msra.mxu1 %v7324_v13  ;;  %5273 = vmatpush1.bf16.msra.mxu0 %v7327_v14  ;;  %v7384_v14 = vld [vmem:[%s9039_s4 + $0x7f8] ss:$60 sps:$4 sm:$0xff]  }
 0x4e7   : > { %5192 = vmatprep.subr.bf16.mxu1 %v7332_v15  ;;  %5274 = vmatprep.subr.bf16.mxu0 %v7335_v16  ;;  %v7387_v15 = vld [vmem:[%s9039_s4 + $0x800] ss:$60 sps:$4 sm:$0xff]   ;;  %v7392_v16 = vld [vmem:[%s9039_s4 + $0x874] ss:$60 sps:$4 sm:$0xff]  }
 0x4ea   : > { %5193 = vmatpush1.bf16.msra.mxu1 %v7330_v18  ;;  %5275 = vmatpush1.bf16.msra.mxu0 %v7333_v19  ;;  %v7395_v18 = vld [vmem:[%s9039_s4 + $0x87c] ss:$60 sps:$4 sm:$0xff]   ;;  %v7390_v19 = vld [vmem:[%s9039_s4 + $0x870] ss:$60 sps:$4 sm:$0xff]  }
 0x4eb   : > { %5194 = vmatprep.subr.bf16.mxu1 %v7338_v20  ;;  %5276 = vmatprep.subr.bf16.mxu0 %v7341_v21  ;;  %v7393_v20 = vld [vmem:[%s9039_s4 + $0x878] ss:$60 sps:$4 sm:$0xff]   ;;  %v7398_v21 = vld [vmem:[%s9039_s4 + $0x8ec] ss:$60 sps:$4 sm:$0xff]  }
 0x4ee   : > { %5195 = vmatpush1.bf16.msra.mxu1 %v7336_v22  ;;  %5277 = vmatpush1.bf16.msra.mxu0 %v7339_v23  ;;  %v7401_v22 = vld [vmem:[%s9039_s4 + $0x8f4] ss:$60 sps:$4 sm:$0xff]   ;;  %v7396_v23 = vld [vmem:[%s9039_s4 + $0x8e8] ss:$60 sps:$4 sm:$0xff]  }
 0x4ef   : > { %5196 = vmatprep.subr.bf16.mxu1 %v7344_v24  ;;  %5278 = vmatprep.subr.bf16.mxu0 %v7347_v26  ;;  %v7399_v24 = vld [vmem:[%s9039_s4 + $0x8f0] ss:$60 sps:$4 sm:$0xff]   ;;  %v7404_v26 = vld [vmem:[%s9039_s4 + $0x964] ss:$60 sps:$4 sm:$0xff]  }
 0x4f2   : > { %5197 = vmatpush1.bf16.msra.mxu1 %v7342_v27  ;;  %5279 = vmatpush1.bf16.msra.mxu0 %v7345_v25  ;;  %v7407_v27 = vld [vmem:[%s9039_s4 + $0x96c] ss:$60 sps:$4 sm:$0xff]   ;;  %v7402_v25 = vld [vmem:[%s9039_s4 + $0x960] ss:$60 sps:$4 sm:$0xff]  }
 0x4f3   : > { %5198 = vmatprep.subr.bf16.mxu1 %v7350_v29  ;;  %5280 = vmatprep.subr.bf16.mxu0 %v7353_v30  ;;  %v7405_v29 = vld [vmem:[%s9039_s4 + $0x968] ss:$60 sps:$4 sm:$0xff]   ;;  %v7410_v30 = vld [vmem:[%s9039_s4 + $0x9dc] ss:$60 sps:$4 sm:$0xff]  }
 0x4f6   : > { %5199 = vmatpush1.bf16.msra.mxu1 %v7348_v31  ;;  %5281 = vmatpush1.bf16.msra.mxu0 %v7351_v32  ;;  %v7413_v31 = vld [vmem:[%s9039_s4 + $0x9e4] ss:$60 sps:$4 sm:$0xff]   ;;  %v7408_v32 = vld [vmem:[%s9039_s4 + $0x9d8] ss:$60 sps:$4 sm:$0xff]  }
 0x4f7   : > { %5200 = vmatprep.subr.bf16.mxu1 %v7356_v34  ;;  %5282 = vmatprep.subr.bf16.mxu0 %v7359_v36  ;;  %v7411_v34 = vld [vmem:[%s9039_s4 + $0x9e0] ss:$60 sps:$4 sm:$0xff]   ;;  %v7416_v36 = vld [vmem:[%s9039_s4 + $0xa54] ss:$60 sps:$4 sm:$0xff]  }
 0x4fa   : > { %5201 = vmatpush1.bf16.msra.mxu1 %v7354_v37  ;;  %5283 = vmatpush1.bf16.msra.mxu0 %v7357_v38  ;;  %v7419_v37 = vld [vmem:[%s9039_s4 + $0xa5c] ss:$60 sps:$4 sm:$0xff]   ;;  %v7414_v38 = vld [vmem:[%s9039_s4 + $0xa50] ss:$60 sps:$4 sm:$0xff]  }
 0x4fb   : > { %5202 = vmatprep.subr.bf16.mxu1 %v7362_v39  ;;  %5284 = vmatprep.subr.bf16.mxu0 %v7365_v17  ;;  %v7417_v39 = vld [vmem:[%s9039_s4 + $0xa58] ss:$60 sps:$4 sm:$0xff]   ;;  %v7422_v17 = vld [vmem:[%s9039_s4 + $0xacc] ss:$60 sps:$4 sm:$0xff]  }
 0x4fe   : > { %5203 = vmatpush1.bf16.msra.mxu1 %v7360_v40  ;;  %5285 = vmatpush1.bf16.msra.mxu0 %v7363_v41  ;;  %v7425_v40 = vld [vmem:[%s9039_s4 + $0xad4] ss:$60 sps:$4 sm:$0xff]   ;;  %v7420_v41 = vld [vmem:[%s9039_s4 + $0xac8] ss:$60 sps:$4 sm:$0xff]  }
 0x4ff   : > { %5204 = vmatprep.subr.bf16.mxu1 %v7368_v42  ;;  %5286 = vmatprep.subr.bf16.mxu0 %v7371_v43  ;;  %v7423_v42 = vld [vmem:[%s9039_s4 + $0xad0] ss:$60 sps:$4 sm:$0xff]   ;;  %v7428_v43 = vld [vmem:[%s9039_s4 + $0xb44] ss:$60 sps:$4 sm:$0xff]  }
 0x502   : > { %5205 = vmatpush1.bf16.msra.mxu1 %v7366_v44  ;;  %5287 = vmatpush1.bf16.msra.mxu0 %v7369_v45  ;;  %v7431_v44 = vld [vmem:[%s9039_s4 + $0xb4c] ss:$60 sps:$4 sm:$0xff]   ;;  %v7426_v45 = vld [vmem:[%s9039_s4 + $0xb40] ss:$60 sps:$4 sm:$0xff]  }
 0x503   : > { %5206 = vmatprep.subr.bf16.mxu1 %v7374_v46  ;;  %5288 = vmatprep.subr.bf16.mxu0 %v7377_v47  ;;  %v7429_v46 = vld [vmem:[%s9039_s4 + $0xb48] ss:$60 sps:$4 sm:$0xff]   ;;  %v7434_v47 = vld [vmem:[%s9039_s4 + $0xbbc] ss:$60 sps:$4 sm:$0xff]  }
 0x506   : > { %5207 = vmatpush1.bf16.msra.mxu1 %v7372_v48  ;;  %5289 = vmatpush1.bf16.msra.mxu0 %v7375_v49  ;;  %v7437_v48 = vld [vmem:[%s9039_s4 + $0xbc4] ss:$60 sps:$4 sm:$0xff]   ;;  %v7432_v49 = vld [vmem:[%s9039_s4 + $0xbb8] ss:$60 sps:$4 sm:$0xff]  }
 0x507   : > { %5217 = vmatprep.subr.bf16.mxu1 %v7380_v50  ;;  %5299 = vmatprep.subr.bf16.mxu0 %v7383_v51  ;;  %v7435_v50 = vld [vmem:[%s9039_s4 + $0xbc0] ss:$60 sps:$4 sm:$0xff]   ;;  %v7440_v51 = vld [vmem:[%s9039_s4 + $0xc34] ss:$60 sps:$4 sm:$0xff]  }
 0x59c   : > { %v2097_v57 = vpop.f32.mrb[16].mxu1  ;;  %v9248_v58 = vpop.f32.mrb[40].mxu0 }
 0x59d   : > { %v2098_v59 = vadd.f32 %v2097_v57, %v1726_v54  ;;  %v2099_v60 = vpop.f32.mrb[17].mxu1  ;;  %v2140_v61 = vpop.f32.mrb[41].mxu0  ;;  %v7443_v54 = vld [vmem:[%s9039_s4 + $0xc3c] ss:$60 sps:$4 sm:$0xff]   ;;  %v7446_v57 = vld [vmem:[%s9039_s4 + $0xcac] ss:$60 sps:$4 sm:$0xff]  }
 0x59e   : > { %v2100_v62 = vadd.f32 %v2099_v60, %v1730_v56  ;;  %v2141_v63 = vadd.f32 %v2140_v61, %v1738_v55  ;;  %v2101_v0 = vpop.f32.mrb[18].mxu1  ;;  %v2142_v1 = vpop.f32.mrb[42].mxu0  ;;  %v7438_v56 = vld [vmem:[%s9039_s4 + $0xc30] ss:$60 sps:$4 sm:$0xff]   ;;  %v7441_v55 = vld [vmem:[%s9039_s4 + $0xc38] ss:$60 sps:$4 sm:$0xff]  }
 0x59f   : > { %v2145_v2 = vmax.f32 %v2098_v59, 0.0  ;;  %v2102_v3 = vpop.f32.mrb[19].mxu1  ;;  %v2143_v4 = vpop.f32.mrb[43].mxu0  ;;  %v7449_v59 = vld [vmem:[%s9039_s4 + $0xcb4] ss:$60 sps:$4 sm:$0xff]  }
 0x5a0   : > { %v2146_v5 = vmax.f32 %v2100_v62, 0.0  ;;  %v2148_v6 = vmax.f32 %v2141_v63, 0.0  ;;  %v7444_v60 = vld [vmem:[%s9039_s4 + $0xca8] ss:$60 sps:$4 sm:$0xff]   ;;  %v7447_v61 = vld [vmem:[%s9039_s4 + $0xcb0] ss:$60 sps:$4 sm:$0xff]  }
 0x5a1   : > { %v9254_v10 = vpack.c.bf16 %v2145_v2, %v2145_v2  ;;  %v7452_v62 = vld [vmem:[%s9039_s4 + $0xd24] ss:$60 sps:$4 sm:$0xff]   ;;  %v7455_v63 = vld [vmem:[%s9039_s4 + $0xd2c] ss:$60 sps:$4 sm:$0xff]   ;;  %v9313_v2 = vsub.s32 2, %v9163_v28 }
 0x5a2   : > { %v9250_v7 = vpack.c.bf16 %v2146_v5, %v2146_v5  ;;  %v9260_v13 = vpack.c.bf16 %v2148_v6, %v2148_v6  ;;  %v7450_v0 = vld [vmem:[%s9039_s4 + $0xd20] ss:$60 sps:$4 sm:$0xff]   ;;  %v7453_v1 = vld [vmem:[%s9039_s4 + $0xd28] ss:$60 sps:$4 sm:$0xff]   ;;  %v7456_v5 = vld [vmem:[%s9039_s4 + $0xd98] ss:$60 sps:$4 sm:$0xff]  }
 0x5a3   : > { %v7458_v3 = vld [vmem:[%s9039_s4 + $0xd9c] ss:$60 sps:$4 sm:$0xff]   ;;  %v7461_v4 = vld [vmem:[%s9039_s4 + $0xda4] ss:$60 sps:$4 sm:$0xff]  }
 0x5a4   : > { %5208 = vmatprep.mubr.bf16.mxu1 %v9250_v7  ;;  %5290 = vmatprep.mubr.bf16.mxu0 %v9250_v7  ;;  %v7459_v6 = vld [vmem:[%s9039_s4 + $0xda0] ss:$60 sps:$4 sm:$0xff]  }
 0x5a5   : > { %5209 = vmatmul.mubr.bf16.vlgmr.msra.gmra.mrb[20].mxu1 %v9254_v10  ;;  %5291 = vmatmul.mubr.bf16.vlgmr.msra.gmra.mrb[44].mxu0 %v9254_v10 }
 0x5a6   : > { %5218 = vmatpush1.bf16.msra.mxu1 %v7378_v8  ;;  %5300 = vmatpush1.bf16.msra.mxu0 %v7381_v9  ;;  %v1734_v8 = vrot.slane %v9237_v52, %v9313_v2  ;;  %v7464_v9 = vld [vmem:[%s9039_s4 + $0xe14] ss:$60 sps:$4 sm:$0xff]  }
 0x5a7   : > { %5249 = vmatprep.mubr.bf16.mxu1 %v9260_v13  ;;  %5331 = vmatprep.mubr.bf16.mxu0 %v9260_v13  ;;  %v7473_v52 = vld [vmem:[%s9039_s4 + $0xe94] ss:$60 sps:$4 sm:$0xff]  }
 0x5a8   : > { %5219 = vmatprep.subr.bf16.mxu1 %v7386_v11  ;;  %5301 = vmatprep.subr.bf16.mxu0 %v7389_v12  ;;  %v7467_v11 = vld [vmem:[%s9039_s4 + $0xe1c] ss:$60 sps:$4 sm:$0xff]   ;;  %v7462_v12 = vld [vmem:[%s9039_s4 + $0xe10] ss:$60 sps:$4 sm:$0xff]  }
 0x5aa   : > { %5220 = vmatpush1.bf16.msra.mxu1 %v7384_v14  ;;  %5302 = vmatpush1.bf16.msra.mxu0 %v7387_v15  ;;  %v7465_v14 = vld [vmem:[%s9039_s4 + $0xe18] ss:$60 sps:$4 sm:$0xff]   ;;  %v2139_v15 = vadd.f32 %v9248_v58, %v1734_v8  ;;  %v7474_v58 = vld [vmem:[%s9039_s4 + $0x10] ss:$60 sps:$4 sm:$0xff]  }
 0x5ab   : > { %5221 = vmatprep.subr.bf16.mxu1 %v7392_v16  ;;  %5303 = vmatprep.subr.bf16.mxu0 %v7395_v18  ;;  %v7470_v16 = vld [vmem:[%s9039_s4 + $0xe8c] ss:$60 sps:$4 sm:$0xff]   ;;  %v7542_v8 = vld [vmem:[%s9039_s4 + $0x53c] ss:$60 sps:$4 sm:$0xff]  }
 0x5ac   : > { %v7468_v18 = vld [vmem:[%s9039_s4 + $0xe88] ss:$60 sps:$4 sm:$0xff]  }
 0x5ae   : > { %5222 = vmatpush1.bf16.msra.mxu1 %v7390_v19  ;;  %5304 = vmatpush1.bf16.msra.mxu0 %v7393_v20  ;;  %v7471_v19 = vld [vmem:[%s9039_s4 + $0xe90] ss:$60 sps:$4 sm:$0xff]   ;;  %v2147_v20 = vmax.f32 %v2139_v15, 0.0  ;;  %v7551_v15 = vld [vmem:[%s9039_s4 + $0x5bc] ss:$60 sps:$4 sm:$0xff]  }
 0x5af   : > { %5223 = vmatprep.subr.bf16.mxu1 %v7398_v21  ;;  %5305 = vmatprep.subr.bf16.mxu0 %v7401_v22  ;;  %v7476_v21 = vld [vmem:[%s9039_s4 + $0x14] ss:$60 sps:$4 sm:$0xff]   ;;  %v7479_v22 = vld [vmem:[%s9039_s4 + $0x1c] ss:$60 sps:$4 sm:$0xff]  }
 0x5b2   : > { %5224 = vmatpush1.bf16.msra.mxu1 %v7396_v23  ;;  %5306 = vmatpush1.bf16.msra.mxu0 %v7399_v24  ;;  %v9333_v23 = vpack.c.bf16 %v2147_v20, %v2147_v20  ;;  %v7477_v24 = vld [vmem:[%s9039_s4 + $0x18] ss:$60 sps:$4 sm:$0xff]   ;;  %v7552_v20 = vld [vmem:[%s9039_s4 + $0x628] ss:$60 sps:$4 sm:$0xff]  }
 0x5b3   : > { %5225 = vmatprep.subr.bf16.mxu1 %v7404_v26  ;;  %5307 = vmatprep.subr.bf16.mxu0 %v7407_v27  ;;  %v7482_v26 = vld [vmem:[%s9039_s4 + $0x8c] ss:$60 sps:$4 sm:$0xff]   ;;  %v7485_v27 = vld [vmem:[%s9039_s4 + $0x94] ss:$60 sps:$4 sm:$0xff]  }
 0x5b6   : > { %5226 = vmatpush1.bf16.msra.mxu1 %v7402_v25  ;;  %5308 = vmatpush1.bf16.msra.mxu0 %v7405_v29  ;;  %v7480_v25 = vld [vmem:[%s9039_s4 + $0x88] ss:$60 sps:$4 sm:$0xff]   ;;  %v7483_v29 = vld [vmem:[%s9039_s4 + $0x90] ss:$60 sps:$4 sm:$0xff]  }
 0x5b7   : > { %5227 = vmatprep.subr.bf16.mxu1 %v7410_v30  ;;  %5309 = vmatprep.subr.bf16.mxu0 %v7413_v31  ;;  %v7488_v30 = vld [vmem:[%s9039_s4 + $0x104] ss:$60 sps:$4 sm:$0xff]   ;;  %v7491_v31 = vld [vmem:[%s9039_s4 + $0x10c] ss:$60 sps:$4 sm:$0xff]  }
 0x5ba   : > { %5228 = vmatpush1.bf16.msra.mxu1 %v7408_v32  ;;  %5310 = vmatpush1.bf16.msra.mxu0 %v7411_v34  ;;  %v7486_v32 = vld [vmem:[%s9039_s4 + $0x100] ss:$60 sps:$4 sm:$0xff]   ;;  %v7489_v34 = vld [vmem:[%s9039_s4 + $0x108] ss:$60 sps:$4 sm:$0xff]  }
 0x5bb   : > { %5229 = vmatprep.subr.bf16.mxu1 %v7416_v36  ;;  %5311 = vmatprep.subr.bf16.mxu0 %v7419_v37  ;;  %v7494_v36 = vld [vmem:[%s9039_s4 + $0x17c] ss:$60 sps:$4 sm:$0xff]   ;;  %v7497_v37 = vld [vmem:[%s9039_s4 + $0x184] ss:$60 sps:$4 sm:$0xff]  }
 0x5be   : > { %5230 = vmatpush1.bf16.msra.mxu1 %v7414_v38  ;;  %5312 = vmatpush1.bf16.msra.mxu0 %v7417_v39  ;;  %v7492_v38 = vld [vmem:[%s9039_s4 + $0x178] ss:$60 sps:$4 sm:$0xff]   ;;  %v7495_v39 = vld [vmem:[%s9039_s4 + $0x180] ss:$60 sps:$4 sm:$0xff]  }
 0x5bf   : > { %5231 = vmatprep.subr.bf16.mxu1 %v7422_v17  ;;  %5313 = vmatprep.subr.bf16.mxu0 %v7425_v40  ;;  %v7500_v17 = vld [vmem:[%s9039_s4 + $0x1f4] ss:$60 sps:$4 sm:$0xff]   ;;  %v7503_v40 = vld [vmem:[%s9039_s4 + $0x1fc] ss:$60 sps:$4 sm:$0xff]  }
 0x5c2   : > { %5232 = vmatpush1.bf16.msra.mxu1 %v7420_v41  ;;  %5314 = vmatpush1.bf16.msra.mxu0 %v7423_v42  ;;  %v7498_v41 = vld [vmem:[%s9039_s4 + $0x1f0] ss:$60 sps:$4 sm:$0xff]   ;;  %v7501_v42 = vld [vmem:[%s9039_s4 + $0x1f8] ss:$60 sps:$4 sm:$0xff]  }
 0x5c3   : > { %5233 = vmatprep.subr.bf16.mxu1 %v7428_v43  ;;  %5315 = vmatprep.subr.bf16.mxu0 %v7431_v44  ;;  %v7506_v43 = vld [vmem:[%s9039_s4 + $0x26c] ss:$60 sps:$4 sm:$0xff]   ;;  %v7509_v44 = vld [vmem:[%s9039_s4 + $0x274] ss:$60 sps:$4 sm:$0xff]  }
 0x5c6   : > { %5234 = vmatpush1.bf16.msra.mxu1 %v7426_v45  ;;  %5316 = vmatpush1.bf16.msra.mxu0 %v7429_v46  ;;  %v7504_v45 = vld [vmem:[%s9039_s4 + $0x268] ss:$60 sps:$4 sm:$0xff]   ;;  %v7507_v46 = vld [vmem:[%s9039_s4 + $0x270] ss:$60 sps:$4 sm:$0xff]  }
 0x5c7   : > { %5235 = vmatprep.subr.bf16.mxu1 %v7434_v47  ;;  %5317 = vmatprep.subr.bf16.mxu0 %v7437_v48  ;;  %v7512_v47 = vld [vmem:[%s9039_s4 + $0x2e4] ss:$60 sps:$4 sm:$0xff]   ;;  %v7515_v48 = vld [vmem:[%s9039_s4 + $0x2ec] ss:$60 sps:$4 sm:$0xff]  }
 0x5ca   : > { %5236 = vmatpush1.bf16.msra.mxu1 %v7432_v49  ;;  %5318 = vmatpush1.bf16.msra.mxu0 %v7435_v50  ;;  %v7510_v49 = vld [vmem:[%s9039_s4 + $0x2e0] ss:$60 sps:$4 sm:$0xff]   ;;  %v7513_v50 = vld [vmem:[%s9039_s4 + $0x2e8] ss:$60 sps:$4 sm:$0xff]  }
 0x5cb   : > { %5237 = vmatprep.subr.bf16.mxu1 %v7440_v51  ;;  %5319 = vmatprep.subr.bf16.mxu0 %v7443_v54  ;;  %v7518_v51 = vld [vmem:[%s9039_s4 + $0x35c] ss:$60 sps:$4 sm:$0xff]   ;;  %v7521_v54 = vld [vmem:[%s9039_s4 + $0x364] ss:$60 sps:$4 sm:$0xff]  }
 0x5ce   : > { %5238 = vmatpush1.bf16.msra.mxu1 %v7438_v56  ;;  %5320 = vmatpush1.bf16.msra.mxu0 %v7441_v55  ;;  %v7516_v56 = vld [vmem:[%s9039_s4 + $0x358] ss:$60 sps:$4 sm:$0xff]   ;;  %v7519_v55 = vld [vmem:[%s9039_s4 + $0x360] ss:$60 sps:$4 sm:$0xff]  }
 0x5cf   : > { %5239 = vmatprep.subr.bf16.mxu1 %v7446_v57  ;;  %5321 = vmatprep.subr.bf16.mxu0 %v7449_v59  ;;  %v7524_v57 = vld [vmem:[%s9039_s4 + $0x3d4] ss:$60 sps:$4 sm:$0xff]   ;;  %v7527_v59 = vld [vmem:[%s9039_s4 + $0x3dc] ss:$60 sps:$4 sm:$0xff]  }
 0x5d2   : > { %5240 = vmatpush1.bf16.msra.mxu1 %v7444_v60  ;;  %5322 = vmatpush1.bf16.msra.mxu0 %v7447_v61  ;;  %v7522_v60 = vld [vmem:[%s9039_s4 + $0x3d0] ss:$60 sps:$4 sm:$0xff]   ;;  %v7525_v61 = vld [vmem:[%s9039_s4 + $0x3d8] ss:$60 sps:$4 sm:$0xff]  }
 0x5d3   : > { %5241 = vmatprep.subr.bf16.mxu1 %v7452_v62  ;;  %5323 = vmatprep.subr.bf16.mxu0 %v7455_v63  ;;  %v7530_v62 = vld [vmem:[%s9039_s4 + $0x44c] ss:$60 sps:$4 sm:$0xff]   ;;  %v7533_v63 = vld [vmem:[%s9039_s4 + $0x454] ss:$60 sps:$4 sm:$0xff]  }
 0x5d6   : > { %5242 = vmatpush1.bf16.msra.mxu1 %v7450_v0  ;;  %5324 = vmatpush1.bf16.msra.mxu0 %v7453_v1  ;;  %v7528_v0 = vld [vmem:[%s9039_s4 + $0x448] ss:$60 sps:$4 sm:$0xff]   ;;  %v7531_v1 = vld [vmem:[%s9039_s4 + $0x450] ss:$60 sps:$4 sm:$0xff]  }
 0x5d7   : > { %5243 = vmatprep.subr.bf16.mxu1 %v7458_v3  ;;  %5325 = vmatprep.subr.bf16.mxu0 %v7461_v4  ;;  %v7536_v3 = vld [vmem:[%s9039_s4 + $0x4c4] ss:$60 sps:$4 sm:$0xff]   ;;  %v7539_v4 = vld [vmem:[%s9039_s4 + $0x4cc] ss:$60 sps:$4 sm:$0xff]  }
 0x5da   : > { %5244 = vmatpush1.bf16.msra.mxu1 %v7456_v5  ;;  %5326 = vmatpush1.bf16.msra.mxu0 %v7459_v6  ;;  %v7534_v5 = vld [vmem:[%s9039_s4 + $0x4c0] ss:$60 sps:$4 sm:$0xff]   ;;  %v7537_v6 = vld [vmem:[%s9039_s4 + $0x4c8] ss:$60 sps:$4 sm:$0xff]  }
 0x5db   : > { %5245 = vmatprep.subr.bf16.mxu1 %v7464_v9  ;;  %5327 = vmatprep.subr.bf16.mxu0 %v7467_v11  ;;  %v7545_v9 = vld [vmem:[%s9039_s4 + $0x544] ss:$60 sps:$4 sm:$0xff]   ;;  %v7540_v11 = vld [vmem:[%s9039_s4 + $0x538] ss:$60 sps:$4 sm:$0xff]  }
 0x5de   : > { %5246 = vmatpush1.bf16.msra.mxu1 %v7462_v12  ;;  %5328 = vmatpush1.bf16.msra.mxu0 %v7465_v14  ;;  %v7543_v12 = vld [vmem:[%s9039_s4 + $0x540] ss:$60 sps:$4 sm:$0xff]   ;;  %v7548_v14 = vld [vmem:[%s9039_s4 + $0x5b4] ss:$60 sps:$4 sm:$0xff]  }
 0x5df   : > { %5247 = vmatprep.subr.bf16.mxu1 %v7470_v16  ;;  %5329 = vmatprep.subr.bf16.mxu0 %v7473_v52  ;;  %v7546_v16 = vld [vmem:[%s9039_s4 + $0x5b0] ss:$60 sps:$4 sm:$0xff]   ;;  %v7549_v52 = vld [vmem:[%s9039_s4 + $0x5b8] ss:$60 sps:$4 sm:$0xff]  }
 0x5e2   : > { %5248 = vmatpush1.bf16.msra.mxu1 %v7468_v18  ;;  %5330 = vmatpush1.bf16.msra.mxu0 %v7471_v19  ;;  %v7554_v18 = vld [vmem:[%s9039_s4 + $0x62c] ss:$60 sps:$4 sm:$0xff]   ;;  %v7557_v19 = vld [vmem:[%s9039_s4 + $0x634] ss:$60 sps:$4 sm:$0xff]  }
 0x5e3   : > { %5340 = vmatprep.subr.bf16.mxu1 %v7476_v21  ;;  %5422 = vmatprep.subr.bf16.mxu0 %v7479_v22  ;;  %v7555_v21 = vld [vmem:[%s9039_s4 + $0x630] ss:$60 sps:$4 sm:$0xff]   ;;  %v7560_v22 = vld [vmem:[%s9039_s4 + $0x6a4] ss:$60 sps:$4 sm:$0xff]  }
 0x5e5   : > { %5250 = vmatmul.mubr.bf16.vlgmr.msra.gmra.mrb[20].mxu1 %v9333_v23  ;;  %5332 = vmatmul.mubr.bf16.vlgmr.msra.gmra.mrb[44].mxu0 %v9333_v23 }
 0x5e6   : > { %5341 = vmatpush1.bf16.msra.mxu1 %v7474_v58  ;;  %5372 = vmatprep.mubr.bf16.mxu1 %v9250_v7  ;;  %v7563_v58 = vld [vmem:[%s9039_s4 + $0x6ac] ss:$60 sps:$4 sm:$0xff]  }
 0x5e7   : > { %5423 = vmatpush1.bf16.msra.mxu0 %v7477_v24  ;;  %5454 = vmatprep.mubr.bf16.mxu0 %v9250_v7  ;;  %v7558_v24 = vld [vmem:[%s9039_s4 + $0x6a0] ss:$60 sps:$4 sm:$0xff]  }
 0x5e8   : > { %5342 = vmatprep.subr.bf16.mxu1 %v7482_v26  ;;  %5424 = vmatprep.subr.bf16.mxu0 %v7485_v27  ;;  %v7561_v26 = vld [vmem:[%s9039_s4 + $0x6a8] ss:$60 sps:$4 sm:$0xff]   ;;  %v7566_v27 = vld [vmem:[%s9039_s4 + $0x71c] ss:$60 sps:$4 sm:$0xff]  }
 0x5ea   : > { %5343 = vmatpush1.bf16.msra.mxu1 %v7480_v25  ;;  %v7569_v25 = vld [vmem:[%s9039_s4 + $0x724] ss:$60 sps:$4 sm:$0xff]  }
 0x5eb   : > { %5425 = vmatpush1.bf16.msra.mxu0 %v7483_v29  ;;  %5344 = vmatprep.subr.bf16.mxu1 %v7488_v30  ;;  %v7564_v29 = vld [vmem:[%s9039_s4 + $0x718] ss:$60 sps:$4 sm:$0xff]   ;;  %v7567_v30 = vld [vmem:[%s9039_s4 + $0x720] ss:$60 sps:$4 sm:$0xff]  }
 0x5ec   : > { %5426 = vmatprep.subr.bf16.mxu0 %v7491_v31  ;;  %v7572_v31 = vld [vmem:[%s9039_s4 + $0x794] ss:$60 sps:$4 sm:$0xff]  }
 0x5ee   : > { %5345 = vmatpush1.bf16.msra.mxu1 %v7486_v32  ;;  %v7575_v32 = vld [vmem:[%s9039_s4 + $0x79c] ss:$60 sps:$4 sm:$0xff]  }
 0x5ef   : > { %5427 = vmatpush1.bf16.msra.mxu0 %v7489_v34  ;;  %5346 = vmatprep.subr.bf16.mxu1 %v7494_v36  ;;  %v7570_v34 = vld [vmem:[%s9039_s4 + $0x790] ss:$60 sps:$4 sm:$0xff]   ;;  %v7573_v36 = vld [vmem:[%s9039_s4 + $0x798] ss:$60 sps:$4 sm:$0xff]  }
 0x5f0   : > { %5428 = vmatprep.subr.bf16.mxu0 %v7497_v37  ;;  %v7578_v37 = vld [vmem:[%s9039_s4 + $0x80c] ss:$60 sps:$4 sm:$0xff]  }
 0x5f2   : > { %5347 = vmatpush1.bf16.msra.mxu1 %v7492_v38  ;;  %v7581_v38 = vld [vmem:[%s9039_s4 + $0x814] ss:$60 sps:$4 sm:$0xff]  }
 0x5f3   : > { %5429 = vmatpush1.bf16.msra.mxu0 %v7495_v39  ;;  %5348 = vmatprep.subr.bf16.mxu1 %v7500_v17  ;;  %v7576_v39 = vld [vmem:[%s9039_s4 + $0x808] ss:$60 sps:$4 sm:$0xff]   ;;  %v7579_v17 = vld [vmem:[%s9039_s4 + $0x810] ss:$60 sps:$4 sm:$0xff]  }
 0x5f4   : > { %5430 = vmatprep.subr.bf16.mxu0 %v7503_v40  ;;  %v7584_v40 = vld [vmem:[%s9039_s4 + $0x884] ss:$60 sps:$4 sm:$0xff]  }
 0x5f6   : > { %5349 = vmatpush1.bf16.msra.mxu1 %v7498_v41  ;;  %v7587_v41 = vld [vmem:[%s9039_s4 + $0x88c] ss:$60 sps:$4 sm:$0xff]  }
 0x5f7   : > { %5431 = vmatpush1.bf16.msra.mxu0 %v7501_v42  ;;  %5350 = vmatprep.subr.bf16.mxu1 %v7506_v43  ;;  %v7582_v42 = vld [vmem:[%s9039_s4 + $0x880] ss:$60 sps:$4 sm:$0xff]   ;;  %v7585_v43 = vld [vmem:[%s9039_s4 + $0x888] ss:$60 sps:$4 sm:$0xff]  }
 0x5f8   : > { %5432 = vmatprep.subr.bf16.mxu0 %v7509_v44  ;;  %v7590_v44 = vld [vmem:[%s9039_s4 + $0x8fc] ss:$60 sps:$4 sm:$0xff]  }
 0x5fa   : > { %5351 = vmatpush1.bf16.msra.mxu1 %v7504_v45  ;;  %v7593_v45 = vld [vmem:[%s9039_s4 + $0x904] ss:$60 sps:$4 sm:$0xff]  }
 0x5fb   : > { %5433 = vmatpush1.bf16.msra.mxu0 %v7507_v46  ;;  %5352 = vmatprep.subr.bf16.mxu1 %v7512_v47  ;;  %v7588_v46 = vld [vmem:[%s9039_s4 + $0x8f8] ss:$60 sps:$4 sm:$0xff]   ;;  %v7591_v47 = vld [vmem:[%s9039_s4 + $0x900] ss:$60 sps:$4 sm:$0xff]  }
 0x5fc   : > { %5434 = vmatprep.subr.bf16.mxu0 %v7515_v48  ;;  %v7596_v48 = vld [vmem:[%s9039_s4 + $0x974] ss:$60 sps:$4 sm:$0xff]  }
 0x5fe   : > { %5353 = vmatpush1.bf16.msra.mxu1 %v7510_v49  ;;  %v7599_v49 = vld [vmem:[%s9039_s4 + $0x97c] ss:$60 sps:$4 sm:$0xff]  }
 0x5ff   : > { %5435 = vmatpush1.bf16.msra.mxu0 %v7513_v50  ;;  %5354 = vmatprep.subr.bf16.mxu1 %v7518_v51  ;;  %v7594_v50 = vld [vmem:[%s9039_s4 + $0x970] ss:$60 sps:$4 sm:$0xff]   ;;  %v7597_v51 = vld [vmem:[%s9039_s4 + $0x978] ss:$60 sps:$4 sm:$0xff]  }
 0x600   : > { %5436 = vmatprep.subr.bf16.mxu0 %v7521_v54  ;;  %v7602_v54 = vld [vmem:[%s9039_s4 + $0x9ec] ss:$60 sps:$4 sm:$0xff]  }
 0x602   : > { %5355 = vmatpush1.bf16.msra.mxu1 %v7516_v56  ;;  %v7605_v56 = vld [vmem:[%s9039_s4 + $0x9f4] ss:$60 sps:$4 sm:$0xff]  }
 0x603   : > { %5437 = vmatpush1.bf16.msra.mxu0 %v7519_v55  ;;  %5356 = vmatprep.subr.bf16.mxu1 %v7524_v57  ;;  %v7600_v55 = vld [vmem:[%s9039_s4 + $0x9e8] ss:$60 sps:$4 sm:$0xff]   ;;  %v7603_v57 = vld [vmem:[%s9039_s4 + $0x9f0] ss:$60 sps:$4 sm:$0xff]  }
 0x604   : > { %5438 = vmatprep.subr.bf16.mxu0 %v7527_v59  ;;  %v7608_v59 = vld [vmem:[%s9039_s4 + $0xa64] ss:$60 sps:$4 sm:$0xff]  }
 0x606   : > { %5357 = vmatpush1.bf16.msra.mxu1 %v7522_v60  ;;  %v7611_v60 = vld [vmem:[%s9039_s4 + $0xa6c] ss:$60 sps:$4 sm:$0xff]  }
 0x607   : > { %5439 = vmatpush1.bf16.msra.mxu0 %v7525_v61  ;;  %5358 = vmatprep.subr.bf16.mxu1 %v7530_v62  ;;  %v7606_v61 = vld [vmem:[%s9039_s4 + $0xa60] ss:$60 sps:$4 sm:$0xff]   ;;  %v7609_v62 = vld [vmem:[%s9039_s4 + $0xa68] ss:$60 sps:$4 sm:$0xff]  }
 0x608   : > { %5440 = vmatprep.subr.bf16.mxu0 %v7533_v63  ;;  %v7614_v63 = vld [vmem:[%s9039_s4 + $0xadc] ss:$60 sps:$4 sm:$0xff]  }
 0x60a   : > { %5359 = vmatpush1.bf16.msra.mxu1 %v7528_v0  ;;  %v7617_v0 = vld [vmem:[%s9039_s4 + $0xae4] ss:$60 sps:$4 sm:$0xff]  }
 0x60b   : > { %5441 = vmatpush1.bf16.msra.mxu0 %v7531_v1  ;;  %5360 = vmatprep.subr.bf16.mxu1 %v7536_v3  ;;  %v7612_v1 = vld [vmem:[%s9039_s4 + $0xad8] ss:$60 sps:$4 sm:$0xff]   ;;  %v7615_v3 = vld [vmem:[%s9039_s4 + $0xae0] ss:$60 sps:$4 sm:$0xff]  }
 0x60c   : > { %5442 = vmatprep.subr.bf16.mxu0 %v7539_v4  ;;  %v7620_v4 = vld [vmem:[%s9039_s4 + $0xb54] ss:$60 sps:$4 sm:$0xff]  }
 0x60e   : > { %5361 = vmatpush1.bf16.msra.mxu1 %v7534_v5  ;;  %v7623_v5 = vld [vmem:[%s9039_s4 + $0xb5c] ss:$60 sps:$4 sm:$0xff]  }
 0x60f   : > { %5443 = vmatpush1.bf16.msra.mxu0 %v7537_v6  ;;  %5362 = vmatprep.subr.bf16.mxu1 %v7542_v8  ;;  %v7618_v6 = vld [vmem:[%s9039_s4 + $0xb50] ss:$60 sps:$4 sm:$0xff]   ;;  %v7621_v8 = vld [vmem:[%s9039_s4 + $0xb58] ss:$60 sps:$4 sm:$0xff]  }
 0x610   : > { %5444 = vmatprep.subr.bf16.mxu0 %v7545_v9  ;;  %v7626_v9 = vld [vmem:[%s9039_s4 + $0xbcc] ss:$60 sps:$4 sm:$0xff]  }
 0x612   : > { %5363 = vmatpush1.bf16.msra.mxu1 %v7540_v11  ;;  %v7629_v11 = vld [vmem:[%s9039_s4 + $0xbd4] ss:$60 sps:$4 sm:$0xff]  }
 0x613   : > { %5445 = vmatpush1.bf16.msra.mxu0 %v7543_v12  ;;  %5364 = vmatprep.subr.bf16.mxu1 %v7548_v14  ;;  %v7624_v12 = vld [vmem:[%s9039_s4 + $0xbc8] ss:$60 sps:$4 sm:$0xff]   ;;  %v7627_v14 = vld [vmem:[%s9039_s4 + $0xbd0] ss:$60 sps:$4 sm:$0xff]  }
 0x614   : > { %5446 = vmatprep.subr.bf16.mxu0 %v7551_v15  ;;  %v7632_v15 = vld [vmem:[%s9039_s4 + $0xc44] ss:$60 sps:$4 sm:$0xff]  }
 0x616   : > { %5365 = vmatpush1.bf16.msra.mxu1 %v7546_v16  ;;  %v7635_v16 = vld [vmem:[%s9039_s4 + $0xc4c] ss:$60 sps:$4 sm:$0xff]  }
 0x617   : > { %5447 = vmatpush1.bf16.msra.mxu0 %v7549_v52  ;;  %5366 = vmatprep.subr.bf16.mxu1 %v7554_v18  ;;  %v7630_v52 = vld [vmem:[%s9039_s4 + $0xc40] ss:$60 sps:$4 sm:$0xff]   ;;  %v7633_v18 = vld [vmem:[%s9039_s4 + $0xc48] ss:$60 sps:$4 sm:$0xff]  }
 0x618   : > { %5448 = vmatprep.subr.bf16.mxu0 %v7557_v19  ;;  %v7638_v19 = vld [vmem:[%s9039_s4 + $0xcbc] ss:$60 sps:$4 sm:$0xff]  }
 0x61a   : > { %5367 = vmatpush1.bf16.msra.mxu1 %v7552_v20  ;;  %v7641_v20 = vld [vmem:[%s9039_s4 + $0xcc4] ss:$60 sps:$4 sm:$0xff]  }
 0x61b   : > { %5449 = vmatpush1.bf16.msra.mxu0 %v7555_v21  ;;  %5368 = vmatprep.subr.bf16.mxu1 %v7560_v22  ;;  %v7636_v21 = vld [vmem:[%s9039_s4 + $0xcb8] ss:$60 sps:$4 sm:$0xff]   ;;  %v7639_v22 = vld [vmem:[%s9039_s4 + $0xcc0] ss:$60 sps:$4 sm:$0xff]  }
 0x61c   : > { %5450 = vmatprep.subr.bf16.mxu0 %v7563_v58  ;;  %v7644_v58 = vld [vmem:[%s9039_s4 + $0xd34] ss:$60 sps:$4 sm:$0xff]  }
 0x61e   : > { %5369 = vmatpush1.bf16.msra.mxu1 %v7558_v24  ;;  %v7647_v24 = vld [vmem:[%s9039_s4 + $0xd3c] ss:$60 sps:$4 sm:$0xff]  }
 0x61f   : > { %5451 = vmatpush1.bf16.msra.mxu0 %v7561_v26  ;;  %5370 = vmatprep.subr.bf16.mxu1 %v7566_v27  ;;  %v7642_v26 = vld [vmem:[%s9039_s4 + $0xd30] ss:$60 sps:$4 sm:$0xff]   ;;  %v7645_v27 = vld [vmem:[%s9039_s4 + $0xd38] ss:$60 sps:$4 sm:$0xff]  }
 0x620   : > { %5452 = vmatprep.subr.bf16.mxu0 %v7569_v25  ;;  %v7650_v25 = vld [vmem:[%s9039_s4 + $0xdac] ss:$60 sps:$4 sm:$0xff]  }
 0x622   : > { %5371 = vmatpush1.bf16.msra.mxu1 %v7564_v29  ;;  %v7653_v29 = vld [vmem:[%s9039_s4 + $0xdb4] ss:$60 sps:$4 sm:$0xff]  }
 0x623   : > { %5453 = vmatpush1.bf16.msra.mxu0 %v7567_v30  ;;  %5381 = vmatprep.subr.bf16.mxu1 %v7572_v31  ;;  %v7648_v30 = vld [vmem:[%s9039_s4 + $0xda8] ss:$60 sps:$4 sm:$0xff]   ;;  %v7651_v31 = vld [vmem:[%s9039_s4 + $0xdb0] ss:$60 sps:$4 sm:$0xff]  }
 0x624   : > { %5463 = vmatprep.subr.bf16.mxu0 %v7575_v32  ;;  %v7656_v32 = vld [vmem:[%s9039_s4 + $0xe24] ss:$60 sps:$4 sm:$0xff]  }
 0x625   : > { %5373 = vmatmul.mubr.bf16.vlgmr.msra.gmra.mrb[24].mxu1 %v9254_v10 }
 0x626   : > { %5455 = vmatmul.mubr.bf16.vlgmr.msra.gmra.mrb[48].mxu0 %v9254_v10  ;;  %5382 = vmatpush1.bf16.msra.mxu1 %v7570_v34  ;;  %v7659_v34 = vld [vmem:[%s9039_s4 + $0xe2c] ss:$60 sps:$4 sm:$0xff]  }
 0x627   : > { %5413 = vmatprep.mubr.bf16.mxu1 %v9260_v13  ;;  %5464 = vmatpush1.bf16.msra.mxu0 %v7573_v36  ;;  %v7654_v36 = vld [vmem:[%s9039_s4 + $0xe20] ss:$60 sps:$4 sm:$0xff]  }
 0x628   : > { %5495 = vmatprep.mubr.bf16.mxu0 %v9260_v13  ;;  %5383 = vmatprep.subr.bf16.mxu1 %v7578_v37  ;;  %v7657_v37 = vld [vmem:[%s9039_s4 + $0xe28] ss:$60 sps:$4 sm:$0xff]  }
 0x629   : > { %5465 = vmatprep.subr.bf16.mxu0 %v7581_v38  ;;  %v7662_v38 = vld [vmem:[%s9039_s4 + $0xe9c] ss:$60 sps:$4 sm:$0xff]  }
 0x62a   : > { %5384 = vmatpush1.bf16.msra.mxu1 %v7576_v39  ;;  %v7665_v39 = vld [vmem:[%s9039_s4 + $0xea4] ss:$60 sps:$4 sm:$0xff]  }
 0x62b   : > { %5466 = vmatpush1.bf16.msra.mxu0 %v7579_v17  ;;  %5385 = vmatprep.subr.bf16.mxu1 %v7584_v40  ;;  %v7660_v17 = vld [vmem:[%s9039_s4 + $0xe98] ss:$60 sps:$4 sm:$0xff]   ;;  %v7663_v40 = vld [vmem:[%s9039_s4 + $0xea0] ss:$60 sps:$4 sm:$0xff]  }
 0x62c   : > { %5467 = vmatprep.subr.bf16.mxu0 %v7587_v41  ;;  %v7668_v41 = vld [vmem:[%s9039_s4 + $0x24] ss:$60 sps:$4 sm:$0xff]  }
 0x62e   : > { %5386 = vmatpush1.bf16.msra.mxu1 %v7582_v42  ;;  %v7671_v42 = vld [vmem:[%s9039_s4 + $0x2c] ss:$60 sps:$4 sm:$0xff]  }
 0x62f   : > { %5468 = vmatpush1.bf16.msra.mxu0 %v7585_v43  ;;  %5387 = vmatprep.subr.bf16.mxu1 %v7590_v44  ;;  %v7666_v43 = vld [vmem:[%s9039_s4 + $0x20] ss:$60 sps:$4 sm:$0xff]   ;;  %v7669_v44 = vld [vmem:[%s9039_s4 + $0x28] ss:$60 sps:$4 sm:$0xff]  }
 0x630   : > { %5469 = vmatprep.subr.bf16.mxu0 %v7593_v45  ;;  %v7674_v45 = vld [vmem:[%s9039_s4 + $0x9c] ss:$60 sps:$4 sm:$0xff]  }
 0x632   : > { %5388 = vmatpush1.bf16.msra.mxu1 %v7588_v46  ;;  %v7677_v46 = vld [vmem:[%s9039_s4 + $0xa4] ss:$60 sps:$4 sm:$0xff]  }
 0x633   : > { %5470 = vmatpush1.bf16.msra.mxu0 %v7591_v47  ;;  %5389 = vmatprep.subr.bf16.mxu1 %v7596_v48  ;;  %v7672_v47 = vld [vmem:[%s9039_s4 + $0x98] ss:$60 sps:$4 sm:$0xff]   ;;  %v7675_v48 = vld [vmem:[%s9039_s4 + $0xa0] ss:$60 sps:$4 sm:$0xff]  }
 0x634   : > { %5471 = vmatprep.subr.bf16.mxu0 %v7599_v49  ;;  %v7680_v49 = vld [vmem:[%s9039_s4 + $0x114] ss:$60 sps:$4 sm:$0xff]  }
 0x636   : > { %5390 = vmatpush1.bf16.msra.mxu1 %v7594_v50  ;;  %v7683_v50 = vld [vmem:[%s9039_s4 + $0x11c] ss:$60 sps:$4 sm:$0xff]  }
 0x637   : > { %5472 = vmatpush1.bf16.msra.mxu0 %v7597_v51  ;;  %5391 = vmatprep.subr.bf16.mxu1 %v7602_v54  ;;  %v7678_v51 = vld [vmem:[%s9039_s4 + $0x110] ss:$60 sps:$4 sm:$0xff]   ;;  %v7681_v54 = vld [vmem:[%s9039_s4 + $0x118] ss:$60 sps:$4 sm:$0xff]  }
 0x638   : > { %5473 = vmatprep.subr.bf16.mxu0 %v7605_v56  ;;  %v7686_v56 = vld [vmem:[%s9039_s4 + $0x18c] ss:$60 sps:$4 sm:$0xff]  }
 0x63a   : > { %5392 = vmatpush1.bf16.msra.mxu1 %v7600_v55  ;;  %v7689_v55 = vld [vmem:[%s9039_s4 + $0x194] ss:$60 sps:$4 sm:$0xff]  }
 0x63b   : > { %5474 = vmatpush1.bf16.msra.mxu0 %v7603_v57  ;;  %5393 = vmatprep.subr.bf16.mxu1 %v7608_v59  ;;  %v7684_v57 = vld [vmem:[%s9039_s4 + $0x188] ss:$60 sps:$4 sm:$0xff]   ;;  %v7687_v59 = vld [vmem:[%s9039_s4 + $0x190] ss:$60 sps:$4 sm:$0xff]  }
 0x63c   : > { %5475 = vmatprep.subr.bf16.mxu0 %v7611_v60  ;;  %v7692_v60 = vld [vmem:[%s9039_s4 + $0x204] ss:$60 sps:$4 sm:$0xff]  }
 0x63e   : > { %5394 = vmatpush1.bf16.msra.mxu1 %v7606_v61  ;;  %v7695_v61 = vld [vmem:[%s9039_s4 + $0x20c] ss:$60 sps:$4 sm:$0xff]  }
 0x63f   : > { %5476 = vmatpush1.bf16.msra.mxu0 %v7609_v62  ;;  %5395 = vmatprep.subr.bf16.mxu1 %v7614_v63  ;;  %v7690_v62 = vld [vmem:[%s9039_s4 + $0x200] ss:$60 sps:$4 sm:$0xff]   ;;  %v7693_v63 = vld [vmem:[%s9039_s4 + $0x208] ss:$60 sps:$4 sm:$0xff]  }
 0x640   : > { %5477 = vmatprep.subr.bf16.mxu0 %v7617_v0  ;;  %v7698_v0 = vld [vmem:[%s9039_s4 + $0x27c] ss:$60 sps:$4 sm:$0xff]  }
 0x642   : > { %5396 = vmatpush1.bf16.msra.mxu1 %v7612_v1  ;;  %v7701_v1 = vld [vmem:[%s9039_s4 + $0x284] ss:$60 sps:$4 sm:$0xff]  }
 0x643   : > { %5478 = vmatpush1.bf16.msra.mxu0 %v7615_v3  ;;  %5397 = vmatprep.subr.bf16.mxu1 %v7620_v4  ;;  %v7696_v3 = vld [vmem:[%s9039_s4 + $0x278] ss:$60 sps:$4 sm:$0xff]   ;;  %v7699_v4 = vld [vmem:[%s9039_s4 + $0x280] ss:$60 sps:$4 sm:$0xff]  }
 0x644   : > { %5479 = vmatprep.subr.bf16.mxu0 %v7623_v5  ;;  %v7704_v5 = vld [vmem:[%s9039_s4 + $0x2f4] ss:$60 sps:$4 sm:$0xff]  }
 0x646   : > { %5398 = vmatpush1.bf16.msra.mxu1 %v7618_v6  ;;  %v7707_v6 = vld [vmem:[%s9039_s4 + $0x2fc] ss:$60 sps:$4 sm:$0xff]  }
 0x647   : > { %5480 = vmatpush1.bf16.msra.mxu0 %v7621_v8  ;;  %5399 = vmatprep.subr.bf16.mxu1 %v7626_v9  ;;  %v7702_v8 = vld [vmem:[%s9039_s4 + $0x2f0] ss:$60 sps:$4 sm:$0xff]   ;;  %v7705_v9 = vld [vmem:[%s9039_s4 + $0x2f8] ss:$60 sps:$4 sm:$0xff]  }
 0x648   : > { %5481 = vmatprep.subr.bf16.mxu0 %v7629_v11  ;;  %v7710_v11 = vld [vmem:[%s9039_s4 + $0x36c] ss:$60 sps:$4 sm:$0xff]  }
 0x64a   : > { %5400 = vmatpush1.bf16.msra.mxu1 %v7624_v12  ;;  %v7713_v12 = vld [vmem:[%s9039_s4 + $0x374] ss:$60 sps:$4 sm:$0xff]  }
 0x64b   : > { %5482 = vmatpush1.bf16.msra.mxu0 %v7627_v14  ;;  %5401 = vmatprep.subr.bf16.mxu1 %v7632_v15  ;;  %v7708_v14 = vld [vmem:[%s9039_s4 + $0x368] ss:$60 sps:$4 sm:$0xff]   ;;  %v7711_v15 = vld [vmem:[%s9039_s4 + $0x370] ss:$60 sps:$4 sm:$0xff]  }
 0x64c   : > { %5483 = vmatprep.subr.bf16.mxu0 %v7635_v16  ;;  %v7716_v16 = vld [vmem:[%s9039_s4 + $0x3e4] ss:$60 sps:$4 sm:$0xff]  }
 0x64e   : > { %5402 = vmatpush1.bf16.msra.mxu1 %v7630_v52  ;;  %v7719_v52 = vld [vmem:[%s9039_s4 + $0x3ec] ss:$60 sps:$4 sm:$0xff]  }
 0x64f   : > { %5484 = vmatpush1.bf16.msra.mxu0 %v7633_v18  ;;  %5403 = vmatprep.subr.bf16.mxu1 %v7638_v19  ;;  %v7714_v18 = vld [vmem:[%s9039_s4 + $0x3e0] ss:$60 sps:$4 sm:$0xff]   ;;  %v7717_v19 = vld [vmem:[%s9039_s4 + $0x3e8] ss:$60 sps:$4 sm:$0xff]  }
 0x650   : > { %5485 = vmatprep.subr.bf16.mxu0 %v7641_v20  ;;  %v7722_v20 = vld [vmem:[%s9039_s4 + $0x45c] ss:$60 sps:$4 sm:$0xff]  }
 0x652   : > { %5404 = vmatpush1.bf16.msra.mxu1 %v7636_v21  ;;  %v7725_v21 = vld [vmem:[%s9039_s4 + $0x464] ss:$60 sps:$4 sm:$0xff]  }
 0x653   : > { %5486 = vmatpush1.bf16.msra.mxu0 %v7639_v22  ;;  %5405 = vmatprep.subr.bf16.mxu1 %v7644_v58  ;;  %v7720_v22 = vld [vmem:[%s9039_s4 + $0x458] ss:$60 sps:$4 sm:$0xff]   ;;  %v7723_v58 = vld [vmem:[%s9039_s4 + $0x460] ss:$60 sps:$4 sm:$0xff]  }
 0x654   : > { %5487 = vmatprep.subr.bf16.mxu0 %v7647_v24  ;;  %v7728_v24 = vld [vmem:[%s9039_s4 + $0x4d4] ss:$60 sps:$4 sm:$0xff]  }
 0x656   : > { %5406 = vmatpush1.bf16.msra.mxu1 %v7642_v26  ;;  %v7731_v26 = vld [vmem:[%s9039_s4 + $0x4dc] ss:$60 sps:$4 sm:$0xff]  }
 0x657   : > { %5488 = vmatpush1.bf16.msra.mxu0 %v7645_v27  ;;  %5407 = vmatprep.subr.bf16.mxu1 %v7650_v25  ;;  %v7726_v27 = vld [vmem:[%s9039_s4 + $0x4d0] ss:$60 sps:$4 sm:$0xff]   ;;  %v7729_v25 = vld [vmem:[%s9039_s4 + $0x4d8] ss:$60 sps:$4 sm:$0xff]  }
 0x658   : > { %5489 = vmatprep.subr.bf16.mxu0 %v7653_v29  ;;  %v7734_v29 = vld [vmem:[%s9039_s4 + $0x54c] ss:$60 sps:$4 sm:$0xff]  }
 0x65a   : > { %5408 = vmatpush1.bf16.msra.mxu1 %v7648_v30  ;;  %v7737_v30 = vld [vmem:[%s9039_s4 + $0x554] ss:$60 sps:$4 sm:$0xff]  }
 0x65b   : > { %5490 = vmatpush1.bf16.msra.mxu0 %v7651_v31  ;;  %5409 = vmatprep.subr.bf16.mxu1 %v7656_v32  ;;  %v7732_v31 = vld [vmem:[%s9039_s4 + $0x548] ss:$60 sps:$4 sm:$0xff]   ;;  %v7735_v32 = vld [vmem:[%s9039_s4 + $0x550] ss:$60 sps:$4 sm:$0xff]  }
 0x65c   : > { %5491 = vmatprep.subr.bf16.mxu0 %v7659_v34  ;;  %v7740_v34 = vld [vmem:[%s9039_s4 + $0x5c4] ss:$60 sps:$4 sm:$0xff]  }
 0x65e   : > { %5410 = vmatpush1.bf16.msra.mxu1 %v7654_v36  ;;  %v7743_v36 = vld [vmem:[%s9039_s4 + $0x5cc] ss:$60 sps:$4 sm:$0xff]  }
 0x65f   : > { %5492 = vmatpush1.bf16.msra.mxu0 %v7657_v37  ;;  %5411 = vmatprep.subr.bf16.mxu1 %v7662_v38  ;;  %v7738_v37 = vld [vmem:[%s9039_s4 + $0x5c0] ss:$60 sps:$4 sm:$0xff]   ;;  %v7741_v38 = vld [vmem:[%s9039_s4 + $0x5c8] ss:$60 sps:$4 sm:$0xff]  }
 0x660   : > { %5493 = vmatprep.subr.bf16.mxu0 %v7665_v39  ;;  %v7746_v39 = vld [vmem:[%s9039_s4 + $0x63c] ss:$60 sps:$4 sm:$0xff]  }
 0x662   : > { %5412 = vmatpush1.bf16.msra.mxu1 %v7660_v17  ;;  %v7749_v17 = vld [vmem:[%s9039_s4 + $0x644] ss:$60 sps:$4 sm:$0xff]  }
 0x663   : > { %5494 = vmatpush1.bf16.msra.mxu0 %v7663_v40  ;;  %5504 = vmatprep.subr.bf16.mxu1 %v7668_v41  ;;  %v7744_v40 = vld [vmem:[%s9039_s4 + $0x638] ss:$60 sps:$4 sm:$0xff]   ;;  %v7747_v41 = vld [vmem:[%s9039_s4 + $0x640] ss:$60 sps:$4 sm:$0xff]  }
 0x664   : > { %5586 = vmatprep.subr.bf16.mxu0 %v7671_v42  ;;  %v7752_v42 = vld [vmem:[%s9039_s4 + $0x6b4] ss:$60 sps:$4 sm:$0xff]  }
 0x665   : > { %5414 = vmatmul.mubr.bf16.vlgmr.msra.gmra.mrb[24].mxu1 %v9333_v23 }
 0x666   : > { %5496 = vmatmul.mubr.bf16.vlgmr.msra.gmra.mrb[48].mxu0 %v9333_v23  ;;  %5505 = vmatpush1.bf16.msra.mxu1 %v7666_v43  ;;  %v7755_v43 = vld [vmem:[%s9039_s4 + $0x6bc] ss:$60 sps:$4 sm:$0xff]  }
 0x667   : > { %5536 = vmatprep.mubr.bf16.mxu1 %v9250_v7  ;;  %5587 = vmatpush1.bf16.msra.mxu0 %v7669_v44  ;;  %v7750_v44 = vld [vmem:[%s9039_s4 + $0x6b0] ss:$60 sps:$4 sm:$0xff]  }
 0x668   : > { %5618 = vmatprep.mubr.bf16.mxu0 %v9250_v7  ;;  %5506 = vmatprep.subr.bf16.mxu1 %v7674_v45  ;;  %v7753_v45 = vld [vmem:[%s9039_s4 + $0x6b8] ss:$60 sps:$4 sm:$0xff]  }
 0x669   : > { %5588 = vmatprep.subr.bf16.mxu0 %v7677_v46  ;;  %v7758_v46 = vld [vmem:[%s9039_s4 + $0x72c] ss:$60 sps:$4 sm:$0xff]  }
 0x66a   : > { %5507 = vmatpush1.bf16.msra.mxu1 %v7672_v47  ;;  %v7761_v47 = vld [vmem:[%s9039_s4 + $0x734] ss:$60 sps:$4 sm:$0xff]  }
 0x66b   : > { %5589 = vmatpush1.bf16.msra.mxu0 %v7675_v48  ;;  %5508 = vmatprep.subr.bf16.mxu1 %v7680_v49  ;;  %v7756_v48 = vld [vmem:[%s9039_s4 + $0x728] ss:$60 sps:$4 sm:$0xff]   ;;  %v7759_v49 = vld [vmem:[%s9039_s4 + $0x730] ss:$60 sps:$4 sm:$0xff]  }
 0x66c   : > { %5590 = vmatprep.subr.bf16.mxu0 %v7683_v50  ;;  %v7764_v50 = vld [vmem:[%s9039_s4 + $0x7a4] ss:$60 sps:$4 sm:$0xff]  }
 0x66e   : > { %5509 = vmatpush1.bf16.msra.mxu1 %v7678_v51  ;;  %v7767_v51 = vld [vmem:[%s9039_s4 + $0x7ac] ss:$60 sps:$4 sm:$0xff]  }
 0x66f   : > { %5591 = vmatpush1.bf16.msra.mxu0 %v7681_v54  ;;  %5510 = vmatprep.subr.bf16.mxu1 %v7686_v56  ;;  %v7762_v54 = vld [vmem:[%s9039_s4 + $0x7a0] ss:$60 sps:$4 sm:$0xff]   ;;  %v7765_v56 = vld [vmem:[%s9039_s4 + $0x7a8] ss:$60 sps:$4 sm:$0xff]  }
 0x670   : > { %5592 = vmatprep.subr.bf16.mxu0 %v7689_v55  ;;  %v7770_v55 = vld [vmem:[%s9039_s4 + $0x81c] ss:$60 sps:$4 sm:$0xff]  }
 0x672   : > { %5511 = vmatpush1.bf16.msra.mxu1 %v7684_v57  ;;  %v7773_v57 = vld [vmem:[%s9039_s4 + $0x824] ss:$60 sps:$4 sm:$0xff]  }
 0x673   : > { %5593 = vmatpush1.bf16.msra.mxu0 %v7687_v59  ;;  %5512 = vmatprep.subr.bf16.mxu1 %v7692_v60  ;;  %v7768_v59 = vld [vmem:[%s9039_s4 + $0x818] ss:$60 sps:$4 sm:$0xff]   ;;  %v7771_v60 = vld [vmem:[%s9039_s4 + $0x820] ss:$60 sps:$4 sm:$0xff]  }
 0x674   : > { %5594 = vmatprep.subr.bf16.mxu0 %v7695_v61  ;;  %v7776_v61 = vld [vmem:[%s9039_s4 + $0x894] ss:$60 sps:$4 sm:$0xff]  }
 0x676   : > { %5513 = vmatpush1.bf16.msra.mxu1 %v7690_v62  ;;  %v7779_v62 = vld [vmem:[%s9039_s4 + $0x89c] ss:$60 sps:$4 sm:$0xff]  }
 0x677   : > { %5595 = vmatpush1.bf16.msra.mxu0 %v7693_v63  ;;  %5514 = vmatprep.subr.bf16.mxu1 %v7698_v0  ;;  %v7774_v63 = vld [vmem:[%s9039_s4 + $0x890] ss:$60 sps:$4 sm:$0xff]   ;;  %v7777_v0 = vld [vmem:[%s9039_s4 + $0x898] ss:$60 sps:$4 sm:$0xff]  }
 0x678   : > { %5596 = vmatprep.subr.bf16.mxu0 %v7701_v1  ;;  %v7782_v1 = vld [vmem:[%s9039_s4 + $0x90c] ss:$60 sps:$4 sm:$0xff]  }
 0x67a   : > { %5515 = vmatpush1.bf16.msra.mxu1 %v7696_v3  ;;  %v7785_v3 = vld [vmem:[%s9039_s4 + $0x914] ss:$60 sps:$4 sm:$0xff]  }
 0x67b   : > { %5597 = vmatpush1.bf16.msra.mxu0 %v7699_v4  ;;  %5516 = vmatprep.subr.bf16.mxu1 %v7704_v5  ;;  %v7780_v4 = vld [vmem:[%s9039_s4 + $0x908] ss:$60 sps:$4 sm:$0xff]   ;;  %v7783_v5 = vld [vmem:[%s9039_s4 + $0x910] ss:$60 sps:$4 sm:$0xff]  }
 0x67c   : > { %5598 = vmatprep.subr.bf16.mxu0 %v7707_v6  ;;  %v7788_v6 = vld [vmem:[%s9039_s4 + $0x984] ss:$60 sps:$4 sm:$0xff]  }
 0x67e   : > { %5517 = vmatpush1.bf16.msra.mxu1 %v7702_v8  ;;  %v7791_v8 = vld [vmem:[%s9039_s4 + $0x98c] ss:$60 sps:$4 sm:$0xff]  }
 0x67f   : > { %5599 = vmatpush1.bf16.msra.mxu0 %v7705_v9  ;;  %5518 = vmatprep.subr.bf16.mxu1 %v7710_v11  ;;  %v7786_v9 = vld [vmem:[%s9039_s4 + $0x980] ss:$60 sps:$4 sm:$0xff]  }
 0x680   : > { %5600 = vmatprep.subr.bf16.mxu0 %v7713_v12  ;;  %v9563_v11 = vld [vmem:[%s9560_s13] sm:$0xff]  ;;  %v8502_v12 = vmov 1983009808  }
 0x682   : > { %5519 = vmatpush1.bf16.msra.mxu1 %v7708_v14  ;;  %v5848_v14 = vunpack.c.l.s4 %v8502_v12  ;;  %v7836_v12 = vld [vmem:[%s9039_s4 + $0xd44] ss:$60 sps:$4 sm:$0xff]  }
 0x683   : > { %5601 = vmatpush1.bf16.msra.mxu0 %v7711_v15  ;;  %5520 = vmatprep.subr.bf16.mxu1 %v7716_v16  ;;  %v7789_v15 = vld [vmem:[%s9039_s4 + $0x988] ss:$60 sps:$4 sm:$0xff]   ;;  %v7794_v16 = vld [vmem:[%s9039_s4 + $0x9fc] ss:$60 sps:$4 sm:$0xff]  }
 0x684   : > { %5602 = vmatprep.subr.bf16.mxu0 %v7719_v52  ;;  %v7797_v52 = vld [vmem:[%s9039_s4 + $0xa04] ss:$60 sps:$4 sm:$0xff]  }
 0x686   : > { %5521 = vmatpush1.bf16.msra.mxu1 %v7714_v18  ;;  %v2672_v18 = vrot.slane %v9563_v11, %v9166_v33 }
 0x687   : > { %5603 = vmatpush1.bf16.msra.mxu0 %v7717_v19  ;;  %5522 = vmatprep.subr.bf16.mxu1 %v7722_v20  ;;  %v2680_v19 = vrot.slane %v9563_v11, %v9313_v2  ;;  %v2676_v20 = vrot.slane %v9563_v11, %v9169_v35 }
 0x688   : > { %5604 = vmatprep.subr.bf16.mxu0 %v7725_v21  ;;  %v5849_v21 = vunpack.c.0.s8 %v5848_v14  ;;  %v7839_v14 = vld [vmem:[%s9039_s4 + $0xd4c] ss:$60 sps:$4 sm:$0xff]  }
 0x68a   : > { %5523 = vmatpush1.bf16.msra.mxu1 %v7720_v22  ;;  %v2684_v22 = vrot.slane %v9563_v11, %v9240_v53 }
 0x68b   : > { %5605 = vmatpush1.bf16.msra.mxu0 %v7723_v58  ;;  %5524 = vmatprep.subr.bf16.mxu1 %v7728_v24  ;;  %v7792_v58 = vld [vmem:[%s9039_s4 + $0x9f8] ss:$60 sps:$4 sm:$0xff]   ;;  %v7795_v24 = vld [vmem:[%s9039_s4 + $0xa00] ss:$60 sps:$4 sm:$0xff]  }
 0x68c   : > { %5606 = vmatprep.subr.bf16.mxu0 %v7731_v26  ;;  %v7800_v26 = vld [vmem:[%s9039_s4 + $0xa74] ss:$60 sps:$4 sm:$0xff]  }
 0x68e   : > { %5525 = vmatpush1.bf16.msra.mxu1 %v7726_v27 }
 0x68f   : > { %5607 = vmatpush1.bf16.msra.mxu0 %v7729_v25  ;;  %5526 = vmatprep.subr.bf16.mxu1 %v7734_v29  ;;  %v7803_v29 = vld [vmem:[%s9039_s4 + $0xa7c] ss:$60 sps:$4 sm:$0xff]  }
 0x690   : > { %5608 = vmatprep.subr.bf16.mxu0 %v7737_v30 }
 0x692   : > { %5527 = vmatpush1.bf16.msra.mxu1 %v7732_v31 }
 0x693   : > { %5609 = vmatpush1.bf16.msra.mxu0 %v7735_v32  ;;  %5528 = vmatprep.subr.bf16.mxu1 %v7740_v34 }
 0x694   : > { %5610 = vmatprep.subr.bf16.mxu0 %v7743_v36 }
 0x696   : > { %5529 = vmatpush1.bf16.msra.mxu1 %v7738_v37  ;;  %v9581_v37 = vsub.s32 %v5849_v21, %v9163_v28  ;;  %v7848_v21 = vld [vmem:[%s9039_s4 + $0xe34] ss:$60 sps:$4 sm:$0xff]  }
 0x697   : > { %5611 = vmatpush1.bf16.msra.mxu0 %v7741_v38  ;;  %5530 = vmatprep.subr.bf16.mxu1 %v7746_v39 }
 0x698   : > { %5612 = vmatprep.subr.bf16.mxu0 %v7749_v17 }
 0x69a   : > { %5531 = vmatpush1.bf16.msra.mxu1 %v7744_v40  ;;  %v7798_v40 = vld [vmem:[%s9039_s4 + $0xa70] ss:$60 sps:$4 sm:$0xff]  }
 0x69b   : > { %5613 = vmatpush1.bf16.msra.mxu0 %v7747_v41  ;;  %5532 = vmatprep.subr.bf16.mxu1 %v7752_v42 }
 0x69c   : > { %5614 = vmatprep.subr.bf16.mxu0 %v7755_v43  ;;  %v7801_v43 = vld [vmem:[%s9039_s4 + $0xa78] ss:$60 sps:$4 sm:$0xff]  }
 0x69e   : > { %5533 = vmatpush1.bf16.msra.mxu1 %v7750_v44  ;;  %v7806_v44 = vld [vmem:[%s9039_s4 + $0xaec] ss:$60 sps:$4 sm:$0xff]  }
 0x69f   : > { %5615 = vmatpush1.bf16.msra.mxu0 %v7753_v45  ;;  %5534 = vmatprep.subr.bf16.mxu1 %v7758_v46 }
 0x6a0   : > { %5616 = vmatprep.subr.bf16.mxu0 %v7761_v47  ;;  %v7809_v47 = vld [vmem:[%s9039_s4 + $0xaf4] ss:$60 sps:$4 sm:$0xff]  }
 0x6a2   : > { %5535 = vmatpush1.bf16.msra.mxu1 %v7756_v48 }
 0x6a3   : > { %5617 = vmatpush1.bf16.msra.mxu0 %v7759_v49  ;;  %5545 = vmatprep.subr.bf16.mxu1 %v7764_v50  ;;  %v7804_v50 = vld [vmem:[%s9039_s4 + $0xae8] ss:$60 sps:$4 sm:$0xff]  }
 0x6a4   : > { %5627 = vmatprep.subr.bf16.mxu0 %v7767_v51  ;;  %v7807_v51 = vld [vmem:[%s9039_s4 + $0xaf0] ss:$60 sps:$4 sm:$0xff]  }
 0x6a5   : > { %5537 = vmatmul.mubr.bf16.vlgmr.msra.gmra.mrb[28].mxu1 %v9254_v10 }
 0x6a6   : > { %5619 = vmatmul.mubr.bf16.vlgmr.msra.gmra.mrb[52].mxu0 %v9254_v10  ;;  %5546 = vmatpush1.bf16.msra.mxu1 %v7762_v54  ;;  %v7812_v54 = vld [vmem:[%s9039_s4 + $0xb64] ss:$60 sps:$4 sm:$0xff]  }
 0x6a7   : > { %5577 = vmatprep.mubr.bf16.mxu1 %v9260_v13  ;;  %5628 = vmatpush1.bf16.msra.mxu0 %v7765_v56 }
 0x6a8   : > { %5659 = vmatprep.mubr.bf16.mxu0 %v9260_v13  ;;  %5547 = vmatprep.subr.bf16.mxu1 %v7770_v55  ;;  %v7815_v55 = vld [vmem:[%s9039_s4 + $0xb6c] ss:$60 sps:$4 sm:$0xff]  }
 0x6a9   : > { %5629 = vmatprep.subr.bf16.mxu0 %v7773_v57  ;;  %v7810_v57 = vld [vmem:[%s9039_s4 + $0xb60] ss:$60 sps:$4 sm:$0xff]  }
 0x6aa   : > { %5548 = vmatpush1.bf16.msra.mxu1 %v7768_v59  ;;  %v7813_v59 = vld [vmem:[%s9039_s4 + $0xb68] ss:$60 sps:$4 sm:$0xff]  }
 0x6ab   : > { %5630 = vmatpush1.bf16.msra.mxu0 %v7771_v60  ;;  %5549 = vmatprep.subr.bf16.mxu1 %v7776_v61  ;;  %v7818_v60 = vld [vmem:[%s9039_s4 + $0xbdc] ss:$60 sps:$4 sm:$0xff]   ;;  %v7821_v61 = vld [vmem:[%s9039_s4 + $0xbe4] ss:$60 sps:$4 sm:$0xff]  }
 0x6ac   : > { %5631 = vmatprep.subr.bf16.mxu0 %v7779_v62  ;;  %v7816_v62 = vld [vmem:[%s9039_s4 + $0xbd8] ss:$60 sps:$4 sm:$0xff]  }
 0x6ae   : > { %5550 = vmatpush1.bf16.msra.mxu1 %v7774_v63  ;;  %v7819_v63 = vld [vmem:[%s9039_s4 + $0xbe0] ss:$60 sps:$4 sm:$0xff]  }
 0x6af   : > { %5632 = vmatpush1.bf16.msra.mxu0 %v7777_v0  ;;  %5551 = vmatprep.subr.bf16.mxu1 %v7782_v1  ;;  %v7824_v0 = vld [vmem:[%s9039_s4 + $0xc54] ss:$60 sps:$4 sm:$0xff]   ;;  %v7827_v1 = vld [vmem:[%s9039_s4 + $0xc5c] ss:$60 sps:$4 sm:$0xff]  }
 0x6b0   : > { %5633 = vmatprep.subr.bf16.mxu0 %v7785_v3  ;;  %v7822_v3 = vld [vmem:[%s9039_s4 + $0xc50] ss:$60 sps:$4 sm:$0xff]  }
 0x6b2   : > { %5552 = vmatpush1.bf16.msra.mxu1 %v7780_v4  ;;  %v7825_v4 = vld [vmem:[%s9039_s4 + $0xc58] ss:$60 sps:$4 sm:$0xff]  }
 0x6b3   : > { %5634 = vmatpush1.bf16.msra.mxu0 %v7783_v5  ;;  %5553 = vmatprep.subr.bf16.mxu1 %v7788_v6  ;;  %v7830_v5 = vld [vmem:[%s9039_s4 + $0xccc] ss:$60 sps:$4 sm:$0xff]   ;;  %v7833_v6 = vld [vmem:[%s9039_s4 + $0xcd4] ss:$60 sps:$4 sm:$0xff]  }
 0x6b4   : > { %5635 = vmatprep.subr.bf16.mxu0 %v7791_v8  ;;  %v7828_v8 = vld [vmem:[%s9039_s4 + $0xcc8] ss:$60 sps:$4 sm:$0xff]  }
 0x6b6   : > { %5554 = vmatpush1.bf16.msra.mxu1 %v7786_v9  ;;  %v7831_v9 = vld [vmem:[%s9039_s4 + $0xcd0] ss:$60 sps:$4 sm:$0xff]  }
 0x6b7   : > { %5636 = vmatpush1.bf16.msra.mxu0 %v7789_v15  ;;  %5555 = vmatprep.subr.bf16.mxu1 %v7794_v16  ;;  %v7834_v15 = vld [vmem:[%s9039_s4 + $0xd40] ss:$60 sps:$4 sm:$0xff]   ;;  %v7837_v16 = vld [vmem:[%s9039_s4 + $0xd48] ss:$60 sps:$4 sm:$0xff]  }
 0x6b8   : > { %v5251_v27 = vpop.f32.mrb[20].mxu1  ;;  %v5333_v25 = vpop.f32.mrb[44].mxu0  ;;  %5637 = vmatprep.subr.bf16.mxu0 %v7797_v52  ;;  %v7842_v52 = vld [vmem:[%s9039_s4 + $0xdbc] ss:$60 sps:$4 sm:$0xff]  }
 0x6b9   : > { %v6918_v30 = vadd.f32 %v5251_v27, %v2672_v18  ;;  %v6920_v31 = vadd.f32 %v5333_v25, %v2680_v19  ;;  %v5253_v32 = vpop.f32.mrb[21].mxu1  ;;  %v5335_v34 = vpop.f32.mrb[45].mxu0  ;;  %v7845_v18 = vld [vmem:[%s9039_s4 + $0xdc4] ss:$60 sps:$4 sm:$0xff]   ;;  %v7840_v19 = vld [vmem:[%s9039_s4 + $0xdb8] ss:$60 sps:$4 sm:$0xff]  }
 0x6ba   : > { %v6919_v36 = vadd.f32 %v5253_v32, %v2676_v20  ;;  %v6921_v38 = vadd.f32 %v5335_v34, %v2684_v22  ;;  %v5255_v39 = vpop.f32.mrb[22].mxu1  ;;  %v5337_v17 = vpop.f32.mrb[46].mxu0  ;;  %5556 = vmatpush1.bf16.msra.mxu1 %v7792_v58  ;;  %v7843_v20 = vld [vmem:[%s9039_s4 + $0xdc0] ss:$60 sps:$4 sm:$0xff]   ;;  %v7846_v58 = vld [vmem:[%s9039_s4 + $0xe30] ss:$60 sps:$4 sm:$0xff]  }
 0x6bb   : > { %5638 = vmatpush1.bf16.msra.mxu0 %v7795_v24  ;;  %v5256_v41 = vpop.f32.mrb[23].mxu1  ;;  %v5338_v42 = vpop.f32.mrb[47].mxu0  ;;  %5557 = vmatprep.subr.bf16.mxu1 %v7800_v26  ;;  %v7851_v22 = vld [vmem:[%s9039_s4 + $0xe3c] ss:$60 sps:$4 sm:$0xff]   ;;  %v7854_v26 = vld [vmem:[%s9039_s4 + $0xeac] ss:$60 sps:$4 sm:$0xff]  }
 0x6bc   : > { %v5845_v45 = vcombine.low %v6918_v30, %v6919_v36  ;;  %v5846_v46 = vcombine.low %v6920_v31, %v6921_v38  ;;  %5639 = vmatprep.subr.bf16.mxu0 %v7803_v29  ;;  %v7849_v24 = vld [vmem:[%s9039_s4 + $0xe38] ss:$60 sps:$4 sm:$0xff]   ;;  %v7852_v25 = vld [vmem:[%s9039_s4 + $0xea8] ss:$60 sps:$4 sm:$0xff]   ;;  %v7855_v29 = vld [vmem:[%s9039_s4 + $0xeb0] ss:$60 sps:$4 sm:$0xff]  }
 0x6bd   : > { %v7857_v27 = vld [vmem:[%s9039_s4 + $0xeb4] ss:$60 sps:$4 sm:$0xff]   ;;  %v7865_v36 = vld [vmem:[%s9039_s4 + $0xac] ss:$60 sps:$4 sm:$0xff]   ;;  %v7868_v42 = vld [vmem:[%s9039_s4 + $0x120] ss:$60 sps:$4 sm:$0xff]  }
 0x6be   : > { %v5853_v48 = vrot.slane %v5845_v45, %v9581_v37  ;;  %v5860_v49 = vrot.slane %v5846_v46, %v9581_v37  ;;  %5558 = vmatpush1.bf16.msra.mxu1 %v7798_v40  ;;  %v7860_v30 = vld [vmem:[%s9039_s4 + $0x34] ss:$60 sps:$4 sm:$0xff]   ;;  %v7863_v39 = vld [vmem:[%s9039_s4 + $0xa8] ss:$60 sps:$4 sm:$0xff]   ;;  %v7876_v45 = vld [vmem:[%s9039_s4 + $0x560] ss:$60 sps:$4 sm:$0xff]  }
 0x6bf   : > { %5640 = vmatpush1.bf16.msra.mxu0 %v7801_v43  ;;  %5559 = vmatprep.subr.bf16.mxu1 %v7806_v44  ;;  %v7861_v31 = vld [vmem:[%s9039_s4 + $0x3f8] ss:$60 sps:$4 sm:$0xff]   ;;  %v7858_v32 = vld [vmem:[%s9039_s4 + $0x30] ss:$60 sps:$4 sm:$0xff]   ;;  %v7870_v40 = vld [vmem:[%s9039_s4 + $0x124] ss:$60 sps:$4 sm:$0xff]  }
 0x6c0   : > { %v5861_v56 = vcombine.low %v5853_v48, %v5860_v49  ;;  %5641 = vmatprep.subr.bf16.mxu0 %v7809_v47  ;;  %v7862_v34 = vld [vmem:[%s9039_s4 + $0x38] ss:$60 sps:$4 sm:$0xff]   ;;  %v7866_v38 = vld [vmem:[%s9039_s4 + $0x470] ss:$60 sps:$4 sm:$0xff]   ;;  %v7871_v41 = vld [vmem:[%s9039_s4 + $0x4e8] ss:$60 sps:$4 sm:$0xff]  }
 0x6c1   : > { %v7867_v17 = vld [vmem:[%s9039_s4 + $0xb0] ss:$60 sps:$4 sm:$0xff]   ;;  %v7872_v43 = vld [vmem:[%s9039_s4 + $0x128] ss:$60 sps:$4 sm:$0xff]   ;;  %v7875_v44 = vld [vmem:[%s9039_s4 + $0x19c] ss:$60 sps:$4 sm:$0xff]  }
 0x6c2   : > { %5916 = vst [vmem:[%s9594_s17] sm:$0xff] %v5861_v56  ;;  %5560 = vmatpush1.bf16.msra.mxu1 %v7804_v50  ;;  %v7877_v46 = vld [vmem:[%s9039_s4 + $0x1a0] ss:$60 sps:$4 sm:$0xff]   ;;  %v7880_v47 = vld [vmem:[%s9039_s4 + $0x214] ss:$60 sps:$4 sm:$0xff]   ;;  %v7883_v56 = vld [vmem:[%s9039_s4 + $0x288] ss:$60 sps:$4 sm:$0xff]  }
 0x6c3   : > { %5642 = vmatpush1.bf16.msra.mxu0 %v7807_v51  ;;  %5561 = vmatprep.subr.bf16.mxu1 %v7812_v54  ;;  %v7881_v48 = vld [vmem:[%s9039_s4 + $0x5d8] ss:$60 sps:$4 sm:$0xff]   ;;  %v7878_v49 = vld [vmem:[%s9039_s4 + $0x210] ss:$60 sps:$4 sm:$0xff]  }
 0x6c4   : > { %5643 = vmatprep.subr.bf16.mxu0 %v7815_v55  ;;  %v7882_v50 = vld [vmem:[%s9039_s4 + $0x218] ss:$60 sps:$4 sm:$0xff]   ;;  %v7885_v51 = vld [vmem:[%s9039_s4 + $0x28c] ss:$60 sps:$4 sm:$0xff]  }
 0x6c5   : > { %v7886_v54 = vld [vmem:[%s9039_s4 + $0x650] ss:$60 sps:$4 sm:$0xff]  }
 0x6c6   : > { %5562 = vmatpush1.bf16.msra.mxu1 %v7810_v57  ;;  %v7887_v55 = vld [vmem:[%s9039_s4 + $0x290] ss:$60 sps:$4 sm:$0xff]   ;;  %v7890_v57 = vld [vmem:[%s9039_s4 + $0x304] ss:$60 sps:$4 sm:$0xff]  }
 0x6c7   : > { %5644 = vmatpush1.bf16.msra.mxu0 %v7813_v59  ;;  %5563 = vmatprep.subr.bf16.mxu1 %v7818_v60  ;;  %v7891_v59 = vld [vmem:[%s9039_s4 + $0x6c8] ss:$60 sps:$4 sm:$0xff]   ;;  %v7888_v60 = vld [vmem:[%s9039_s4 + $0x300] ss:$60 sps:$4 sm:$0xff]  }
 0x6c8   : > { %5645 = vmatprep.subr.bf16.mxu0 %v7821_v61  ;;  %v7892_v61 = vld [vmem:[%s9039_s4 + $0x308] ss:$60 sps:$4 sm:$0xff]  }
 0x6ca   : > { %5564 = vmatpush1.bf16.msra.mxu1 %v7816_v62  ;;  %v7895_v62 = vld [vmem:[%s9039_s4 + $0x37c] ss:$60 sps:$4 sm:$0xff]  }
 0x6cb   : > { %5646 = vmatpush1.bf16.msra.mxu0 %v7819_v63  ;;  %5565 = vmatprep.subr.bf16.mxu1 %v7824_v0  ;;  %v7896_v63 = vld [vmem:[%s9039_s4 + $0x740] ss:$60 sps:$4 sm:$0xff]   ;;  %v7893_v0 = vld [vmem:[%s9039_s4 + $0x378] ss:$60 sps:$4 sm:$0xff]  }
 0x6cc   : > { %5647 = vmatprep.subr.bf16.mxu0 %v7827_v1  ;;  %v7897_v1 = vld [vmem:[%s9039_s4 + $0x380] ss:$60 sps:$4 sm:$0xff]  }
 0x6ce   : > { %5566 = vmatpush1.bf16.msra.mxu1 %v7822_v3  ;;  %v7900_v3 = vld [vmem:[%s9039_s4 + $0x3f4] ss:$60 sps:$4 sm:$0xff]  }
 0x6cf   : > { %5648 = vmatpush1.bf16.msra.mxu0 %v7825_v4  ;;  %5567 = vmatprep.subr.bf16.mxu1 %v7830_v5  ;;  %v7901_v4 = vld [vmem:[%s9039_s4 + $0xb78] ss:$60 sps:$4 sm:$0xff]   ;;  %v7898_v5 = vld [vmem:[%s9039_s4 + $0x3f0] ss:$60 sps:$4 sm:$0xff]  }
 0x6d0   : > { %5649 = vmatprep.subr.bf16.mxu0 %v7833_v6  ;;  %v7902_v6 = vld [vmem:[%s9039_s4 + $0x7b8] ss:$60 sps:$4 sm:$0xff]  }
 0x6d2   : > { %5568 = vmatpush1.bf16.msra.mxu1 %v7828_v8  ;;  %v7905_v8 = vld [vmem:[%s9039_s4 + $0x46c] ss:$60 sps:$4 sm:$0xff]  }
 0x6d3   : > { %5650 = vmatpush1.bf16.msra.mxu0 %v7831_v9  ;;  %5569 = vmatprep.subr.bf16.mxu1 %v7836_v12  ;;  %v7906_v9 = vld [vmem:[%s9039_s4 + $0xbf0] ss:$60 sps:$4 sm:$0xff]   ;;  %v7903_v12 = vld [vmem:[%s9039_s4 + $0x468] ss:$60 sps:$4 sm:$0xff]  }
 0x6d4   : > { %5651 = vmatprep.subr.bf16.mxu0 %v7839_v14  ;;  %v7907_v14 = vld [vmem:[%s9039_s4 + $0x830] ss:$60 sps:$4 sm:$0xff]  }
 0x6d6   : > { %5570 = vmatpush1.bf16.msra.mxu1 %v7834_v15  ;;  %v7910_v15 = vld [vmem:[%s9039_s4 + $0x4e4] ss:$60 sps:$4 sm:$0xff]  }
 0x6d7   : > { %5652 = vmatpush1.bf16.msra.mxu0 %v7837_v16  ;;  %5571 = vmatprep.subr.bf16.mxu1 %v7842_v52  ;;  %v7911_v16 = vld [vmem:[%s9039_s4 + $0xc68] ss:$60 sps:$4 sm:$0xff]   ;;  %v7908_v52 = vld [vmem:[%s9039_s4 + $0x4e0] ss:$60 sps:$4 sm:$0xff]  }
 0x6d8   : > { %5653 = vmatprep.subr.bf16.mxu0 %v7845_v18  ;;  %v7912_v18 = vld [vmem:[%s9039_s4 + $0x8a8] ss:$60 sps:$4 sm:$0xff]  }
 0x6da   : > { %5572 = vmatpush1.bf16.msra.mxu1 %v7840_v19  ;;  %v7915_v19 = vld [vmem:[%s9039_s4 + $0x55c] ss:$60 sps:$4 sm:$0xff]  }
 0x6db   : > { %5654 = vmatpush1.bf16.msra.mxu0 %v7843_v20  ;;  %5573 = vmatprep.subr.bf16.mxu1 %v7848_v21  ;;  %v7916_v20 = vld [vmem:[%s9039_s4 + $0xce0] ss:$60 sps:$4 sm:$0xff]   ;;  %v7913_v21 = vld [vmem:[%s9039_s4 + $0x558] ss:$60 sps:$4 sm:$0xff]  }
 0x6dc   : > { %5655 = vmatprep.subr.bf16.mxu0 %v7851_v22  ;;  %v7917_v22 = vld [vmem:[%s9039_s4 + $0x920] ss:$60 sps:$4 sm:$0xff]  }
 0x6de   : > { %5574 = vmatpush1.bf16.msra.mxu1 %v7846_v58  ;;  %v7920_v58 = vld [vmem:[%s9039_s4 + $0x5d4] ss:$60 sps:$4 sm:$0xff]  }
 0x6df   : > { %5656 = vmatpush1.bf16.msra.mxu0 %v7849_v24  ;;  %5575 = vmatprep.subr.bf16.mxu1 %v7854_v26  ;;  %v7921_v24 = vld [vmem:[%s9039_s4 + $0xd58] ss:$60 sps:$4 sm:$0xff]   ;;  %v7918_v26 = vld [vmem:[%s9039_s4 + $0x5d0] ss:$60 sps:$4 sm:$0xff]  }
 0x6e0   : > { %5657 = vmatprep.subr.bf16.mxu0 %v7857_v27  ;;  %v7922_v27 = vld [vmem:[%s9039_s4 + $0x998] ss:$60 sps:$4 sm:$0xff]  }
 0x6e2   : > { %5576 = vmatpush1.bf16.msra.mxu1 %v7852_v25  ;;  %v7925_v25 = vld [vmem:[%s9039_s4 + $0x64c] ss:$60 sps:$4 sm:$0xff]  }
 0x6e3   : > { %5658 = vmatpush1.bf16.msra.mxu0 %v7855_v29  ;;  %5668 = vmatprep.subr.bf16.mxu1 %v7860_v30  ;;  %v7926_v29 = vld [vmem:[%s9039_s4 + $0xdd0] ss:$60 sps:$4 sm:$0xff]   ;;  %v7923_v30 = vld [vmem:[%s9039_s4 + $0x648] ss:$60 sps:$4 sm:$0xff]  }
 0x6e4   : > { %6810 = vmatprep.subr.bf16.mxu0 %v7861_v31  ;;  %v7927_v31 = vld [vmem:[%s9039_s4 + $0xa10] ss:$60 sps:$4 sm:$0xff]  }
 0x6e5   : > { %5578 = vmatmul.mubr.bf16.vlgmr.msra.gmra.mrb[28].mxu1 %v9333_v23 }
 0x6e6   : > { %5660 = vmatmul.mubr.bf16.vlgmr.msra.gmra.mrb[52].mxu0 %v9333_v23  ;;  %5669 = vmatpush1.bf16.msra.mxu1 %v7858_v32  ;;  %v7930_v32 = vld [vmem:[%s9039_s4 + $0x6c4] ss:$60 sps:$4 sm:$0xff]  }
 0x6e7   : > { %5700 = vmatprep.mubr.bf16.mxu1 %v9250_v7  ;;  %6811 = vmatpush3.bf16.msra.mxu0 %v7862_v34  ;;  %v7931_v34 = vld [vmem:[%s9039_s4 + $0xe48] ss:$60 sps:$4 sm:$0xff]  }
 0x6e8   : > { %5782 = vmatprep.mubr.bf16.mxu0 %v9250_v7  ;;  %5670 = vmatprep.subr.bf16.mxu1 %v7865_v36  ;;  %v7873_v7 = vld [vmem:[%s9039_s4 + $0x198] ss:$60 sps:$4 sm:$0xff]   ;;  %v7928_v36 = vld [vmem:[%s9039_s4 + $0x6c0] ss:$60 sps:$4 sm:$0xff]  }
 0x6e9   : > { %6812 = vmatprep.subr.bf16.mxu0 %v7866_v38  ;;  %v7932_v38 = vld [vmem:[%s9039_s4 + $0xa88] ss:$60 sps:$4 sm:$0xff]  }
 0x6ea   : > { %5671 = vmatpush1.bf16.msra.mxu1 %v7863_v39  ;;  %v7935_v39 = vld [vmem:[%s9039_s4 + $0x73c] ss:$60 sps:$4 sm:$0xff]  }
 0x6eb   : > { %6813 = vmatpush3.bf16.msra.mxu0 %v7867_v17  ;;  %5672 = vmatprep.subr.bf16.mxu1 %v7870_v40  ;;  %v7936_v17 = vld [vmem:[%s9039_s4 + $0xec0] ss:$60 sps:$4 sm:$0xff]   ;;  %v7933_v40 = vld [vmem:[%s9039_s4 + $0x738] ss:$60 sps:$4 sm:$0xff]  }
 0x6ec   : > { %6814 = vmatprep.subr.bf16.mxu0 %v7871_v41  ;;  %v7937_v41 = vld [vmem:[%s9039_s4 + $0xb00] ss:$60 sps:$4 sm:$0xff]  }
 0x6ee   : > { %5673 = vmatpush1.bf16.msra.mxu1 %v7868_v42  ;;  %v7940_v42 = vld [vmem:[%s9039_s4 + $0x7b4] ss:$60 sps:$4 sm:$0xff]  }
 0x6ef   : > { %6815 = vmatpush3.bf16.msra.mxu0 %v7872_v43  ;;  %5674 = vmatprep.subr.bf16.mxu1 %v7875_v44  ;;  %v7938_v43 = vld [vmem:[%s9039_s4 + $0x7b0] ss:$60 sps:$4 sm:$0xff]  }
 0x6f0   : > { %6816 = vmatprep.subr.bf16.mxu0 %v7876_v45  ;;  %v7943_v44 = vld [vmem:[%s9039_s4 + $0x82c] ss:$60 sps:$4 sm:$0xff]  }
 0x6f1   : > { %v7941_v45 = vld [vmem:[%s9039_s4 + $0x828] ss:$60 sps:$4 sm:$0xff]  }
 0x6f2   : > { %5675 = vmatpush1.bf16.msra.mxu1 %v7873_v7  ;;  %v7946_v7 = vld [vmem:[%s9039_s4 + $0x8a4] ss:$60 sps:$4 sm:$0xff]  }
 0x6f3   : > { %6817 = vmatpush3.bf16.msra.mxu0 %v7877_v46  ;;  %5676 = vmatprep.subr.bf16.mxu1 %v7880_v47  ;;  %v7944_v46 = vld [vmem:[%s9039_s4 + $0x8a0] ss:$60 sps:$4 sm:$0xff]  }
 0x6f4   : > { %6818 = vmatprep.subr.bf16.mxu0 %v7881_v48  ;;  %v7949_v47 = vld [vmem:[%s9039_s4 + $0x91c] ss:$60 sps:$4 sm:$0xff]  }
 0x6f5   : > { %v7947_v48 = vld [vmem:[%s9039_s4 + $0x918] ss:$60 sps:$4 sm:$0xff]  }
 0x6f6   : > { %5677 = vmatpush1.bf16.msra.mxu1 %v7878_v49  ;;  %v7952_v49 = vld [vmem:[%s9039_s4 + $0x994] ss:$60 sps:$4 sm:$0xff]  }
 0x6f7   : > { %6819 = vmatpush3.bf16.msra.mxu0 %v7882_v50  ;;  %5678 = vmatprep.subr.bf16.mxu1 %v7885_v51  ;;  %v7950_v50 = vld [vmem:[%s9039_s4 + $0x990] ss:$60 sps:$4 sm:$0xff]   ;;  %v2695_v51 = vsub.s32 6, %v9163_v28 }
 0x6f8   : > { %6820 = vmatprep.subr.bf16.mxu0 %v7886_v54  ;;  %v2699_v54 = vsub.s32 7, %v9163_v28 }
 0x6fa   : > { %5679 = vmatpush1.bf16.msra.mxu1 %v7883_v56  ;;  %v7955_v56 = vld [vmem:[%s9039_s4 + $0xa0c] ss:$60 sps:$4 sm:$0xff]  }
 0x6fb   : > { %6821 = vmatpush3.bf16.msra.mxu0 %v7887_v55  ;;  %5680 = vmatprep.subr.bf16.mxu1 %v7890_v57  ;;  %v2696_v57 = vrot.slane %v9563_v11, %v2695_v51 }
 0x6fc   : > { %6822 = vmatprep.subr.bf16.mxu0 %v7891_v59 }
 0x6fe   : > { %5681 = vmatpush1.bf16.msra.mxu1 %v7888_v60  ;;  %v7953_v60 = vld [vmem:[%s9039_s4 + $0xa08] ss:$60 sps:$4 sm:$0xff]  }
 0x6ff   : > { %6823 = vmatpush3.bf16.msra.mxu0 %v7892_v61  ;;  %5682 = vmatprep.subr.bf16.mxu1 %v7895_v62  ;;  %v2700_v61 = vrot.slane %v9563_v11, %v2699_v54  ;;  %v7958_v62 = vld [vmem:[%s9039_s4 + $0xa84] ss:$60 sps:$4 sm:$0xff]  }
 0x700   : > { %6824 = vmatprep.subr.bf16.mxu0 %v7896_v63 }
 0x702   : > { %5683 = vmatpush1.bf16.msra.mxu1 %v7893_v0 }
 0x703   : > { %6825 = vmatpush3.bf16.msra.mxu0 %v7897_v1  ;;  %5684 = vmatprep.subr.bf16.mxu1 %v7900_v3 }
 0x704   : > { %6832 = vmatprep.subr.bf16.mxu0 %v7901_v4 }
 0x706   : > { %5783 = vmatmul.mubr.bf16.vlgmr.msra.gmra.mrb[56].mxu0 %v9254_v10  ;;  %5685 = vmatpush1.bf16.msra.mxu1 %v7898_v5 }
 0x707   : > { %6833 = vmatpush3.bf16.msra.mxu0 %v7902_v6  ;;  %5822 = vmatprep.mubr.bf16.mxu0 %v9260_v13 }
 0x708   : > { %5686 = vmatprep.subr.bf16.mxu1 %v7905_v8  ;;  %6834 = vmatprep.subr.bf16.mxu0 %v7906_v9  ;;  %v7956_v9 = vld [vmem:[%s9039_s4 + $0xa80] ss:$60 sps:$4 sm:$0xff]  }
 0x70a   : > { %5687 = vmatpush1.bf16.msra.mxu1 %v7903_v12 }
 0x70b   : > { %6835 = vmatpush3.bf16.msra.mxu0 %v7907_v14  ;;  %5688 = vmatprep.subr.bf16.mxu1 %v7910_v15  ;;  %v7961_v15 = vld [vmem:[%s9039_s4 + $0xafc] ss:$60 sps:$4 sm:$0xff]  }
 0x70c   : > { %6836 = vmatprep.subr.bf16.mxu0 %v7911_v16 }
 0x70e   : > { %5689 = vmatpush1.bf16.msra.mxu1 %v7908_v52 }
 0x70f   : > { %6837 = vmatpush3.bf16.msra.mxu0 %v7912_v18  ;;  %5690 = vmatprep.subr.bf16.mxu1 %v7915_v19 }
 0x710   : > { %6838 = vmatprep.subr.bf16.mxu0 %v7916_v20  ;;  %v7959_v20 = vld [vmem:[%s9039_s4 + $0xaf8] ss:$60 sps:$4 sm:$0xff]  }
 0x712   : > { %5691 = vmatpush1.bf16.msra.mxu1 %v7913_v21 }
 0x713   : > { %6839 = vmatpush3.bf16.msra.mxu0 %v7917_v22  ;;  %5692 = vmatprep.subr.bf16.mxu1 %v7920_v58  ;;  %v7964_v22 = vld [vmem:[%s9039_s4 + $0xb74] ss:$60 sps:$4 sm:$0xff]  }
 0x714   : > { %6840 = vmatprep.subr.bf16.mxu0 %v7921_v24  ;;  %v7962_v24 = vld [vmem:[%s9039_s4 + $0xb70] ss:$60 sps:$4 sm:$0xff]  }
 0x716   : > { %5693 = vmatpush1.bf16.msra.mxu1 %v7918_v26  ;;  %v7967_v26 = vld [vmem:[%s9039_s4 + $0xbec] ss:$60 sps:$4 sm:$0xff]  }
 0x717   : > { %6841 = vmatpush3.bf16.msra.mxu0 %v7922_v27  ;;  %5694 = vmatprep.subr.bf16.mxu1 %v7925_v25  ;;  %v7965_v27 = vld [vmem:[%s9039_s4 + $0xbe8] ss:$60 sps:$4 sm:$0xff]  }
 0x718   : > { %6842 = vmatprep.subr.bf16.mxu0 %v7926_v29  ;;  %v7970_v25 = vld [vmem:[%s9039_s4 + $0xc64] ss:$60 sps:$4 sm:$0xff]  }
 0x719   : > { %v7968_v29 = vld [vmem:[%s9039_s4 + $0xc60] ss:$60 sps:$4 sm:$0xff]  }
 0x71a   : > { %5695 = vmatpush1.bf16.msra.mxu1 %v7923_v30  ;;  %v7973_v30 = vld [vmem:[%s9039_s4 + $0xcdc] ss:$60 sps:$4 sm:$0xff]  }
 0x71b   : > { %6843 = vmatpush3.bf16.msra.mxu0 %v7927_v31  ;;  %5696 = vmatprep.subr.bf16.mxu1 %v7930_v32  ;;  %v7971_v31 = vld [vmem:[%s9039_s4 + $0xcd8] ss:$60 sps:$4 sm:$0xff]  }
 0x71c   : > { %6844 = vmatprep.subr.bf16.mxu0 %v7931_v34  ;;  %v7976_v32 = vld [vmem:[%s9039_s4 + $0xd54] ss:$60 sps:$4 sm:$0xff]  }
 0x71d   : > { %v7974_v34 = vld [vmem:[%s9039_s4 + $0xd50] ss:$60 sps:$4 sm:$0xff]  }
 0x71e   : > { %5697 = vmatpush1.bf16.msra.mxu1 %v7928_v36  ;;  %v7979_v36 = vld [vmem:[%s9039_s4 + $0xdcc] ss:$60 sps:$4 sm:$0xff]  }
 0x71f   : > { %6845 = vmatpush3.bf16.msra.mxu0 %v7932_v38  ;;  %5698 = vmatprep.subr.bf16.mxu1 %v7935_v39  ;;  %v7977_v38 = vld [vmem:[%s9039_s4 + $0xdc8] ss:$60 sps:$4 sm:$0xff]  }
 0x720   : > { %6846 = vmatprep.subr.bf16.mxu0 %v7936_v17  ;;  %v7982_v39 = vld [vmem:[%s9039_s4 + $0xe44] ss:$60 sps:$4 sm:$0xff]  }
 0x721   : > { %v7980_v17 = vld [vmem:[%s9039_s4 + $0xe40] ss:$60 sps:$4 sm:$0xff]  }
 0x722   : > { %5699 = vmatpush1.bf16.msra.mxu1 %v7933_v40  ;;  %v7985_v40 = vld [vmem:[%s9039_s4 + $0xebc] ss:$60 sps:$4 sm:$0xff]  }
 0x723   : > { %6847 = vmatpush3.bf16.msra.mxu0 %v7937_v41  ;;  %5709 = vmatprep.subr.bf16.mxu1 %v7940_v42  ;;  %v7983_v41 = vld [vmem:[%s9039_s4 + $0xeb8] ss:$60 sps:$4 sm:$0xff]   ;;  %s6777_s4 = smul.u32 480, %s8615_s0  ;;  %s8503_s0 = smov [#allocation24]  }
 0x724   : > { %v2666_v42 = vld [vmem:[%s9560_s13 + $0x8] sm:$0xff]  ;;  %s8386_s16 = sshll.u32 %s8503_s0, 4  ;;  %s8387_s16 = int_to_ptr.vmem [resolvable:$false] %s8386_s16 }
 0x725   : > { %5701 = vmatmul.mubr.bf16.vlgmr.msra.gmra.mrb[32].mxu1 %v9254_v10  ;;  %v2687_v10 = vsub.s32 4, %v9163_v28  ;;  %s9771_s10 = scalar_lea.hbm %s9923_s18, %s6777_s4  ;;  %s8388_s9 = scalar_lea.vmem %s8387_s16, 960 }
 0x726   : > { %5823 = vmatmul.mubr.bf16.vlgmr.msra.gmra.mrb[60].mxu0 %v9333_v23  ;;  %5710 = vmatpush1.bf16.msra.mxu1 %v7938_v43  ;;  %v2704_v43 = vrot.slane %v2666_v42, %v9166_v33  ;;  %p8389_p11 = scmp.lt.s32.totalorder %s9773_s12, %s8387_s16  ;;  %p8390_p10 = scmp.lt.s32.totalorder %s8388_s9, %s8382_s7 }
 0x727   : > { %5741 = vmatprep.mubr.bf16.mxu1 %v9260_v13  ;;  %5711 = vmatprep.subr.bf16.mxu1 %v7943_v44  ;;  %v2691_v13 = vsub.s32 5, %v9163_v28  ;;  %v2688_v55 = vrot.slane %v9563_v11, %v2687_v10  ;;  %v2712_v44 = vrot.slane %v2666_v42, %v9313_v2 }
 0x728   : > { %p8391_p7 = por %p8390_p10, %p8389_p11 }
 0x729   : > { %v2692_v59 = vrot.slane %v9563_v11, %v2691_v13 }
 0x72a   : > { %5712 = vmatpush1.bf16.msra.mxu1 %v7941_v45  ;;  %v2708_v45 = vrot.slane %v2666_v42, %v9169_v35  ;;  %p8392_p8 = pnand %p8391_p7, %p8385_p9 }
 0x72b   : > { %5713 = vmatprep.subr.bf16.mxu1 %v7946_v7  ;;  %v2716_v7 = vrot.slane %v2666_v42, %v9240_v53 }
 0x72e   : > { %5714 = vmatpush1.bf16.msra.mxu1 %v7944_v46 }
 0x72f   : > { %5715 = vmatprep.subr.bf16.mxu1 %v7949_v47 }
 0x732   : > { %5716 = vmatpush1.bf16.msra.mxu1 %v7947_v48 }
 0x733   : > { %5717 = vmatprep.subr.bf16.mxu1 %v7952_v49 }
 0x736   : > { %5718 = vmatpush1.bf16.msra.mxu1 %v7950_v50 }
 0x737   : > { %5719 = vmatprep.subr.bf16.mxu1 %v7955_v56 }
 0x738   : > { %v5415_v63 = vpop.f32.mrb[24].mxu1 }
 0x739   : > { %v6922_v0 = vadd.f32 %v5415_v63, %v2688_v55  ;;  %v5497_v1 = vpop.f32.mrb[48].mxu0  ;;  %v5417_v3 = vpop.f32.mrb[25].mxu1 }
 0x73a   : > { %v6924_v4 = vadd.f32 %v5497_v1, %v2696_v57  ;;  %v6923_v5 = vadd.f32 %v5417_v3, %v2692_v59  ;;  %v5499_v6 = vpop.f32.mrb[49].mxu0  ;;  %v5419_v8 = vpop.f32.mrb[26].mxu1  ;;  %5720 = vmatpush1.bf16.msra.mxu1 %v7953_v60 }
 0x73b   : > { %v6925_v12 = vadd.f32 %v5499_v6, %v2700_v61  ;;  %v5501_v14 = vpop.f32.mrb[50].mxu0  ;;  %v5420_v11 = vpop.f32.mrb[27].mxu1  ;;  %5721 = vmatprep.subr.bf16.mxu1 %v7958_v62 }
 0x73c   : > { %v5862_v16 = vcombine.low %v6922_v0, %v6923_v5  ;;  %v5502_v52 = vpop.f32.mrb[51].mxu0 }
 0x73d   : > { %v5863_v18 = vcombine.low %v6924_v4, %v6925_v12  ;;  %v2728_v4 = vrot.slane %v2666_v42, %v2695_v51 }
 0x73e   : > { %v5870_v19 = vrot.slane %v5862_v16, %v9581_v37  ;;  %5722 = vmatpush1.bf16.msra.mxu1 %v7956_v9  ;;  %v2724_v16 = vrot.slane %v2666_v42, %v2691_v13 }
 0x73f   : > { %v5877_v21 = vrot.slane %v5863_v18, %v9581_v37  ;;  %5723 = vmatprep.subr.bf16.mxu1 %v7961_v15  ;;  %v2720_v15 = vrot.slane %v2666_v42, %v2687_v10 }
 0x741   : > { %v5878_v58 = vcombine.low %v5870_v19, %v5877_v21 }
 0x742   : > { %5724 = vmatpush1.bf16.msra.mxu1 %v7959_v20 }
 0x743   : > { %5917 = vst [vmem:[%s9594_s17 + $0x8] sm:$0xff] %v5878_v58  ;;  %5725 = vmatprep.subr.bf16.mxu1 %v7964_v22 }
 0x746   : > { %5726 = vmatpush1.bf16.msra.mxu1 %v7962_v24 }
 0x747   : > { %5727 = vmatprep.subr.bf16.mxu1 %v7967_v26 }
 0x74a   : > { %5728 = vmatpush1.bf16.msra.mxu1 %v7965_v27 }
 0x74b   : > { %5729 = vmatprep.subr.bf16.mxu1 %v7970_v25 }
 0x74e   : > { %5730 = vmatpush1.bf16.msra.mxu1 %v7968_v29 }
 0x74f   : > { %5731 = vmatprep.subr.bf16.mxu1 %v7973_v30 }
 0x752   : > { %5732 = vmatpush1.bf16.msra.mxu1 %v7971_v31 }
 0x753   : > { %5733 = vmatprep.subr.bf16.mxu1 %v7976_v32 }
 0x756   : > { %5734 = vmatpush1.bf16.msra.mxu1 %v7974_v34 }
 0x757   : > { %5735 = vmatprep.subr.bf16.mxu1 %v7979_v36 }
 0x75a   : > { %5736 = vmatpush1.bf16.msra.mxu1 %v7977_v38 }
 0x75b   : > { %5737 = vmatprep.subr.bf16.mxu1 %v7982_v39 }
 0x75e   : > { %5738 = vmatpush1.bf16.msra.mxu1 %v7980_v17 }
 0x75f   : > { %5739 = vmatprep.subr.bf16.mxu1 %v7985_v40 }
 0x762   : > { %5740 = vmatpush1.bf16.msra.mxu1 %v7983_v41 }
 0x765   : > { %5742 = vmatmul.mubr.bf16.vlgmr.msra.gmra.mrb[32].mxu1 %v9333_v23 }
 0x7b8   : > { %v5579_v46 = vpop.f32.mrb[28].mxu1 }
 0x7b9   : > { %v6926_v47 = vadd.f32 %v5579_v46, %v2704_v43  ;;  %v5661_v48 = vpop.f32.mrb[52].mxu0  ;;  %v5581_v49 = vpop.f32.mrb[29].mxu1 }
 0x7ba   : > { %v6928_v50 = vadd.f32 %v5661_v48, %v2712_v44  ;;  %v6927_v54 = vadd.f32 %v5581_v49, %v2708_v45  ;;  %v5663_v56 = vpop.f32.mrb[53].mxu0  ;;  %v5583_v55 = vpop.f32.mrb[30].mxu1 }
 0x7bb   : > { %v6929_v57 = vadd.f32 %v5663_v56, %v2716_v7  ;;  %v5665_v23 = vpop.f32.mrb[54].mxu0  ;;  %v5584_v59 = vpop.f32.mrb[31].mxu1 }
 0x7bc   : > { %v5879_v60 = vcombine.low %v6926_v47, %v6927_v54  ;;  %v5666_v33 = vpop.f32.mrb[55].mxu0 }
 0x7bd   : > { %v5880_v61 = vcombine.low %v6928_v50, %v6929_v57 }
 0x7be   : > { %v5887_v2 = vrot.slane %v5879_v60, %v9581_v37 }
 0x7bf   : > { %v5894_v35 = vrot.slane %v5880_v61, %v9581_v37 }
 0x7c1   : > { %v5895_v53 = vcombine.low %v5887_v2, %v5894_v35 }
 0x7c3   : > { %5918 = vst [vmem:[%s9594_s17 + $0x10] sm:$0xff] %v5895_v53 }
 0x7d9   : > { %v6826_v62 = vpop.f32.mrb[56].mxu0 }
 0x7da   : > { %v6827_v63 = vpop.f32.mrb[57].mxu0 }
 0x7db   : > { %v6828_v0 = vadd.f32 %v6827_v63, %v6826_v62  ;;  %v6829_v1 = vpop.f32.mrb[58].mxu0 }
 0x7dc   : > { %v6830_v3 = vpop.f32.mrb[59].mxu0 }
 0x7dd   : > { %v5785_v8 = vadd.f32 %v6828_v0, %v2728_v4 }
 0x7f9   : > { %v6848_v5 = vpop.f32.mrb[60].mxu0 }
 0x7fa   : > { %v6849_v6 = vpop.f32.mrb[61].mxu0 }
 0x7fb   : > { %v6850_v9 = vadd.f32 %v6849_v6, %v6848_v5  ;;  %v6851_v12 = vpop.f32.mrb[62].mxu0 }
 0x7fc   : > { %v6852_v14 = vpop.f32.mrb[63].mxu0 }
 0x7fd   : > { %v5825_v11 = vadd.f32 %v6850_v9, %v5785_v8 }
 0x7ff   : > { %v5910_v58 = vrot.slane %v5825_v11, %v9581_v37 }
 0x838   : > { %v5743_v52 = vpop.f32.mrb[32].mxu1 }
 0x839   : > { %v6930_v18 = vadd.f32 %v5743_v52, %v2720_v15  ;;  %v5745_v51 = vpop.f32.mrb[33].mxu1 }
 0x83a   : > { %v6931_v19 = vadd.f32 %v5745_v51, %v2724_v16  ;;  %v5747_v20 = vpop.f32.mrb[34].mxu1 }
 0x83b   : > { %v5748_v21 = vpop.f32.mrb[35].mxu1 }
 0x83c   : > { %v5896_v22 = vcombine.low %v6930_v18, %v6931_v19 }
 0x83e   : > { %v5903_v24 = vrot.slane %v5896_v22, %v9581_v37 }
 0x840   : > { %v5911_v10 = vcombine.low %v5903_v24, %v5910_v58 }
 0x842   : > { %5919 = vst [vmem:[%s9594_s17 + $0x18] sm:$0x3f] %v5911_v10 }
 0x843   : > { %8395 = shalt.err (!%p8392_p8)
}
 0x844   : > { %s8396_s14 = scalar_lea.hbm %s9771_s10, 480  ;;  %s8400_s1 = scalar_lea.hbm %s9923_s18, 960 }
 0x845   : > { %p8397_p12 = scmp.ne.s32.totalorder %s9771_s10, %s8396_s14  ;;  %p8401_p6 = scmp.lt.u32.totalorder %s9771_s10, %s9923_s18 }
 0x846   : > { %p8402_p1 = scmp.lt.u32.totalorder %s8400_s1, %s8396_s14  ;;  %p8404_p3 = scmp.lt.u32.totalorder %s8396_s14, %s9771_s10 }
 0x847   : > { %p8398_p13 = pnand %p8397_p12, %p9924_p0 }
 0x848   : > { %p8403_p4 = por %p8402_p1, %p8401_p6 }
 0x849   : > { %p8399_p2 = pneg %p8398_p13 }
 0x84a   : > { %p8405_p5 = por %p8404_p3, %p8403_p4 }
 0x84c   : > { %p8406_p9 = pnand %p8405_p5, %p8399_p2 }
 0x84e   : > { %8409 = shalt.err (!%p8406_p9)
}
 0x84f   : > { %7019 = dma.vmem_to_hbm [thread:$0]  (%p9924_p0), %s9773_s12, 480, %s9771_s10, %s5921_s3  }
 0x850 PF: > { %s5947_s17 = sand.u32 1, %s8464_s24   ;;  %p9925_p11 = scmp.ne.s32.totalorder %s9886_s23, 0 }
 0x851   : > { %p9926_p10 = scmp.ge.s32.totalorder %s8476_s27, 2  ;;  %s5948_s4 = scalar_lea.sflag [#allocation4], %s5947_s17 }
 0x853   : > { %p7066_p7 = pnand %p9926_p10, %p9925_p11 }
 0x855   : > { %8459 = dma.done.wait (!%p7066_p7), %s5948_s4, 480  }
 0x856   : > { %8461 = vsyncadd (!%p7066_p7), %s5948_s4, 4294966816  ;;  %s9927_s28 = sld [smem:[#allocation35_spill]]  ;;  %p34_p8 = scmp.ge.s32.totalorder %s8777_s30, 4  }
 0x857   : > { %s9928_s24 = smov %s8468_s25  ;;  %s9929_s25 = smov %s8472_s26 }
 0x858   : > { %s9931_s27 = smov %s8777_s30  ;;  %36 = sbr.rel (!%p34_p8) target bundleno = 29 (0x1d), region = 191 }
 0x85c   : > { %s9930_s26 = smov %s9927_s28 }
 0x85f   :  { %5953 = vsyncpa [#allocation3], 1 }
 0x860   :  { %5955 = vsyncpa [#allocation3 + $0x1], 1 }
 0x861   :  { %5956 = vsyncpa [#allocation6], 1 }
 0x862   :  { %5957 = vsyncpa [#allocation9], 1 }
 0x863   :  { %5958 = vsyncpa [#allocation12], 1 }
 0x864   :  { %5959 = vsyncpa [#allocation15], 1 }
 0x865   :  { %5960 = vsyncpa [#allocation18], 1 }
 0x866   :  { %5961 = vsyncpa [#allocation21], 1 }
 0x867   :  { %5962 = vsyncpa [#allocation4], 1 }
 0x868   :  { %5964 = vsyncpa [#allocation4 + $0x1], 1 }

</bundles_post_ra>
